<compile_context>
chip_gen: v5e
topology: v5e:2x2
jax: 0.10.0
libtpu: 0.0.40
codegen_flags: <defaults>
</compile_context>

<pallas_src>
import jax
import jax.numpy as jnp
from jax.experimental import pallas as pl
from jax.experimental.pallas import tpu as pltpu


def _round_up(x, m):
    return ((x + m - 1) // m) * m


def make_bottleneck_kernel(N, H, W, Cin_p, Cw, Cout_p):
    """Builds a pallas_call for one full Bottleneck forward pass (NHWC, padded)."""
    assert Cin_p % 128 == 0 and Cw % 128 == 0 and Cout_p % 128 == 0
    assert Cin_p == Cout_p, "identity residual requires C_in == C_out"
    # W must be sublane-aligned so the im2col row offsets (multiples of W) are
    # aligned slices of the scratch buffer.
    assert W % 8 == 0, "this implementation requires W % 8 == 0"

    HW = H * W
    K2 = 3 * Cw  # fused K for each of the three row-tap matmuls

    def kernel(x_ref, w1_ref, w2_ref, w3_ref,
               s1_ref, b1_ref, s2_ref, b2_ref, s3_ref, b3_ref,
               o_ref, col_ref):
        # ---- conv1 (1x1) + bn1 + relu  (bf16 matmul, f32 accumulate) -------
        x2d = x_ref[0].reshape(HW, Cin_p)                       # bf16
        t1 = jnp.dot(x2d, w1_ref[...], preferred_element_type=jnp.float32)
        t1 = jnp.maximum(t1 * s1_ref[...] + b1_ref[...], 0.0)   # f32 epilogue
        t1f = t1.reshape(H, W, Cw)

        # ---- conv2 (3x3, stride 1, pad 1): fused-K im2col -------------------
        # kx shifts via XLU roll along the sublane (W) axis + boundary mask.
        col = jax.lax.broadcasted_iota(jnp.int32, (H, W, Cw), 1)
        left = jnp.where(col == 0, 0.0,
                         pltpu.roll(t1f, shift=1, axis=1))       # t1[:, x-1, :]
        right = jnp.where(col == W - 1, 0.0,
                          pltpu.roll(t1f, shift=W - 1, axis=1))  # t1[:, x+1, :]
        cat = jnp.concatenate([left.astype(jnp.bfloat16),
                               t1f.astype(jnp.bfloat16),
                               right.astype(jnp.bfloat16)], axis=-1)  # (H,W,3Cw)

        # Zero only the W-row halo at each end (cheap), not the whole scratch;
        # the interior is fully overwritten every step.  (Unconditional so the
        # kernel is safe when the parallel grid axis is split across cores.)
        col_ref[0:W, :] = jnp.zeros((W, K2), jnp.bfloat16)
        col_ref[(H + 1) * W:(H + 2) * W, :] = jnp.zeros((W, K2), jnp.bfloat16)
        col_ref[W:W + HW, :] = cat.reshape(HW, K2)

        # Three K = 3*Cw matmuls (one per ky tap), reading aligned row slices
        # of the haloed scratch; f32 accumulation.
        acc = jnp.zeros((HW, Cw), jnp.float32)
        for ky in range(3):
            acc = acc + jnp.dot(col_ref[ky * W:ky * W + HW, :], w2_ref[ky],
                                preferred_element_type=jnp.float32)
        t2 = jnp.maximum(acc * s2_ref[...] + b2_ref[...], 0.0).astype(jnp.bfloat16)

        # ---- conv3 (1x1) + bn3 + residual add + relu ------------------------
        t3 = jnp.dot(t2, w3_ref[...], preferred_element_type=jnp.float32)
        t3 = t3 * s3_ref[...] + b3_ref[...]
        # Re-read the residual from the (VMEM-resident) input block here
        # instead of keeping it live across all three convs.
        identity = x_ref[0].reshape(HW, Cin_p).astype(jnp.float32)
        out = jnp.maximum(t3 + identity, 0.0)
        o_ref[0] = out.reshape(H, W, Cout_p).astype(o_ref.dtype)

    grid_spec = pltpu.PrefetchScalarGridSpec(
        num_scalar_prefetch=0,
        grid=(N,),
        in_specs=[
            pl.BlockSpec((1, H, W, Cin_p), lambda n: (n, 0, 0, 0)),   # x (bf16)
            pl.BlockSpec((Cin_p, Cw), lambda n: (0, 0)),              # w1 (bf16)
            pl.BlockSpec((3, K2, Cw), lambda n: (0, 0, 0)),           # w2 im2col (bf16)
            pl.BlockSpec((Cw, Cout_p), lambda n: (0, 0)),             # w3 (bf16)
            pl.BlockSpec((1, Cw), lambda n: (0, 0)),                  # bn1 scale
            pl.BlockSpec((1, Cw), lambda n: (0, 0)),                  # bn1 bias
            pl.BlockSpec((1, Cw), lambda n: (0, 0)),                  # bn2 scale
            pl.BlockSpec((1, Cw), lambda n: (0, 0)),                  # bn2 bias
            pl.BlockSpec((1, Cout_p), lambda n: (0, 0)),              # bn3 scale
            pl.BlockSpec((1, Cout_p), lambda n: (0, 0)),              # bn3 bias
        ],
        out_specs=pl.BlockSpec((1, H, W, Cout_p), lambda n: (n, 0, 0, 0)),
        scratch_shapes=[pltpu.VMEM(((H + 2) * W, K2), jnp.bfloat16)],
    )

    return pl.pallas_call(
        kernel,
        grid_spec=grid_spec,
        out_shape=jax.ShapeDtypeStruct((N, H, W, Cout_p), jnp.float32),
        compiler_params=pltpu.CompilerParams(
            dimension_semantics=("parallel",),
            vmem_limit_bytes=48 * 1024 * 1024),   # fits v7x's 64 MiB with headroom
    )


def fold_bn(gamma, beta, mean, var, eps=1e-5):
    scale = gamma / jnp.sqrt(var + eps)
    bias = beta - mean * scale
    return scale, bias


def _pad_axis(a, axis, new_size):
    pad = [(0, 0)] * a.ndim
    pad[axis] = (0, new_size - a.shape[axis])
    return jnp.pad(a, pad)


def bottleneck_forward(x_nchw, params):
    """x_nchw: (N, C_in, H, W) float32 — matches the PyTorch input layout."""
    N, C_in, H, W = x_nchw.shape
    w1, w2, w3 = params["w1"], params["w2"], params["w3"]
    width = w1.shape[1]
    C_out = w3.shape[1]
    assert C_in == C_out, "identity residual requires inplanes == planes * 4"

    # Pad every channel dim to a multiple of 128 lanes (lane-dense stores,
    # full MXU columns even for tiny configs).
    Cin_p = _round_up(C_in, 128)
    Cw = _round_up(width, 128)
    Cout_p = _round_up(C_out, 128)

    # Fold BN (inference mode); zero-pad scale/bias so padded channels stay 0.
    s1, b1 = fold_bn(*params["bn1"])
    s2, b2 = fold_bn(*params["bn2"])
    s3, b3 = fold_bn(*params["bn3"])
    s1 = _pad_axis(s1, 0, Cw).reshape(1, Cw)
    b1 = _pad_axis(b1, 0, Cw).reshape(1, Cw)
    s2 = _pad_axis(s2, 0, Cw).reshape(1, Cw)
    b2 = _pad_axis(b2, 0, Cw).reshape(1, Cw)
    s3 = _pad_axis(s3, 0, Cout_p).reshape(1, Cout_p)
    b3 = _pad_axis(b3, 0, Cout_p).reshape(1, Cout_p)

    # Conv weights: zero-pad channel dims and cast to bf16 for the MXU.
    w1p = jnp.zeros((Cin_p, Cw), jnp.float32).at[:C_in, :width].set(w1)
    w1p = w1p.astype(jnp.bfloat16)
    w3p = jnp.zeros((Cw, Cout_p), jnp.float32).at[:width, :C_out].set(w3)
    w3p = w3p.astype(jnp.bfloat16)
    # conv2 weights in fused im2col layout: (ky, kx * Cw + c_in, c_out)
    w2p = jnp.zeros((3, 3 * Cw, Cw), jnp.float32)
    for ky in range(3):
        for kx in range(3):
            w2p = w2p.at[ky, kx * Cw:kx * Cw + width, :width].set(w2[ky, kx])
    w2p = w2p.astype(jnp.bfloat16)

    # NCHW -> NHWC, channel-pad, bf16 for halved DMA bytes.
    x_nhwc = jnp.transpose(x_nchw, (0, 2, 3, 1))
    x_nhwc = _pad_axis(x_nhwc, 3, Cin_p).astype(jnp.bfloat16)

    f = make_bottleneck_kernel(N, H, W, Cin_p, Cw, Cout_p)
    out_nhwc = f(x_nhwc, w1p, w2p, w3p, s1, b1, s2, b2, s3, b3)
    out_nhwc = out_nhwc[..., :C_out]
    return jnp.transpose(out_nhwc, (0, 3, 1, 2))  # NHWC -> NCHW


def reference_forward(x_nchw, params):
    """Pure-JAX f32 NHWC reference using lax.conv_general_dilated."""
    x = jnp.transpose(x_nchw, (0, 2, 3, 1))
    dn = ("NHWC", "HWIO", "NHWC")

    def bn(y, p):
        s, b = fold_bn(*p)
        return y * s.reshape(1, 1, 1, -1) + b.reshape(1, 1, 1, -1)

    w1 = params["w1"][None, None]                      # (1,1,Cin,width)
    w2 = params["w2"]                                  # (3,3,width,width)
    w3 = params["w3"][None, None]                      # (1,1,width,Cout)

    t = jax.lax.conv_general_dilated(x, w1, (1, 1), "VALID", dimension_numbers=dn)
    t = jnp.maximum(bn(t, params["bn1"]), 0.0)
    t = jax.lax.conv_general_dilated(t, w2, (1, 1), ((1, 1), (1, 1)),
                                     dimension_numbers=dn)
    t = jnp.maximum(bn(t, params["bn2"]), 0.0)
    t = jax.lax.conv_general_dilated(t, w3, (1, 1), "VALID", dimension_numbers=dn)
    t = bn(t, params["bn3"]) + x
    t = jnp.maximum(t, 0.0)
    return jnp.transpose(t, (0, 3, 1, 2))


if __name__ == "__main__":
    # Module config (defaults): stride=1, groups=1, base_width=64, dilation=1,
    # downsample=None.  inplanes = planes * expansion so the residual add works.
    planes = 4
    inplanes = planes * 4          # 16
    width = planes                 # int(planes * 64/64) * 1 = 4
    C_out = planes * 4             # 16
    N, H, W = 2, 16, 16

    key = jax.random.PRNGKey(0)
    ks = jax.random.split(key, 11)

    params = {
        # conv weights stored directly in matmul / HWIO layout
        "w1": jax.random.normal(ks[0], (inplanes, width), jnp.float32) * 0.1,
        "w2": jax.random.normal(ks[1], (3, 3, width, width), jnp.float32) * 0.1,
        "w3": jax.random.normal(ks[2], (width, C_out), jnp.float32) * 0.1,
        # bn params: (gamma, beta, running_mean, running_var)
        "bn1": (jax.random.normal(ks[3], (width,)) * 0.1 + 1.0,
                jax.random.normal(ks[4], (width,)) * 0.1,
                jax.random.normal(ks[5], (width,)) * 0.1,
                jnp.abs(jax.random.normal(ks[6], (width,))) * 0.1 + 1.0),
        "bn2": (jnp.ones((width,)), jnp.zeros((width,)),
                jnp.zeros((width,)), jnp.ones((width,))),
        "bn3": (jax.random.normal(ks[7], (C_out,)) * 0.1 + 1.0,
                jax.random.normal(ks[8], (C_out,)) * 0.1,
                jnp.zeros((C_out,)),
                jnp.abs(jax.random.normal(ks[9], (C_out,))) * 0.1 + 1.0),
    }

    x = jax.random.normal(ks[10], (N, inplanes, H, W), jnp.float32)

    out = jax.block_until_ready(bottleneck_forward(x, params))
    ref = reference_forward(x, params)

    assert out.shape == (N, C_out, H, W)
    # bf16 inputs/weights with f32 accumulation -> loose tolerance vs f32 ref.
    assert jnp.allclose(out, ref, atol=5e-2, rtol=5e-2), "mismatch vs reference"

    print("KERNEL_OK")
</pallas_src>

<mosaic_0001>
module attributes {stable_mosaic.version = 11 : i64} {
  func.func @kernel(%arg0: i32, %arg1: memref<1x16x16x128xbf16, #tpu.memory_space<vmem>>, %arg2: memref<128x128xbf16, #tpu.memory_space<vmem>>, %arg3: memref<3x384x128xbf16, #tpu.memory_space<vmem>>, %arg4: memref<128x128xbf16, #tpu.memory_space<vmem>>, %arg5: memref<1x128xf32, #tpu.memory_space<vmem>>, %arg6: memref<1x128xf32, #tpu.memory_space<vmem>>, %arg7: memref<1x128xf32, #tpu.memory_space<vmem>>, %arg8: memref<1x128xf32, #tpu.memory_space<vmem>>, %arg9: memref<1x128xf32, #tpu.memory_space<vmem>>, %arg10: memref<1x128xf32, #tpu.memory_space<vmem>>, %arg11: memref<1x16x16x128xf32, #tpu.memory_space<vmem>>, %arg12: memref<288x384xbf16, #tpu.memory_space<vmem>>) attributes {dimension_semantics = [#tpu.dimension_semantics<parallel>], iteration_bounds = array<i64: 2>, scalar_prefetch = 0 : i64, scratch_operands = 1 : i64, tpu.core_type = #tpu.core_type<tc>, window_params = [{transform_indices = @transform_0, window_bounds = array<i64: 1, 16, 16, 128>}, {pipeline_mode = #tpu.pipeline_mode<synchronous>, transform_indices = @transform_1, window_bounds = array<i64: 128, 128>}, {pipeline_mode = #tpu.pipeline_mode<synchronous>, transform_indices = @transform_2, window_bounds = array<i64: 3, 384, 128>}, {pipeline_mode = #tpu.pipeline_mode<synchronous>, transform_indices = @transform_3, window_bounds = array<i64: 128, 128>}, {pipeline_mode = #tpu.pipeline_mode<synchronous>, transform_indices = @transform_4, window_bounds = array<i64: 1, 128>}, {pipeline_mode = #tpu.pipeline_mode<synchronous>, transform_indices = @transform_5, window_bounds = array<i64: 1, 128>}, {pipeline_mode = #tpu.pipeline_mode<synchronous>, transform_indices = @transform_6, window_bounds = array<i64: 1, 128>}, {pipeline_mode = #tpu.pipeline_mode<synchronous>, transform_indices = @transform_7, window_bounds = array<i64: 1, 128>}, {pipeline_mode = #tpu.pipeline_mode<synchronous>, transform_indices = @transform_8, window_bounds = array<i64: 1, 128>}, {pipeline_mode = #tpu.pipeline_mode<synchronous>, transform_indices = @transform_9, window_bounds = array<i64: 1, 128>}, {transform_indices = @transform_10, window_bounds = array<i64: 1, 16, 16, 128>}]} {
    %c0 = arith.constant 0 : index
    %c0_0 = arith.constant 0 : index
    %c0_1 = arith.constant 0 : index
    %c0_2 = arith.constant 0 : index
    %0 = vector.load %arg1[%c0, %c0_0, %c0_1, %c0_2] : memref<1x16x16x128xbf16, #tpu.memory_space<vmem>>, vector<1x16x16x128xbf16>
    %1 = vector.shape_cast %0 : vector<1x16x16x128xbf16> to vector<16x16x128xbf16>
    %2 = vector.shape_cast %1 : vector<16x16x128xbf16> to vector<256x128xbf16>
    %c0_3 = arith.constant 0 : index
    %c0_4 = arith.constant 0 : index
    %3 = vector.load %arg2[%c0_3, %c0_4] : memref<128x128xbf16, #tpu.memory_space<vmem>>, vector<128x128xbf16>
    %cst = arith.constant dense<0.000000e+00> : vector<256x128xf32>
    %4 = tpu.matmul %2, %3, %cst {dimension_numbers = #tpu.dot_dimension_numbers<[1], [0], [0], [1], [0, 0, 1, 1], [], []>} : vector<256x128xbf16>, vector<128x128xbf16>, vector<256x128xf32> -> vector<256x128xf32>
    %c0_5 = arith.constant 0 : index
    %c0_6 = arith.constant 0 : index
    %5 = vector.load %arg5[%c0_5, %c0_6] : memref<1x128xf32, #tpu.memory_space<vmem>>, vector<1x128xf32>
    %6 = vector.broadcast %5 : vector<1x128xf32> to vector<256x128xf32>
    %7 = arith.mulf %4, %6 : vector<256x128xf32>
    %c0_7 = arith.constant 0 : index
    %c0_8 = arith.constant 0 : index
    %8 = vector.load %arg6[%c0_7, %c0_8] : memref<1x128xf32, #tpu.memory_space<vmem>>, vector<1x128xf32>
    %9 = vector.broadcast %8 : vector<1x128xf32> to vector<256x128xf32>
    %10 = arith.addf %7, %9 : vector<256x128xf32>
    %cst_9 = arith.constant 0.000000e+00 : f32
    %11 = vector.broadcast %cst_9 : f32 to vector<256x128xf32>
    %12 = arith.maximumf %10, %11 : vector<256x128xf32>
    %13 = vector.shape_cast %12 : vector<256x128xf32> to vector<16x16x128xf32>
    %14 = tpu.iota {dimensions = array<i32: 1>} : vector<16x16x128xi32>
    %c0_i32 = arith.constant 0 : i32
    %15 = vector.broadcast %c0_i32 : i32 to vector<16x16x128xi32>
    %16 = arith.cmpi eq, %14, %15 : vector<16x16x128xi32>
    %c1_i32 = arith.constant 1 : i32
    %17 = tpu.dynamic_rotate %13 by %c1_i32 dim 1 : vector<16x16x128xf32>, i32 -> vector<16x16x128xf32>
    %cst_10 = arith.constant 0.000000e+00 : f32
    %18 = vector.broadcast %cst_10 : f32 to vector<16x16x128xf32>
    %19 = arith.select %16, %18, %17 : vector<16x16x128xi1>, vector<16x16x128xf32>
    %c15_i32 = arith.constant 15 : i32
    %20 = vector.broadcast %c15_i32 : i32 to vector<16x16x128xi32>
    %21 = arith.cmpi eq, %14, %20 : vector<16x16x128xi32>
    %c15_i32_11 = arith.constant 15 : i32
    %22 = tpu.dynamic_rotate %13 by %c15_i32_11 dim 1 : vector<16x16x128xf32>, i32 -> vector<16x16x128xf32>
    %cst_12 = arith.constant 0.000000e+00 : f32
    %23 = vector.broadcast %cst_12 : f32 to vector<16x16x128xf32>
    %24 = arith.select %21, %23, %22 : vector<16x16x128xi1>, vector<16x16x128xf32>
    %25 = arith.truncf %19 : vector<16x16x128xf32> to vector<16x16x128xbf16>
    %26 = arith.truncf %13 : vector<16x16x128xf32> to vector<16x16x128xbf16>
    %27 = arith.truncf %24 : vector<16x16x128xf32> to vector<16x16x128xbf16>
    %28 = tpu.concatenate %25, %26, %27 in 2 : vector<16x16x128xbf16>, vector<16x16x128xbf16>, vector<16x16x128xbf16> -> vector<16x16x384xbf16>
    %cst_13 = arith.constant 0.000000e+00 : bf16
    %29 = vector.broadcast %cst_13 : bf16 to vector<16x384xbf16>
    %c0_14 = arith.constant 0 : index
    %c0_15 = arith.constant 0 : index
    %30 = vector.load %arg12[%c0_14, %c0_15] : memref<288x384xbf16, #tpu.memory_space<vmem>>, vector<16x384xbf16>
    tpu.vector_store %arg12[%c0_14, %c0_15], %29 {strides = array<i32>} : memref<288x384xbf16, #tpu.memory_space<vmem>>, vector<16x384xbf16>,
    %cst_16 = arith.constant 0.000000e+00 : bf16
    %31 = vector.broadcast %cst_16 : bf16 to vector<16x384xbf16>
    %c272 = arith.constant 272 : index
    %c0_17 = arith.constant 0 : index
    %32 = vector.load %arg12[%c272, %c0_17] : memref<288x384xbf16, #tpu.memory_space<vmem>>, vector<16x384xbf16>
    tpu.vector_store %arg12[%c272, %c0_17], %31 {strides = array<i32>} : memref<288x384xbf16, #tpu.memory_space<vmem>>, vector<16x384xbf16>,
    %33 = vector.shape_cast %28 : vector<16x16x384xbf16> to vector<256x384xbf16>
    %c16 = arith.constant 16 : index
    %c0_18 = arith.constant 0 : index
    %34 = vector.load %arg12[%c16, %c0_18] : memref<288x384xbf16, #tpu.memory_space<vmem>>, vector<256x384xbf16>
    tpu.vector_store %arg12[%c16, %c0_18], %33 {strides = array<i32>} : memref<288x384xbf16, #tpu.memory_space<vmem>>, vector<256x384xbf16>,
    %cst_19 = arith.constant 0.000000e+00 : f32
    %35 = vector.broadcast %cst_19 : f32 to vector<256x128xf32>
    %c0_20 = arith.constant 0 : index
    %c0_21 = arith.constant 0 : index
    %36 = vector.load %arg12[%c0_20, %c0_21] : memref<288x384xbf16, #tpu.memory_space<vmem>>, vector<256x384xbf16>
    %c0_22 = arith.constant 0 : index
    %c0_23 = arith.constant 0 : index
    %c0_24 = arith.constant 0 : index
    %37 = vector.load %arg3[%c0_22, %c0_23, %c0_24] : memref<3x384x128xbf16, #tpu.memory_space<vmem>>, vector<1x384x128xbf16>
    %38 = vector.shape_cast %37 : vector<1x384x128xbf16> to vector<384x128xbf16>
    %cst_25 = arith.constant dense<0.000000e+00> : vector<256x128xf32>
    %39 = tpu.matmul %36, %38, %cst_25 {dimension_numbers = #tpu.dot_dimension_numbers<[1], [0], [0], [1], [0, 0, 1, 1], [], []>} : vector<256x384xbf16>, vector<384x128xbf16>, vector<256x128xf32> -> vector<256x128xf32>
    %40 = arith.addf %35, %39 : vector<256x128xf32>
    %c16_26 = arith.constant 16 : index
    %c0_27 = arith.constant 0 : index
    %41 = vector.load %arg12[%c16_26, %c0_27] : memref<288x384xbf16, #tpu.memory_space<vmem>>, vector<256x384xbf16>
    %c1 = arith.constant 1 : index
    %c0_28 = arith.constant 0 : index
    %c0_29 = arith.constant 0 : index
    %42 = vector.load %arg3[%c1, %c0_28, %c0_29] : memref<3x384x128xbf16, #tpu.memory_space<vmem>>, vector<1x384x128xbf16>
    %43 = vector.shape_cast %42 : vector<1x384x128xbf16> to vector<384x128xbf16>
    %cst_30 = arith.constant dense<0.000000e+00> : vector<256x128xf32>
    %44 = tpu.matmul %41, %43, %cst_30 {dimension_numbers = #tpu.dot_dimension_numbers<[1], [0], [0], [1], [0, 0, 1, 1], [], []>} : vector<256x384xbf16>, vector<384x128xbf16>, vector<256x128xf32> -> vector<256x128xf32>
    %45 = arith.addf %40, %44 : vector<256x128xf32>
    %c32 = arith.constant 32 : index
    %c0_31 = arith.constant 0 : index
    %46 = vector.load %arg12[%c32, %c0_31] : memref<288x384xbf16, #tpu.memory_space<vmem>>, vector<256x384xbf16>
    %c2 = arith.constant 2 : index
    %c0_32 = arith.constant 0 : index
    %c0_33 = arith.constant 0 : index
    %47 = vector.load %arg3[%c2, %c0_32, %c0_33] : memref<3x384x128xbf16, #tpu.memory_space<vmem>>, vector<1x384x128xbf16>
    %48 = vector.shape_cast %47 : vector<1x384x128xbf16> to vector<384x128xbf16>
    %cst_34 = arith.constant dense<0.000000e+00> : vector<256x128xf32>
    %49 = tpu.matmul %46, %48, %cst_34 {dimension_numbers = #tpu.dot_dimension_numbers<[1], [0], [0], [1], [0, 0, 1, 1], [], []>} : vector<256x384xbf16>, vector<384x128xbf16>, vector<256x128xf32> -> vector<256x128xf32>
    %50 = arith.addf %45, %49 : vector<256x128xf32>
    %c0_35 = arith.constant 0 : index
    %c0_36 = arith.constant 0 : index
    %51 = vector.load %arg7[%c0_35, %c0_36] : memref<1x128xf32, #tpu.memory_space<vmem>>, vector<1x128xf32>
    %52 = vector.broadcast %51 : vector<1x128xf32> to vector<256x128xf32>
    %53 = arith.mulf %50, %52 : vector<256x128xf32>
    %c0_37 = arith.constant 0 : index
    %c0_38 = arith.constant 0 : index
    %54 = vector.load %arg8[%c0_37, %c0_38] : memref<1x128xf32, #tpu.memory_space<vmem>>, vector<1x128xf32>
    %55 = vector.broadcast %54 : vector<1x128xf32> to vector<256x128xf32>
    %56 = arith.addf %53, %55 : vector<256x128xf32>
    %cst_39 = arith.constant 0.000000e+00 : f32
    %57 = vector.broadcast %cst_39 : f32 to vector<256x128xf32>
    %58 = arith.maximumf %56, %57 : vector<256x128xf32>
    %59 = arith.truncf %58 : vector<256x128xf32> to vector<256x128xbf16>
    %c0_40 = arith.constant 0 : index
    %c0_41 = arith.constant 0 : index
    %60 = vector.load %arg4[%c0_40, %c0_41] : memref<128x128xbf16, #tpu.memory_space<vmem>>, vector<128x128xbf16>
    %cst_42 = arith.constant dense<0.000000e+00> : vector<256x128xf32>
    %61 = tpu.matmul %59, %60, %cst_42 {dimension_numbers = #tpu.dot_dimension_numbers<[1], [0], [0], [1], [0, 0, 1, 1], [], []>} : vector<256x128xbf16>, vector<128x128xbf16>, vector<256x128xf32> -> vector<256x128xf32>
    %c0_43 = arith.constant 0 : index
    %c0_44 = arith.constant 0 : index
    %62 = vector.load %arg9[%c0_43, %c0_44] : memref<1x128xf32, #tpu.memory_space<vmem>>, vector<1x128xf32>
    %63 = vector.broadcast %62 : vector<1x128xf32> to vector<256x128xf32>
    %64 = arith.mulf %61, %63 : vector<256x128xf32>
    %c0_45 = arith.constant 0 : index
    %c0_46 = arith.constant 0 : index
    %65 = vector.load %arg10[%c0_45, %c0_46] : memref<1x128xf32, #tpu.memory_space<vmem>>, vector<1x128xf32>
    %66 = vector.broadcast %65 : vector<1x128xf32> to vector<256x128xf32>
    %67 = arith.addf %64, %66 : vector<256x128xf32>
    %c0_47 = arith.constant 0 : index
    %c0_48 = arith.constant 0 : index
    %c0_49 = arith.constant 0 : index
    %c0_50 = arith.constant 0 : index
    %68 = vector.load %arg1[%c0_47, %c0_48, %c0_49, %c0_50] : memref<1x16x16x128xbf16, #tpu.memory_space<vmem>>, vector<1x16x16x128xbf16>
    %69 = vector.shape_cast %68 : vector<1x16x16x128xbf16> to vector<16x16x128xbf16>
    %70 = vector.shape_cast %69 : vector<16x16x128xbf16> to vector<256x128xbf16>
    %71 = arith.extf %70 : vector<256x128xbf16> to vector<256x128xf32>
    %72 = arith.addf %67, %71 : vector<256x128xf32>
    %cst_51 = arith.constant 0.000000e+00 : f32
    %73 = vector.broadcast %cst_51 : f32 to vector<256x128xf32>
    %74 = arith.maximumf %72, %73 : vector<256x128xf32>
    %75 = vector.shape_cast %74 : vector<256x128xf32> to vector<16x16x128xf32>
    %c0_52 = arith.constant 0 : index
    %c0_53 = arith.constant 0 : index
    %c0_54 = arith.constant 0 : index
    %c0_55 = arith.constant 0 : index
    %76 = vector.load %arg11[%c0_52, %c0_53, %c0_54, %c0_55] : memref<1x16x16x128xf32, #tpu.memory_space<vmem>>, vector<1x16x16x128xf32>
    %77 = vector.shape_cast %76 : vector<1x16x16x128xf32> to vector<16x16x128xf32>
    %78 = vector.shape_cast %75 : vector<16x16x128xf32> to vector<1x16x16x128xf32>
    tpu.vector_store %arg11[%c0_52, %c0_53, %c0_54, %c0_55], %78 {strides = array<i32>} : memref<1x16x16x128xf32, #tpu.memory_space<vmem>>, vector<1x16x16x128xf32>,
    return
  }
  func.func @transform_0(%arg0: i32) -> (i32, i32, i32, i32) {
    %c0_i32 = arith.constant 0 : i32
    %c0_i32_0 = arith.constant 0 : i32
    %c0_i32_1 = arith.constant 0 : i32
    %c0_i32_2 = arith.constant 0 : i32
    return %arg0, %c0_i32, %c0_i32_0, %c0_i32_1 : i32, i32, i32, i32
  }
  func.func @transform_1(%arg0: i32) -> (i32, i32) {
    %c0_i32 = arith.constant 0 : i32
    %c0_i32_0 = arith.constant 0 : i32
    %c0_i32_1 = arith.constant 0 : i32
    return %c0_i32, %c0_i32_0 : i32, i32
  }
  func.func @transform_2(%arg0: i32) -> (i32, i32, i32) {
    %c0_i32 = arith.constant 0 : i32
    %c0_i32_0 = arith.constant 0 : i32
    %c0_i32_1 = arith.constant 0 : i32
    %c0_i32_2 = arith.constant 0 : i32
    return %c0_i32, %c0_i32_0, %c0_i32_1 : i32, i32, i32
  }
  func.func @transform_3(%arg0: i32) -> (i32, i32) {
    %c0_i32 = arith.constant 0 : i32
    %c0_i32_0 = arith.constant 0 : i32
    %c0_i32_1 = arith.constant 0 : i32
    return %c0_i32, %c0_i32_0 : i32, i32
  }
  func.func @transform_4(%arg0: i32) -> (i32, i32) {
    %c0_i32 = arith.constant 0 : i32
    %c0_i32_0 = arith.constant 0 : i32
    %c0_i32_1 = arith.constant 0 : i32
    return %c0_i32, %c0_i32_0 : i32, i32
  }
  func.func @transform_5(%arg0: i32) -> (i32, i32) {
    %c0_i32 = arith.constant 0 : i32
    %c0_i32_0 = arith.constant 0 : i32
    %c0_i32_1 = arith.constant 0 : i32
    return %c0_i32, %c0_i32_0 : i32, i32
  }
  func.func @transform_6(%arg0: i32) -> (i32, i32) {
    %c0_i32 = arith.constant 0 : i32
    %c0_i32_0 = arith.constant 0 : i32
    %c0_i32_1 = arith.constant 0 : i32
    return %c0_i32, %c0_i32_0 : i32, i32
  }
  func.func @transform_7(%arg0: i32) -> (i32, i32) {
    %c0_i32 = arith.constant 0 : i32
    %c0_i32_0 = arith.constant 0 : i32
    %c0_i32_1 = arith.constant 0 : i32
    return %c0_i32, %c0_i32_0 : i32, i32
  }
  func.func @transform_8(%arg0: i32) -> (i32, i32) {
    %c0_i32 = arith.constant 0 : i32
    %c0_i32_0 = arith.constant 0 : i32
    %c0_i32_1 = arith.constant 0 : i32
    return %c0_i32, %c0_i32_0 : i32, i32
  }
  func.func @transform_9(%arg0: i32) -> (i32, i32) {
    %c0_i32 = arith.constant 0 : i32
    %c0_i32_0 = arith.constant 0 : i32
    %c0_i32_1 = arith.constant 0 : i32
    return %c0_i32, %c0_i32_0 : i32, i32
  }
  func.func @transform_10(%arg0: i32) -> (i32, i32, i32, i32) {
    %c0_i32 = arith.constant 0 : i32
    %c0_i32_0 = arith.constant 0 : i32
    %c0_i32_1 = arith.constant 0 : i32
    %c0_i32_2 = arith.constant 0 : i32
    return %arg0, %c0_i32, %c0_i32_0, %c0_i32_1 : i32, i32, i32, i32
  }
}

</mosaic_0001>

<bundles_post_ra>
// kernel: tpu_custom_call.1
= control target key start
LH: loop header
LB: loop body
LE: loop exit
PB: predicated region body
PF: predicated region fallthrough
CT: control target
= control target key end

     0   :  { %s7139_s0 = inlined_call_operand.hbm [shape: bf16[2,16,16,128], index: 0, kind: input, shape index: {}]   ;;  %s7140_s1 = inlined_call_operand.hbm [shape: bf16[128,128], index: 1, kind: input, shape index: {}]   ;;  %s7141_s2 = inlined_call_operand.hbm [shape: bf16[3,384,128], index: 2, kind: input, shape index: {}]   ;;  %s7142_s3 = inlined_call_operand.hbm [shape: bf16[128,128], index: 3, kind: input, shape index: {}]   ;;  %s7143_s4 = inlined_call_operand.vmem [shape: f32[1,128], index: 4, kind: input, shape index: {}]   ;;  %s7144_s5 = inlined_call_operand.vmem [shape: f32[1,128], index: 5, kind: input, shape index: {}]   ;;  %s7145_s6 = inlined_call_operand.vmem [shape: f32[1,128], index: 6, kind: input, shape index: {}]   ;;  %s7146_s7 = inlined_call_operand.vmem [shape: f32[1,128], index: 7, kind: input, shape index: {}]   ;;  %s7147_s8 = inlined_call_operand.vmem [shape: f32[1,128], index: 8, kind: input, shape index: {}]   ;;  %s7148_s9 = inlined_call_operand.vmem [shape: f32[1,128], index: 9, kind: input, shape index: {}]   ;;  %s7149_s10 = inlined_call_operand.hbm [shape: f32[2,16,16,128], index: 10, kind: output, shape index: {}]  }
   0x1   :  { %7153 = sst [smem:[#allocation31_spill]] %s7140_s1 }
   0x2   :  { %7154 = sst [smem:[#allocation32_spill]] %s7141_s2 }
   0x3   :  { %7155 = sst [smem:[#allocation33_spill]] %s7142_s3 }
   0x4   :  { %15 = vsyncpa [#allocation4], 0 }
   0x5   :  { %17 = vsyncpa [#allocation4 + $0x1], 0 }
   0x6   :  { %18 = vsyncpa [#allocation7], 0 }
   0x7   :  { %19 = vsyncpa [#allocation10], 0 }
   0x8   :  { %20 = vsyncpa [#allocation5], 0 }
   0x9   :  { %22 = vsyncpa [#allocation5 + $0x1], 0  ;;  %s5688_s13 = smov 0   ;;  %s5690_s14 = smov 0  }
   0xa   :  { %s5692_s15 = smov 0   ;;  %s5694_s16 = smov 0  }
   0xb LB: > { %s5709_s17 = sadd.s32 4294967295, %s5623_s16   ;;  %s4199_s18 = sadd.s32 4294967294, %s5623_s16   ;;  %s5623_s16 = sphi %s5694_s16, %s7221_s16   ;;  %s5619_s15 = sphi %s5692_s15, %s7220_s15   ;;  %s5615_s14 = sphi %s5690_s14, %s7219_s14   ;;  %s5611_s13 = sphi %s5688_s13, %s7218_s13  }
   0xc   : > { %p48_p0 = scmp.ne.s32.totalorder %s5615_s14, %s5611_s13  ;;  %p49_p1 = scmp.eq.s32.totalorder %s5709_s17, 0 }
   0xd   : > { %p261_p2 = scmp.eq.s32.totalorder %s5709_s17, 1  ;;  %p267_p3 = scmp.eq.s32.totalorder %s4199_s18, 1 }
   0xe   : > { %p5718_p4 = por %p49_p1, %p48_p0  ;;  %p4200_p5 = scmp.ge.s32.totalorder %s5623_s16, 1 }
   0xf   : > { %p5723_p6 = por %p267_p3, %p48_p0  ;;  %p274_p7 = scmp.lt.s32.totalorder %s5623_s16, 3 }
  0x10   : > { %s7158_s1 = sld [smem:[#allocation31_spill]]  ;;  %s5625_s25 = smov [#allocation6]  }
  0x11   : > { %p5731_p8 = pnand %p4200_p5, %p274_p7  ;;  %s287_s26 = sshll.u32 %s5625_s25, 4  ;;  %s288_s26 = int_to_ptr.vmem [resolvable:$true] %s287_s26 }
  0x12   : > { %s7161_s2 = sld [smem:[#allocation32_spill]]  ;;  %s7150_s11 = smov 64  }
  0x13   : > { %p5355_p9 = pneg %p5731_p8  ;;  %s7151_s12 = smov 4  }
  0x14   : > { %s5628_s18 = smov [#allocation8]   ;;  %s7162_s3 = sld [smem:[#allocation33_spill]] }
  0x15   : > { %p5739_p10 = pnand %p5355_p9, %p49_p1  ;;  %s301_s21 = sshll.u32 %s5628_s18, 4  ;;  %s302_s21 = int_to_ptr.vmem [resolvable:$true] %s301_s21 }
  0x16   : > { %s285_s23 = sshll.u32 %s7158_s1, 4  ;;  %s5761_s29 = sadd.s32 1, %s5623_s16   ;;  %s286_s23 = int_to_ptr.hbm [resolvable:$true] %s285_s23 }
  0x17   : > { %5358 = dma.hbm_to_vmem [thread:$0]  (!%p5739_p10), %s286_s23, 1024, %s288_s26, [#allocation7], %s7150_s11, %s7150_s11, %s7151_s12  }
  0x18   : > { %s299_s30 = sshll.u32 %s7161_s2, 4  ;;  %s5629_s23 = smov [#allocation9]   ;;  %s300_s30 = int_to_ptr.hbm [resolvable:$true] %s299_s30 }
  0x19   : > { %5361 = dma.hbm_to_vmem [thread:$0]  (!%p5739_p10), %s300_s30, 9216, %s302_s21, [#allocation7], %s7150_s11, %s7150_s11, %s7151_s12  }
  0x1a   : > { %s313_s28 = sshll.u32 %s7162_s3, 4  ;;  %s315_s26 = sshll.u32 %s5629_s23, 4  ;;  %s314_s28 = int_to_ptr.hbm [resolvable:$true] %s313_s28  ;;  %s316_s26 = int_to_ptr.vmem [resolvable:$true] %s315_s26 }
  0x1b   : > { %5364 = dma.hbm_to_vmem [thread:$0]  (!%p5739_p10), %s314_s28, 1024, %s316_s26, [#allocation10], %s7150_s11, %s7150_s11, %s7151_s12  }
  0x1c   : > { %s32_s18 = ssub.s32 %s5623_s16, %s5761_s29  ;;  %s35_s22 = sadd.s32 1, %s5619_s15 }
  0x1d   : > { %p33_p12 = scmp.eq.s32.totalorder %s32_s18, 0  ;;  %p42_p13 = scmp.ne.s32.totalorder %s5619_s15, %s5615_s14 }
  0x1e   : > { %p43_p0 = scmp.eq.s32.totalorder %s5623_s16, 0  ;;  %p5376_p5 = scmp.lt.s32.totalorder %s5623_s16, 2 }
  0x1f   : > { %s5775_s25 = scalar_select %p33_p12, %s5619_s15, %s35_s22  }
  0x20   : > { %p5779_p3 = por %p261_p2, %p42_p13  ;;  %s347_s21 = sand.u32 1, %s5619_s15  }
  0x21   : > { %7163 = sst [smem:[#allocation16_spill]] %s5775_s25  ;;  %s5031_s27 = sshll.u32 %s5623_s16, 7 }
  0x22   : > { %p44_p7 = por %p43_p0, %p42_p13  ;;  %s4205_s23 = sshll.u32 %s347_s21, 7 }
  0x23   : > { %s356_s28 = scalar_lea.hbm %s7139_s0, %s5031_s27  ;;  %s351_s18 = scalar_lea.vmem [#allocation3], %s4205_s23 }
  0x24   : > { %s357_s26 = sshll.u32 %s356_s28, 4  ;;  %s359_s11 = sshll.u32 %s351_s18, 4  ;;  %s358_s26 = int_to_ptr.hbm [resolvable:$true] %s357_s26  ;;  %s360_s11 = int_to_ptr.vmem [resolvable:$true] %s359_s11 }
  0x25   : > { %p5789_p9 = pnand %p5376_p5, %p44_p7  ;;  %s348_s12 = scalar_lea.sflag [#allocation4], %s347_s21 }
  0x26   : > { %s5519_s3 = sshra.s32 %s358_s26, 4  ;;  %s5526_s27 = scalar_lea.hbm %s7139_s0, 256  ;;  %s5520_s3 = int_to_ptr.hbm [resolvable:$true] %s5519_s3 }
  0x27   : > { %s5521_s25 = scalar_lea.hbm %s5520_s3, 128  ;;  %p5523_p10 = pneg %p5789_p9 }
  0x28   : > { %p5522_p2 = scmp.ne.s32.totalorder %s5520_s3, %s5521_s25  ;;  %p5527_p0 = scmp.lt.s32.totalorder %s5520_s3, %s7139_s0 }
  0x29   : > { %p5528_p5 = scmp.lt.s32.totalorder %s5526_s27, %s5521_s25 }
  0x2a   : > { %p5524_p12 = pnand %p5523_p10, %p5522_p2 }
  0x2b   : > { %p5529_p7 = por %p5528_p5, %p5527_p0 }
  0x2c   : > { %p5525_p13 = pneg %p5524_p12 }
  0x2e   : > { %p5530_p11 = pnand %p5529_p7, %p5525_p13 }
  0x30   : > { %5533 = shalt.err (!%p5530_p11)
}
  0x31   : > { %s7166_s21 = smov 4   ;;  %s7167_s18 = smov 64  }
  0x32   : > { %5368 = dma.hbm_to_vmem [thread:$0]  (!%p5789_p9), %s358_s26, 2048, %s360_s11, %s348_s12, %s7167_s18, %s7167_s18, %s7166_s21  }
  0x33   : > { %371 = sbr.rel (%p5731_p8) target bundleno = 1249 (0x4e1), region = 60 }
  0x38   : > { %s5809_s1 = sand.u32 1, %s5615_s14  }
  0x39   : > { %s4209_s3 = sshll.u32 %s5809_s1, 7  ;;  %s374_s25 = scalar_lea.sflag [#allocation4], %s5809_s1 }
  0x3a   : > { %s5813_s2 = scalar_lea.vmem [#allocation3], %s4209_s3 }
  0x3b   : > { %5594 = dma.done.wait (%p5718_p4), %s374_s25, 2048  }
  0x3c   : > { %5596 = vsyncadd (%p5718_p4), %s374_s25, 4294965248 }
  0x3d   : > { %5598 = dma.done.wait (%p49_p1), [#allocation7], 10240  }
  0x3e   : > { %5600 = vsyncadd (%p49_p1), [#allocation7], 4294957056 }
  0x3f   : > { %5602 = dma.done.wait (%p49_p1), [#allocation10], 1024  }
  0x40   : > { %5604 = vsyncadd (%p49_p1), [#allocation10], 4294966272  ;;  %v5055_v0 = vld [vmem:[#allocation6 + $0x38] sm:$0xff]  ;;  %v5054_v1 = vld [vmem:[#allocation6 + $0x30] sm:$0xff]  ;;  %v816_v39 = vlaneseq  ;;  %s4213_s12 = sshll.u32 %s5809_s1, 8  ;;  %s5235_s22 = sshll.u32 %s5709_s17, 8 }
  0x41   : > { %623 = vmatpush.bf16.msra.mxu0 %v5055_v0  ;;  %5315 = vmatpush.bf16.msra.mxu3 %v5055_v0  ;;  %v5053_v2 = vld [vmem:[#allocation6 + $0x28] sm:$0xff]  ;;  %v5052_v3 = vld [vmem:[#allocation6 + $0x20] sm:$0xff]  ;;  %v5051_v4 = vld [vmem:[#allocation6 + $0x18] sm:$0xff]  ;;  %s6952_s26 = scalar_lea.vmem [#allocation11], %s4213_s12  ;;  %s4093_s28 = scalar_lea.hbm %s7149_s10, %s5235_s22 }
  0x42   : > { %v5050_v5 = vld [vmem:[#allocation6 + $0x10] sm:$0xff]  ;;  %v5049_v6 = vld [vmem:[#allocation6 + $0x8] sm:$0xff]  ;;  %v5048_v7 = vld [vmem:[#allocation6] sm:$0xff]  ;;  %v5870_v42 = vshrl.u32 %v816_v39, 7  ;;  %s4096_s21 = sshll.u32 %s4093_s28, 4  ;;  %s4082_s17 = scalar_lea.sflag [#allocation5], %s5809_s1  ;;  %s4097_s21 = int_to_ptr.hbm [resolvable:$true] %s4096_s21 }
  0x43   : > { %v5032_v8 = vld [vmem:[%s5813_s2] sm:$0xff]  ;;  %v5033_v10 = vld [vmem:[%s5813_s2 + $0x8] sm:$0xff]  ;;  %v5034_v12 = vld [vmem:[%s5813_s2 + $0x10] sm:$0xff]  ;;  %s5563_s18 = sshra.s32 %s4097_s21, 4  ;;  %s5569_s24 = scalar_lea.hbm %s7149_s10, 512  ;;  %s5564_s18 = int_to_ptr.hbm [resolvable:$true] %s5563_s18 }
  0x44   : > { %v5044_v9 = vld [vmem:[%s5813_s2 + $0x60] sm:$0xff]  ;;  %v5045_v11 = vld [vmem:[%s5813_s2 + $0x68] sm:$0xff]  ;;  %v5046_v13 = vld [vmem:[%s5813_s2 + $0x70] sm:$0xff]  ;;  %v5878_v49 = vadd.s32 8, %v5870_v42  ;;  %vm819_vm0 = vcmp.eq.s32.totalorder %v5870_v42, 0  ;;  %vm853_vm1 = vcmp.lt.s32.totalorder %v5870_v42, 1  ;;  %p5570_p11 = scmp.lt.s32.totalorder %s5564_s18, %s7149_s10 }
  0x45   : > { %624 = vmatpush.bf16.msra.mxu0 %v5054_v1  ;;  %5316 = vmatpush.bf16.msra.mxu3 %v5054_v1  ;;  %v5035_v14 = vld [vmem:[%s5813_s2 + $0x18] sm:$0xff]  ;;  %v5036_v16 = vld [vmem:[%s5813_s2 + $0x20] sm:$0xff]  ;;  %v5037_v17 = vld [vmem:[%s5813_s2 + $0x28] sm:$0xff]  ;;  %vm952_vm3 = vcmp.lt.s32.totalorder %v5870_v42, 7  ;;  %s5565_s3 = scalar_lea.hbm %s5564_s18, 256 }
  0x46   : > { %v5047_v15 = vld [vmem:[%s5813_s2 + $0x78] sm:$0xff]  ;;  %v5038_v18 = vld [vmem:[%s5813_s2 + $0x30] sm:$0xff]  ;;  %v5136_v23 = vld [vmem:[#allocation8 + $0xe8] sm:$0xff]  ;;  %vm919_vm2 = vcmp.eq.s32.totalorder %v5878_v49, 15  ;;  %p5566_p1 = scmp.ne.s32.totalorder %s5564_s18, %s5565_s3  ;;  %p5571_p9 = scmp.lt.s32.totalorder %s5569_s24, %s5565_s3 }
  0x47   : > { %v5138_v19 = vld [vmem:[#allocation8 + $0xf8] sm:$0xff]  ;;  %v5137_v21 = vld [vmem:[#allocation8 + $0xf0] sm:$0xff]  ;;  %v5841_v24 = vld [vmem:[#allocation8 + $0x128] sm:$0xff] }
  0x48   : > { %v5146_v20 = vld [vmem:[#allocation8 + $0x138] sm:$0xff]  ;;  %2070 = vmatpush.bf16.msra.mxu1 %v5138_v19  ;;  %v5838_v22 = vld [vmem:[#allocation8 + $0x130] sm:$0xff]  ;;  %v5135_v26 = vld [vmem:[#allocation8 + $0xe0] sm:$0xff]  ;;  %p5567_p4 = pnand %p5566_p1, %p5779_p3  ;;  %p5572_p2 = por %p5571_p9, %p5570_p11 }
  0x49   : > { %625 = vmatpush.bf16.msra.mxu0 %v5053_v2  ;;  %5317 = vmatpush.bf16.msra.mxu3 %v5053_v2  ;;  %v5039_v25 = vld [vmem:[%s5813_s2 + $0x38] sm:$0xff]  ;;  %v5845_v27 = vld [vmem:[#allocation8 + $0x120] sm:$0xff]  ;;  %v5133_v30 = vld [vmem:[#allocation8 + $0xd0] sm:$0xff] }
  0x4a   : > { %2159 = vmatpush.bf16.msra.mxu2 %v5146_v20  ;;  %v5134_v28 = vld [vmem:[#allocation8 + $0xd8] sm:$0xff]  ;;  %v5851_v31 = vld [vmem:[#allocation8 + $0x110] sm:$0xff]  ;;  %v5040_v33 = vld [vmem:[%s5813_s2 + $0x40] sm:$0xff]  ;;  %p5568_p8 = pneg %p5567_p4 }
  0x4b   : > { %v5848_v29 = vld [vmem:[#allocation8 + $0x118] sm:$0xff]  ;;  %v5856_v32 = vld [vmem:[%s7143_s4] ss:$0 sm:$0xff]  ;;  %v5132_v36 = vld [vmem:[#allocation8 + $0xc8] sm:$0xff] }
  0x4c   : > { %2071 = vmatpush.bf16.msra.mxu1 %v5137_v21  ;;  %v5863_v35 = vld [vmem:[%s7144_s5] ss:$0 sm:$0xff]  ;;  %v5865_v37 = vld [vmem:[#allocation8 + $0x108] sm:$0xff]  ;;  %v5131_v44 = vld [vmem:[#allocation8 + $0xc0] sm:$0xff]  ;;  %p5573_p10 = pnand %p5572_p2, %p5568_p8 }
  0x4d   : > { %626 = vmatpush.bf16.msra.mxu0 %v5052_v3  ;;  %5318 = vmatpush.bf16.msra.mxu3 %v5052_v3  ;;  %v5873_v45 = vld [vmem:[#allocation8 + $0x100] sm:$0xff]  ;;  %v5111_v52 = vld [vmem:[#allocation8 + $0x38] sm:$0xff]  ;;  %v5041_v61 = vld [vmem:[%s5813_s2 + $0x48] sm:$0xff] }
  0x4e   : > { %2160 = vmatpush.bf16.msra.mxu2 %v5838_v22  ;;  %v5110_v62 = vld [vmem:[#allocation8 + $0x30] sm:$0xff]  ;;  %v5123_v49 = vld [vmem:[#allocation8 + $0x98] sm:$0xff] }
  0x50   : > { %2072 = vmatpush.bf16.msra.mxu1 %v5136_v23 }
  0x51   : > { %627 = vmatpush.bf16.msra.mxu0 %v5051_v4  ;;  %5319 = vmatpush.bf16.msra.mxu3 %v5051_v4 }
  0x52   : > { %2161 = vmatpush.bf16.msra.mxu2 %v5841_v24 }
  0x54   : > { %2073 = vmatpush.bf16.msra.mxu1 %v5135_v26 }
  0x55   : > { %628 = vmatpush.bf16.msra.mxu0 %v5050_v5  ;;  %5320 = vmatpush.bf16.msra.mxu3 %v5050_v5 }
  0x56   : > { %2162 = vmatpush.bf16.msra.mxu2 %v5845_v27 }
  0x58   : > { %2074 = vmatpush.bf16.msra.mxu1 %v5134_v28 }
  0x59   : > { %629 = vmatpush.bf16.msra.mxu0 %v5049_v6  ;;  %5321 = vmatpush.bf16.msra.mxu3 %v5049_v6 }
  0x5a   : > { %2163 = vmatpush.bf16.msra.mxu2 %v5848_v29 }
  0x5c   : > { %2075 = vmatpush.bf16.msra.mxu1 %v5133_v30 }
  0x5d   : > { %630 = vmatpush.bf16.msra.mxu0 %v5048_v7  ;;  %5322 = vmatpush.bf16.msra.mxu3 %v5048_v7 }
  0x5e   : > { %2164 = vmatpush.bf16.msra.mxu2 %v5851_v31 }
  0x60   : > { %631 = vmatmul.bf16.vlgmr.msra.gmra.mxu0 %v5032_v8  ;;  %691 = vmatmul.bf16.vlgmr.msra.gmra.mxu3 %v5044_v9 }
  0x61   : > { %5323 = vmatpush.bf16.msrb.mxu3 %v5138_v19  ;;  %2076 = vmatpush.bf16.msra.mxu1 %v5132_v36 }
  0x62   : > { %2165 = vmatpush.bf16.msra.mxu2 %v5865_v37  ;;  %2497 = vmatpush.bf16.msrb.mxu0 %v5111_v52 }
  0x65   : > { %5324 = vmatpush.bf16.msrb.mxu3 %v5137_v21  ;;  %2077 = vmatpush.bf16.msra.mxu1 %v5131_v44 }
  0x66   : > { %2166 = vmatpush.bf16.msra.mxu2 %v5873_v45  ;;  %2498 = vmatpush.bf16.msrb.mxu0 %v5110_v62 }
  0x69   : > { %5325 = vmatpush.bf16.msrb.mxu3 %v5136_v23 }
  0x6d   : > { %5326 = vmatpush.bf16.msrb.mxu3 %v5135_v26 }
  0x70   : > { %636 = vmatmul.bf16.gmra.mxu0 %v5033_v10  ;;  %696 = vmatmul.bf16.gmra.mxu3 %v5045_v11 }
  0x71   : > { %5327 = vmatpush.bf16.msrb.mxu3 %v5134_v28 }
  0x75   : > { %5328 = vmatpush.bf16.msrb.mxu3 %v5133_v30 }
  0x79   : > { %5329 = vmatpush.bf16.msrb.mxu3 %v5132_v36 }
  0x7d   : > { %5330 = vmatpush.bf16.msrb.mxu3 %v5131_v44 }
  0x80   : > { %641 = vmatmul.bf16.gmra.mxu0 %v5034_v12  ;;  %701 = vmatmul.bf16.gmra.mxu3 %v5046_v13 }
  0x81   : > { %5331 = vmatpush.bf16.msra.mxu3 %v5146_v20  ;;  %v5119_v20 = vld [vmem:[#allocation8 + $0x78] sm:$0xff] }
  0x82   : > { %2586 = vmatpush.bf16.msrb.mxu1 %v5119_v20 }
  0x85   : > { %5332 = vmatpush.bf16.msra.mxu3 %v5838_v22 }
  0x89   : > { %5333 = vmatpush.bf16.msra.mxu3 %v5841_v24 }
  0x8d   : > { %5334 = vmatpush.bf16.msra.mxu3 %v5845_v27 }
  0x90   : > { %646 = vmatmul.bf16.gmra.mxu0 %v5035_v14  ;;  %706 = vmatmul.bf16.gmra.mxu3 %v5047_v15  ;;  %v5109_v15 = vld [vmem:[#allocation8 + $0x28] sm:$0xff] }
  0x91   : > { %2499 = vmatpush.bf16.msrb.mxu0 %v5109_v15  ;;  %5335 = vmatpush.bf16.msra.mxu3 %v5848_v29 }
  0x95   : > { %5336 = vmatpush.bf16.msra.mxu3 %v5851_v31 }
  0x99   : > { %5337 = vmatpush.bf16.msra.mxu3 %v5865_v37 }
  0x9d   : > { %5338 = vmatpush.bf16.msra.mxu3 %v5873_v45 }
  0xa0   : > { %651 = vmatmul.bf16.gmra.mxu0 %v5036_v16 }
  0xb0   : > { %656 = vmatmul.bf16.gmra.mxu0 %v5037_v17 }
  0xc0   : > { %661 = vmatmul.bf16.gmra.mxu0 %v5038_v18 }
  0xd0   : > { %666 = vmatmul.bf16.gmra.mxu0 %v5039_v25 }
  0xdd   : > { %v632_v34 = vpop.f32.mrf.mxu0 }
  0xde   : > { %v716_v38 = vmul.f32 %v5856_v32, %v632_v34 }
  0xe0   : > { %671 = vmatmul.bf16.gmra.mxu0 %v5040_v33  ;;  %v752_v40 = vadd.f32 %v5863_v35, %v716_v38 }
  0xe2   : > { %v784_v46 = vmax.f32 %v752_v40, 0.0  ;;  %v5108_v40 = vld [vmem:[#allocation8 + $0x20] sm:$0xff] }
  0xe3   : > { %v692_v41 = vpop.f32.mrf.mxu3  ;;  %2500 = vmatpush.bf16.msrb.mxu0 %v5108_v40 }
  0xe4   : > { %v740_v43 = vmul.f32 %v5856_v32, %v692_v41  ;;  %v1049_v53 = vpack.c.bf16 %v784_v46, %v784_v46  ;;  %v821_v55 = vrot.slane %v784_v46, 7  ;;  %v920_v57 = vrot.slane %v784_v46, 1 }
  0xe5   : > { %v634_v47 = vpop.f32.mrf.mxu0 }
  0xe6   : > { %v717_v48 = vmul.f32 %v5856_v32, %v634_v47  ;;  %v776_v50 = vadd.f32 %v5863_v35, %v740_v43  ;;  %v1209_v63 = vunpack.c.l.b16 %v1049_v53 }
  0xe8   : > { %v753_v51 = vadd.f32 %v5863_v35, %v717_v48  ;;  %v5886_v58 = vmax.f32 %v776_v50, 0.0 }
  0xea   : > { %v785_v54 = vmax.f32 %v753_v51, 0.0  ;;  %v833_v11 = vrot.slane %v5886_v58, 7  ;;  %v932_v21 = vrot.slane %v5886_v58, 1  ;;  %v1073_v26 = vpack.c.bf16 %v5886_v58, %v5886_v58 }
  0xeb   : > { %v694_v56 = vpop.f32.mrf.mxu3 }
  0xec   : > { %v837_v59 = vrot.slane %v785_v54, 7  ;;  %v936_v60 = vrot.slane %v785_v54, 1  ;;  %v1050_v0 = vpack.c.bf16 %v785_v54, %v785_v54  ;;  %v741_v1 = vmul.f32 %v5856_v32, %v694_v56 }
  0xed   : > { %v637_v2 = vpop.f32.mrf.mxu0 }
  0xee   : > { %v854_v3 = vsel %vm853_vm1, %v821_v55, %v837_v59  ;;  %v870_v4 = vsel %vm853_vm1, %v837_v59, %v821_v55  ;;  %v953_v5 = vsel %vm952_vm3, %v920_v57, %v936_v60  ;;  %v969_v6 = vsel %vm952_vm3, %v936_v60, %v920_v57 }
  0xef   : > { %v886_v7 = vsel %vm819_vm0, 0.0, %v870_v4  ;;  %v986_v8 = vsel %vm919_vm2, 0.0, %v969_v6  ;;  %v1018_v9 = vpack.c.bf16 %v854_v3, %v854_v3  ;;  %v1081_v10 = vpack.c.bf16 %v953_v5, %v953_v5 }
  0xf0   : > { %v1017_v12 = vpack.c.bf16 %v886_v7, %v886_v7  ;;  %v1082_v13 = vpack.c.bf16 %v986_v8, %v986_v8  ;;  %v777_v14 = vadd.f32 %v5863_v35, %v741_v1  ;;  %676 = vmatmul.bf16.gmra.mxu0 %v5041_v61  ;;  %v1210_v17 = vunpack.c.l.b16 %v1050_v0  ;;  %v5042_v8 = vld [vmem:[%s5813_s2 + $0x50] sm:$0xff] }
  0xf1   : > { %v1146_v16 = vunpack.c.l.b16 %v1018_v9  ;;  %v1273_v18 = vunpack.c.l.b16 %v1081_v10  ;;  %v718_v19 = vmul.f32 %v5856_v32, %v637_v2  ;;  %v1233_v55 = vunpack.c.l.b16 %v1073_v26 }
  0xf2   : > { %v1145_v22 = vunpack.c.l.b16 %v1017_v12  ;;  %v1274_v23 = vunpack.c.l.b16 %v1082_v13  ;;  %v809_v25 = vmax.f32 %v777_v14, 0.0 }
  0xf3   : > { %v1314_v28 = vpack.c.b16 %v1273_v18, %v1273_v18  ;;  %v1315_v30 = vpack.c.b16 %v1210_v17, %v1146_v16  ;;  %v754_v33 = vadd.f32 %v5863_v35, %v718_v19  ;;  %v697_v24 = vpop.f32.mrf.mxu3 }
  0xf4   : > { %v1313_v34 = vpack.c.b16 %v1209_v63, %v1145_v22  ;;  %v1316_v36 = vpack.c.b16 %v1274_v23, %v1274_v23  ;;  %v849_v38 = vrot.slane %v809_v25, 7  ;;  %v948_v39 = vrot.slane %v809_v25, 1  ;;  %v5107_v23 = vld [vmem:[#allocation8 + $0x18] sm:$0xff] }
  0xf5   : > { %1442 = vst [vmem:[#allocation2 + $0x20] sm:$0xf] %v1314_v28  ;;  %v1074_v41 = vpack.c.bf16 %v809_v25, %v809_v25  ;;  %v5912_v43 = vmax.f32 %v754_v33, 0.0  ;;  %v742_v44 = vmul.f32 %v5856_v32, %v697_v24  ;;  %v639_v46 = vpop.f32.mrf.mxu0  ;;  %2501 = vmatpush.bf16.msrb.mxu0 %v5107_v23  ;;  %v5043_v23 = vld [vmem:[%s5813_s2 + $0x58] sm:$0xff] }
  0xf6   : > { %1441 = vst [vmem:[#allocation2 + $0x18] sm:$0xff] %v1313_v34  ;;  %v866_v47 = vsel %vm853_vm1, %v833_v11, %v849_v38  ;;  %v882_v48 = vsel %vm853_vm1, %v849_v38, %v833_v11  ;;  %v965_v50 = vsel %vm952_vm3, %v932_v21, %v948_v39  ;;  %v981_v27 = vsel %vm952_vm3, %v948_v39, %v932_v21 }
  0xf7   : > { %1443 = vst [vmem:[#allocation2 + $0x24] sm:$0xff] %v1315_v30  ;;  %v910_v51 = vsel %vm819_vm0, 0.0, %v882_v48  ;;  %v1010_v52 = vsel %vm919_vm2, 0.0, %v981_v27  ;;  %v1042_v53 = vpack.c.bf16 %v866_v47, %v866_v47  ;;  %v1105_v54 = vpack.c.bf16 %v965_v50, %v965_v50 }
  0xf8   : > { %1444 = vst [vmem:[#allocation2 + $0x2c] sm:$0xf] %v1316_v36  ;;  %v1041_v56 = vpack.c.bf16 %v910_v51, %v910_v51  ;;  %v1106_v57 = vpack.c.bf16 %v1010_v52, %v1010_v52  ;;  %v1234_v58 = vunpack.c.l.b16 %v1074_v41  ;;  %v1051_v61 = vpack.c.bf16 %v5912_v43, %v5912_v43  ;;  %v5106_v41 = vld [vmem:[#allocation8 + $0x10] sm:$0xff] }
  0xf9   : > { %v1170_v59 = vunpack.c.l.b16 %v1042_v53  ;;  %v1297_v60 = vunpack.c.l.b16 %v1105_v54  ;;  %v778_v0 = vadd.f32 %v5863_v35, %v742_v44  ;;  %v719_v1 = vmul.f32 %v5856_v32, %v639_v46  ;;  %2502 = vmatpush.bf16.msrb.mxu0 %v5106_v41 }
  0xfa   : > { %v1169_v62 = vunpack.c.l.b16 %v1041_v56  ;;  %v1298_v63 = vunpack.c.l.b16 %v1106_v57  ;;  %v822_v9 = vrot.slane %v5912_v43, 7  ;;  %v921_v10 = vrot.slane %v5912_v43, 1 }
  0xfb   : > { %v1362_v2 = vpack.c.b16 %v1297_v60, %v1297_v60  ;;  %v1363_v3 = vpack.c.b16 %v1234_v58, %v1170_v59  ;;  %v699_v4 = vpop.f32.mrf.mxu3  ;;  %v5932_v7 = vmax.f32 %v778_v0, 0.0  ;;  %v755_v29 = vadd.f32 %v5863_v35, %v719_v1 }
  0xfc   : > { %v1361_v5 = vpack.c.b16 %v1233_v55, %v1169_v62  ;;  %v1364_v6 = vpack.c.b16 %v1298_v63, %v1298_v63  ;;  %v743_v11 = vmul.f32 %v5856_v32, %v699_v4  ;;  %v5940_v14 = vunpack.c.l.b16 %v1051_v61  ;;  %v5105_v62 = vld [vmem:[#allocation8 + $0x8] sm:$0xff] }
  0xfd   : > { %1490 = vst [vmem:[#allocation2 + $0x140] sm:$0xf] %v1362_v2  ;;  %v642_v12 = vpop.f32.mrf.mxu0  ;;  %v4312_v13 = vld [vmem:[#allocation2 + $0x18] sm:$0xf]  ;;  %v1075_v15 = vpack.c.bf16 %v5932_v7, %v5932_v7  ;;  %v787_v16 = vmax.f32 %v755_v29, 0.0  ;;  %v834_v31 = vrot.slane %v5932_v7, 7  ;;  %2503 = vmatpush.bf16.msrb.mxu0 %v5105_v62 }
  0xfe   : > { %1489 = vst [vmem:[#allocation2 + $0x138] sm:$0xff] %v1361_v5  ;;  %v5060_v17 = vld [vmem:[#allocation2 + $0x20] sm:$0xf0]  ;;  %v5059_v18 = vld [vmem:[#allocation2 + $0x1c] sm:$0xf]  ;;  %v779_v19 = vadd.f32 %v5863_v35, %v743_v11  ;;  %v720_v20 = vmul.f32 %v5856_v32, %v642_v12  ;;  %v933_v25 = vrot.slane %v5932_v7, 1 }
  0xff   : > { %1491 = vst [vmem:[#allocation2 + $0x144] sm:$0xff] %v1363_v3  ;;  %v5947_v21 = vor.u32 %v5060_v17, %v4312_v13  ;;  %v4314_v22 = vld [vmem:[#allocation2 + $0x24] sm:$0xf0]  ;;  %v838_v26 = vrot.slane %v787_v16, 7  ;;  %v937_v28 = vrot.slane %v787_v16, 1  ;;  %v1052_v30 = vpack.c.bf16 %v787_v16, %v787_v16 }
 0x100   : > { %1492 = vst [vmem:[#allocation2 + $0x14c] sm:$0xf] %v1364_v6  ;;  %681 = vmatmul.bf16.gmra.mxu0 %v5042_v8  ;;  %v5951_v33 = vunpack.c.l.b16 %v1075_v15  ;;  %v811_v24 = vmax.f32 %v779_v19, 0.0  ;;  %v756_v34 = vadd.f32 %v5863_v35, %v720_v20  ;;  %v5955_v36 = vor.u32 %v5059_v18, %v4314_v22  ;;  %v5104_v19 = vld [vmem:[#allocation8] sm:$0xff] }
 0x101   : > { %2078 = vmatmul.bf16.vlgmr.msra.gmra.mxu1 %v5947_v21  ;;  %v855_v38 = vsel %vm853_vm1, %v822_v9, %v838_v26  ;;  %v871_v39 = vsel %vm853_vm1, %v838_v26, %v822_v9  ;;  %v954_v40 = vsel %vm952_vm3, %v921_v10, %v937_v28  ;;  %v970_v37 = vsel %vm952_vm3, %v937_v28, %v921_v10 }
 0x102   : > { %v888_v43 = vsel %vm819_vm0, 0.0, %v871_v39  ;;  %v988_v44 = vsel %vm919_vm2, 0.0, %v970_v37  ;;  %v1020_v46 = vpack.c.bf16 %v855_v38, %v855_v38  ;;  %v1083_v47 = vpack.c.bf16 %v954_v40, %v954_v40  ;;  %2167 = vmatmul.bf16.vlgmr.msra.gmra.mxu2 %v5955_v36  ;;  %2504 = vmatpush.bf16.msrb.mxu0 %v5104_v19 }
 0x103   : > { %v702_v48 = vpop.f32.mrf.mxu3  ;;  %v1019_v50 = vpack.c.bf16 %v888_v43, %v888_v43  ;;  %v1084_v27 = vpack.c.bf16 %v988_v44, %v988_v44  ;;  %v1212_v51 = vunpack.c.l.b16 %v1052_v30  ;;  %v850_v52 = vrot.slane %v811_v24, 7 }
 0x104   : > { %v1148_v53 = vunpack.c.l.b16 %v1020_v46  ;;  %v1275_v54 = vunpack.c.l.b16 %v1083_v47  ;;  %v949_v55 = vrot.slane %v811_v24, 1  ;;  %v1076_v56 = vpack.c.bf16 %v811_v24, %v811_v24  ;;  %v5118_v46 = vld [vmem:[#allocation8 + $0x70] sm:$0xff] }
 0x105   : > { %v644_v57 = vpop.f32.mrf.mxu0  ;;  %v1147_v58 = vunpack.c.l.b16 %v1019_v50  ;;  %v1276_v59 = vunpack.c.l.b16 %v1084_v27  ;;  %v867_v60 = vsel %vm853_vm1, %v834_v31, %v850_v52  ;;  %v883_v61 = vsel %vm853_vm1, %v850_v52, %v834_v31  ;;  %v4456_v6 = vld [vmem:[#allocation2 + $0x138] sm:$0xf]  ;;  %2587 = vmatpush.bf16.msrb.mxu1 %v5118_v46 }
 0x106   : > { %v1318_v63 = vpack.c.b16 %v1275_v54, %v1275_v54  ;;  %v1319_v0 = vpack.c.b16 %v1212_v51, %v1148_v53  ;;  %v912_v45 = vsel %vm819_vm0, 0.0, %v883_v61  ;;  %v966_v1 = vsel %vm952_vm3, %v933_v25, %v949_v55  ;;  %v5096_v7 = vld [vmem:[#allocation2 + $0x140] sm:$0xf0] }
 0x107   : > { %v1317_v2 = vpack.c.b16 %v5940_v14, %v1147_v58  ;;  %v1320_v3 = vpack.c.b16 %v1276_v59, %v1276_v59  ;;  %v982_v4 = vsel %vm952_vm3, %v949_v55, %v933_v25  ;;  %v1043_v5 = vpack.c.bf16 %v912_v45, %v912_v45 }
 0x108   : > { %1446 = vst [vmem:[#allocation2 + $0x38] sm:$0xf] %v1318_v63  ;;  %v1012_v29 = vsel %vm919_vm2, 0.0, %v982_v4  ;;  %v1044_v8 = vpack.c.bf16 %v867_v60, %v867_v60  ;;  %v1107_v9 = vpack.c.bf16 %v966_v1, %v966_v1  ;;  %v1236_v10 = vunpack.c.l.b16 %v1076_v56 }
 0x109   : > { %1445 = vst [vmem:[#allocation2 + $0x30] sm:$0xff] %v1317_v2  ;;  %v1108_v11 = vpack.c.bf16 %v1012_v29, %v1012_v29  ;;  %v1171_v12 = vunpack.c.l.b16 %v1043_v5  ;;  %v788_v13 = vmax.f32 %v756_v34, 0.0  ;;  %v744_v14 = vmul.f32 %v5856_v32, %v702_v48 }
 0x10a   : > { %1447 = vst [vmem:[#allocation2 + $0x3c] sm:$0xff] %v1319_v0  ;;  %v1172_v15 = vunpack.c.l.b16 %v1044_v8  ;;  %v1299_v16 = vunpack.c.l.b16 %v1107_v9  ;;  %v721_v17 = vmul.f32 %v5856_v32, %v644_v57  ;;  %v5986_v18 = vor.u32 %v5096_v7, %v4456_v6 }
 0x10b   : > { %v704_v31 = vpop.f32.mrf.mxu3  ;;  %1448 = vst [vmem:[#allocation2 + $0x44] sm:$0xf] %v1320_v3  ;;  %v1300_v20 = vunpack.c.l.b16 %v1108_v11  ;;  %v1365_v22 = vpack.c.b16 %v5951_v33, %v1171_v12  ;;  %v1053_v28 = vpack.c.bf16 %v788_v13, %v788_v13  ;;  %v780_v30 = vadd.f32 %v5863_v35, %v744_v14 }
 0x10c   : > { %v1366_v25 = vpack.c.b16 %v1299_v16, %v1299_v16  ;;  %v1367_v26 = vpack.c.b16 %v1236_v10, %v1172_v15  ;;  %2138 = vmatmul.bf16.vlgmr.msrb.gmra.mxu3 %v5986_v18  ;;  %v757_v38 = vadd.f32 %v5863_v35, %v721_v17  ;;  %v745_v39 = vmul.f32 %v5856_v32, %v704_v31 }
 0x10d   : > { %v647_v24 = vpop.f32.mrf.mxu0  ;;  %v1368_v34 = vpack.c.b16 %v1300_v20, %v1300_v20  ;;  %1493 = vst [vmem:[#allocation2 + $0x150] sm:$0xff] %v1365_v22  ;;  %v5995_v37 = vmax.f32 %v780_v30, 0.0  ;;  %v823_v33 = vrot.slane %v788_v13, 7  ;;  %v922_v47 = vrot.slane %v788_v13, 1 }
 0x10e   : > { %v722_v40 = vmul.f32 %v5856_v32, %v647_v24  ;;  %1494 = vst [vmem:[#allocation2 + $0x158] sm:$0xf] %v1366_v25  ;;  %v789_v41 = vmax.f32 %v757_v38, 0.0  ;;  %v781_v43 = vadd.f32 %v5863_v35, %v745_v39  ;;  %v1213_v48 = vunpack.c.l.b16 %v1053_v28 }
 0x10f   : > { %1495 = vst [vmem:[#allocation2 + $0x15c] sm:$0xff] %v1367_v26  ;;  %v835_v50 = vrot.slane %v5995_v37, 7  ;;  %v1077_v27 = vpack.c.bf16 %v5995_v37, %v5995_v37  ;;  %v5630_v57 = vmov 0   ;;  %v934_v58 = vrot.slane %v5995_v37, 1 }
 0x110   : > { %v758_v44 = vadd.f32 %v5863_v35, %v722_v40  ;;  %686 = vmatmul.bf16.gmra.mxu0 %v5043_v23  ;;  %1496 = vst [vmem:[#allocation2 + $0x164] sm:$0xf] %v1368_v34  ;;  %v4324_v51 = vld [vmem:[#allocation2 + $0x30] sm:$0xf]  ;;  %v839_v52 = vrot.slane %v789_v41, 7  ;;  %v938_v53 = vrot.slane %v789_v41, 1  ;;  %v1054_v54 = vpack.c.bf16 %v789_v41, %v789_v41 }
 0x111   : > { %v813_v55 = vmax.f32 %v781_v43, 0.0  ;;  %v5063_v56 = vld [vmem:[#allocation2 + $0x38] sm:$0xf0]  ;;  %1305 = vst [vmem:[#allocation2] sm:$0xff] %v5630_v57  ;;  %v6003_v59 = vunpack.c.l.b16 %v1077_v27  ;;  %v5062_v30 = vld [vmem:[#allocation2 + $0x34] sm:$0xf] }
 0x112   : > { %v6005_v60 = vmax.f32 %v758_v44, 0.0  ;;  %v6007_v61 = vor.u32 %v5063_v56, %v4324_v51  ;;  %1307 = vst [vmem:[#allocation2 + $0xc] sm:$0xff] %v5630_v57  ;;  %v856_v63 = vsel %vm853_vm1, %v823_v33, %v839_v52  ;;  %v872_v0 = vsel %vm853_vm1, %v839_v52, %v823_v33  ;;  %v4326_v24 = vld [vmem:[#allocation2 + $0x3c] sm:$0xf0] }
 0x113   : > { %v707_v62 = vpop.f32.mrf.mxu3  ;;  %v955_v45 = vsel %vm952_vm3, %v922_v47, %v938_v53  ;;  %v971_v1 = vsel %vm952_vm3, %v938_v53, %v922_v47  ;;  %1306 = vst [vmem:[#allocation2 + $0x8] sm:$0xf] %v5630_v57  ;;  %v890_v2 = vsel %vm819_vm0, 0.0, %v872_v0  ;;  %v1022_v4 = vpack.c.bf16 %v856_v63, %v856_v63 }
 0x114   : > { %v990_v3 = vsel %vm919_vm2, 0.0, %v971_v1  ;;  %v1085_v5 = vpack.c.bf16 %v955_v45, %v955_v45  ;;  %2083 = vmatmul.bf16.gmra.mxu1 %v6007_v61  ;;  %1308 = vst [vmem:[#allocation2 + $0x14] sm:$0xf] %v5630_v57  ;;  %v1021_v7 = vpack.c.bf16 %v890_v2, %v890_v2  ;;  %v1214_v8 = vunpack.c.l.b16 %v1054_v54  ;;  %v4468_v41 = vld [vmem:[#allocation2 + $0x150] sm:$0xf] }
 0x115   : > { %v649_v6 = vpop.f32.mrf.mxu0  ;;  %v1086_v29 = vpack.c.bf16 %v990_v3, %v990_v3  ;;  %v851_v9 = vrot.slane %v813_v55, 7  ;;  %1309 = vst [vmem:[#allocation2 + $0x198] sm:$0xff] %v5630_v57  ;;  %v1150_v10 = vunpack.c.l.b16 %v1022_v4  ;;  %v950_v12 = vrot.slane %v813_v55, 1 }
 0x116   : > { %v1277_v11 = vunpack.c.l.b16 %v1085_v5  ;;  %v1078_v13 = vpack.c.bf16 %v813_v55, %v813_v55  ;;  %1310 = vst [vmem:[#allocation2 + $0x1a0] sm:$0xf] %v5630_v57  ;;  %v1149_v14 = vunpack.c.l.b16 %v1021_v7  ;;  %v5099_v43 = vld [vmem:[#allocation2 + $0x158] sm:$0xf0]  ;;  %v6034_v47 = vor.u32 %v5062_v30, %v4326_v24 }
 0x117   : > { %v1278_v15 = vunpack.c.l.b16 %v1086_v29  ;;  %v868_v16 = vsel %vm853_vm1, %v835_v50, %v851_v9  ;;  %v884_v17 = vsel %vm853_vm1, %v851_v9, %v835_v50  ;;  %1311 = vst [vmem:[#allocation2 + $0x1a4] sm:$0xff] %v5630_v57  ;;  %v1323_v19 = vpack.c.b16 %v1214_v8, %v1150_v10 }
 0x118   : > { %v1322_v31 = vpack.c.b16 %v1277_v11, %v1277_v11  ;;  %v914_v20 = vsel %vm819_vm0, 0.0, %v884_v17  ;;  %v967_v22 = vsel %vm952_vm3, %v934_v58, %v950_v12  ;;  %1312 = vst [vmem:[#allocation2 + $0x1ac] sm:$0xf] %v5630_v57  ;;  %v1321_v23 = vpack.c.b16 %v1213_v48, %v1149_v14  ;;  %v4600_v54 = vld [vmem:[#allocation2] sm:$0xf]  ;;  %2172 = vmatmul.bf16.gmra.mxu2 %v6034_v47 }
 0x119   : > { %v1324_v25 = vpack.c.b16 %v1278_v15, %v1278_v15  ;;  %v983_v26 = vsel %vm952_vm3, %v950_v12, %v934_v58  ;;  %v1045_v28 = vpack.c.bf16 %v914_v20, %v914_v20  ;;  %v1046_v38 = vpack.c.bf16 %v868_v16, %v868_v16  ;;  %1451 = vst [vmem:[#allocation2 + $0x54] sm:$0xff] %v1323_v19  ;;  %v5057_v55 = vld [vmem:[#allocation2 + $0x8] sm:$0xf0] }
 0x11a   : > { %1450 = vst [vmem:[#allocation2 + $0x50] sm:$0xf] %v1322_v31  ;;  %v1014_v34 = vsel %vm919_vm2, 0.0, %v983_v26  ;;  %v1109_v39 = vpack.c.bf16 %v967_v22, %v967_v22  ;;  %v1238_v40 = vunpack.c.l.b16 %v1078_v13  ;;  %v746_v52 = vmul.f32 %v5856_v32, %v707_v62 }
 0x11b   : > { %1449 = vst [vmem:[#allocation2 + $0x48] sm:$0xff] %v1321_v23  ;;  %v1110_v37 = vpack.c.bf16 %v1014_v34, %v1014_v34  ;;  %v1173_v33 = vunpack.c.l.b16 %v1045_v28  ;;  %v1174_v44 = vunpack.c.l.b16 %v1046_v38  ;;  %v709_v48 = vpop.f32.mrf.mxu3  ;;  %v723_v53 = vmul.f32 %v5856_v32, %v649_v6  ;;  %v5117_v6 = vld [vmem:[#allocation8 + $0x68] sm:$0xff] }
 0x11c   : > { %v1301_v46 = vunpack.c.l.b16 %v1109_v39  ;;  %1452 = vst [vmem:[#allocation2 + $0x5c] sm:$0xf] %v1324_v25  ;;  %v1055_v58 = vpack.c.bf16 %v6005_v60, %v6005_v60  ;;  %v6042_v63 = vor.u32 %v5099_v43, %v4468_v41  ;;  %v782_v45 = vadd.f32 %v5863_v35, %v746_v52  ;;  %2588 = vmatpush.bf16.msrb.mxu1 %v5117_v6 }
 0x11d   : > { %v652_v50 = vpop.f32.mrf.mxu0  ;;  %v1302_v27 = vunpack.c.l.b16 %v1110_v37  ;;  %v1369_v51 = vpack.c.b16 %v6003_v59, %v1173_v33  ;;  %v1371_v57 = vpack.c.b16 %v1238_v40, %v1174_v44  ;;  %v759_v59 = vadd.f32 %v5863_v35, %v723_v53 }
 0x11e   : > { %v1370_v56 = vpack.c.b16 %v1301_v46, %v1301_v46  ;;  %v747_v62 = vmul.f32 %v5856_v32, %v709_v48  ;;  %2143 = vmatmul.bf16.gmra.mxu3 %v6042_v63  ;;  %v724_v1 = vmul.f32 %v5856_v32, %v652_v50  ;;  %v4601_v2 = vor.u32 %v5057_v55, %v4600_v54 }
 0x11f   : > { %v1372_v0 = vpack.c.b16 %v1302_v27, %v1302_v27  ;;  %1497 = vst [vmem:[#allocation2 + $0x168] sm:$0xff] %v1369_v51  ;;  %v814_v3 = vmax.f32 %v782_v45, 0.0  ;;  %v791_v4 = vmax.f32 %v759_v59, 0.0  ;;  %v824_v7 = vrot.slane %v6005_v60, 7 }
 0x120   : > { %1498 = vst [vmem:[#allocation2 + $0x170] sm:$0xf] %v1370_v56  ;;  %v783_v5 = vadd.f32 %v5863_v35, %v747_v62  ;;  %v923_v29 = vrot.slane %v6005_v60, 1  ;;  %2505 = vmatmul.bf16.vlgmr.msrb.gmra.mxu0 %v4601_v2  ;;  %v1215_v9 = vunpack.c.l.b16 %v1055_v58  ;;  %v6053_v12 = vadd.f32 %v5863_v35, %v724_v1  ;;  %v5066_v13 = vld [vmem:[#allocation2 + $0x50] sm:$0xf0] }
 0x121   : > { %1499 = vst [vmem:[#allocation2 + $0x174] sm:$0xff] %v1371_v57  ;;  %v836_v10 = vrot.slane %v814_v3, 7  ;;  %v840_v11 = vrot.slane %v791_v4, 7  ;;  %v935_v14 = vrot.slane %v814_v3, 1  ;;  %v939_v15 = vrot.slane %v791_v4, 1 }
 0x122   : > { %1500 = vst [vmem:[#allocation2 + $0x17c] sm:$0xf] %v1372_v0  ;;  %v4336_v8 = vld [vmem:[#allocation2 + $0x48] sm:$0xf]  ;;  %v1056_v16 = vpack.c.bf16 %v791_v4, %v791_v4  ;;  %v815_v17 = vmax.f32 %v783_v5, 0.0  ;;  %v1079_v19 = vpack.c.bf16 %v814_v3, %v814_v3 }
 0x123   : > { %v857_v20 = vsel %vm853_vm1, %v824_v7, %v840_v11  ;;  %v873_v60 = vsel %vm853_vm1, %v840_v11, %v824_v7  ;;  %v6059_v22 = vor.u32 %v5066_v13, %v4336_v8  ;;  %v956_v25 = vsel %vm952_vm3, %v923_v29, %v939_v15  ;;  %v5065_v56 = vld [vmem:[#allocation2 + $0x4c] sm:$0xf]  ;;  %v4338_v57 = vld [vmem:[#allocation2 + $0x54] sm:$0xf0] }
 0x124   : > { %v892_v23 = vsel %vm819_vm0, 0.0, %v873_v60  ;;  %v972_v26 = vsel %vm952_vm3, %v939_v15, %v923_v29  ;;  %v1024_v28 = vpack.c.bf16 %v857_v20, %v857_v20  ;;  %v1087_v34 = vpack.c.bf16 %v956_v25, %v956_v25 }
 0x125   : > { %v654_v31 = vpop.f32.mrf.mxu0  ;;  %v992_v30 = vsel %vm919_vm2, 0.0, %v972_v26  ;;  %v1023_v24 = vpack.c.bf16 %v892_v23, %v892_v23  ;;  %v1216_v38 = vunpack.c.l.b16 %v1056_v16  ;;  %2088 = vmatmul.bf16.gmra.mxu1 %v6059_v22  ;;  %v852_v37 = vrot.slane %v815_v17, 7 }
 0x126   : > { %v1088_v39 = vpack.c.bf16 %v992_v30, %v992_v30  ;;  %v1152_v40 = vunpack.c.l.b16 %v1024_v28  ;;  %v951_v33 = vrot.slane %v815_v17, 1  ;;  %v1239_v41 = vunpack.c.l.b16 %v1079_v19  ;;  %v4480_v62 = vld [vmem:[#allocation2 + $0x168] sm:$0xf] }
 0x127   : > { %v1151_v43 = vunpack.c.l.b16 %v1023_v24  ;;  %v1279_v44 = vunpack.c.l.b16 %v1087_v34  ;;  %v1080_v46 = vpack.c.bf16 %v815_v17, %v815_v17  ;;  %v869_v27 = vsel %vm853_vm1, %v836_v10, %v852_v37 }
 0x128   : > { %v1280_v48 = vunpack.c.l.b16 %v1088_v39  ;;  %v1327_v50 = vpack.c.b16 %v1216_v38, %v1152_v40  ;;  %v885_v51 = vsel %vm853_vm1, %v852_v37, %v836_v10  ;;  %v968_v55 = vsel %vm952_vm3, %v935_v14, %v951_v33  ;;  %v5102_v1 = vld [vmem:[#allocation2 + $0x170] sm:$0xf0] }
 0x129   : > { %v1325_v52 = vpack.c.b16 %v1215_v9, %v1151_v43  ;;  %v1326_v53 = vpack.c.b16 %v1279_v44, %v1279_v44  ;;  %v916_v54 = vsel %vm819_vm0, 0.0, %v885_v51  ;;  %v984_v0 = vsel %vm952_vm3, %v951_v33, %v935_v14 }
 0x12a   : > { %v1328_v58 = vpack.c.b16 %v1280_v48, %v1280_v48  ;;  %1455 = vst [vmem:[#allocation2 + $0x6c] sm:$0xff] %v1327_v50  ;;  %v1047_v45 = vpack.c.bf16 %v916_v54, %v916_v54  ;;  %v1048_v59 = vpack.c.bf16 %v869_v27, %v869_v27  ;;  %v1016_v3 = vsel %vm919_vm2, 0.0, %v984_v0  ;;  %v5116_v27 = vld [vmem:[#allocation8 + $0x60] sm:$0xff] }
 0x12b   : > { %1453 = vst [vmem:[#allocation2 + $0x60] sm:$0xff] %v1325_v52  ;;  %v1111_v4 = vpack.c.bf16 %v968_v55, %v968_v55  ;;  %v1240_v5 = vunpack.c.l.b16 %v1080_v46  ;;  %v1112_v6 = vpack.c.bf16 %v1016_v3, %v1016_v3  ;;  %v6082_v9 = vor.u32 %v5065_v56, %v4338_v57  ;;  %2589 = vmatpush.bf16.msrb.mxu1 %v5116_v27 }
 0x12c   : > { %1454 = vst [vmem:[#allocation2 + $0x68] sm:$0xf] %v1326_v53  ;;  %v1175_v7 = vunpack.c.l.b16 %v1047_v45  ;;  %v1176_v29 = vunpack.c.l.b16 %v1048_v59  ;;  %v725_v10 = vmul.f32 %v5856_v32, %v654_v31  ;;  %v6085_v11 = vor.u32 %v5102_v1, %v4480_v62 }
 0x12d   : > { %v657_v2 = vpop.f32.mrf.mxu0  ;;  %1456 = vst [vmem:[#allocation2 + $0x74] sm:$0xf] %v1328_v58  ;;  %v1303_v8 = vunpack.c.l.b16 %v1111_v4  ;;  %v1304_v13 = vunpack.c.l.b16 %v1112_v6  ;;  %v792_v16 = vmax.f32 %v6053_v12, 0.0  ;;  %2177 = vmatmul.bf16.gmra.mxu2 %v6082_v9 }
 0x12e   : > { %v1373_v14 = vpack.c.b16 %v1239_v41, %v1175_v7  ;;  %v1375_v15 = vpack.c.b16 %v1240_v5, %v1176_v29  ;;  %v761_v19 = vadd.f32 %v5863_v35, %v725_v10  ;;  %2148 = vmatmul.bf16.gmra.mxu3 %v6085_v11  ;;  %v726_v60 = vmul.f32 %v5856_v32, %v657_v2 }
 0x12f   : > { %v1374_v17 = vpack.c.b16 %v1303_v8, %v1303_v8  ;;  %v1376_v20 = vpack.c.b16 %v1304_v13, %v1304_v13  ;;  %v825_v25 = vrot.slane %v792_v16, 7  ;;  %v924_v28 = vrot.slane %v792_v16, 1 }
 0x130   : > { %1501 = vst [vmem:[#allocation2 + $0x180] sm:$0xff] %v1373_v14  ;;  %2510 = vmatmul.bf16.gmra.mxu0 %v5947_v21  ;;  %v793_v31 = vmax.f32 %v761_v19, 0.0  ;;  %v1057_v30 = vpack.c.bf16 %v792_v16, %v792_v16  ;;  %v762_v39 = vadd.f32 %v5863_v35, %v726_v60 }
 0x131   : > { %1502 = vst [vmem:[#allocation2 + $0x188] sm:$0xf] %v1374_v17  ;;  %v5069_v23 = vld [vmem:[#allocation2 + $0x68] sm:$0xf0]  ;;  %v4350_v58 = vld [vmem:[#allocation2 + $0x6c] sm:$0xf0] }
 0x132   : > { %1503 = vst [vmem:[#allocation2 + $0x18c] sm:$0xff] %v1375_v15  ;;  %v4348_v26 = vld [vmem:[#allocation2 + $0x60] sm:$0xf]  ;;  %v841_v24 = vrot.slane %v793_v31, 7  ;;  %v940_v34 = vrot.slane %v793_v31, 1  ;;  %v1058_v38 = vpack.c.bf16 %v793_v31, %v793_v31  ;;  %v794_v56 = vmax.f32 %v762_v39, 0.0 }
 0x133   : > { %1504 = vst [vmem:[#allocation2 + $0x194] sm:$0xf] %v1376_v20  ;;  %v6094_v40 = vor.u32 %v5069_v23, %v4348_v26  ;;  %v5068_v57 = vld [vmem:[#allocation2 + $0x64] sm:$0xf]  ;;  %v1217_v0 = vunpack.c.l.b16 %v1057_v30 }
 0x134   : > { %v858_v21 = vsel %vm853_vm1, %v825_v25, %v841_v24  ;;  %v874_v33 = vsel %vm853_vm1, %v841_v24, %v825_v25  ;;  %v957_v41 = vsel %vm952_vm3, %v924_v28, %v940_v34  ;;  %v973_v43 = vsel %vm952_vm3, %v940_v34, %v924_v28 }
 0x135   : > { %v659_v12 = vpop.f32.mrf.mxu0  ;;  %v894_v44 = vsel %vm819_vm0, 0.0, %v874_v33  ;;  %v994_v46 = vsel %vm919_vm2, 0.0, %v973_v43  ;;  %v1026_v48 = vpack.c.bf16 %v858_v21, %v858_v21  ;;  %v1089_v50 = vpack.c.bf16 %v957_v41, %v957_v41  ;;  %2093 = vmatmul.bf16.gmra.mxu1 %v6094_v40 }
 0x136   : > { %v727_v37 = vmul.f32 %v5856_v32, %v659_v12  ;;  %v1025_v51 = vpack.c.bf16 %v894_v44, %v894_v44  ;;  %v1090_v52 = vpack.c.bf16 %v994_v46, %v994_v46  ;;  %v1218_v54 = vunpack.c.l.b16 %v1058_v38 }
 0x137   : > { %v1154_v53 = vunpack.c.l.b16 %v1026_v48  ;;  %v1281_v55 = vunpack.c.l.b16 %v1089_v50  ;;  %v4492_v1 = vld [vmem:[#allocation2 + $0x180] sm:$0xf]  ;;  %v6111_v29 = vor.u32 %v5068_v57, %v4350_v58  ;;  %v826_v10 = vrot.slane %v794_v56, 7 }
 0x138   : > { %v1153_v45 = vunpack.c.l.b16 %v1025_v51  ;;  %v1282_v59 = vunpack.c.l.b16 %v1090_v52  ;;  %v763_v62 = vadd.f32 %v5863_v35, %v727_v37  ;;  %v925_v14 = vrot.slane %v794_v56, 1 }
 0x139   : > { %v5129_v2 = vld [vmem:[#allocation2 + $0x188] sm:$0xf0]  ;;  %v1330_v3 = vpack.c.b16 %v1281_v55, %v1281_v55  ;;  %v1331_v4 = vpack.c.b16 %v1218_v54, %v1154_v53  ;;  %v1059_v19 = vpack.c.bf16 %v794_v56, %v794_v56 }
 0x13a   : > { %v1329_v6 = vpack.c.b16 %v1217_v0, %v1153_v45  ;;  %v1332_v7 = vpack.c.b16 %v1282_v59, %v1282_v59  ;;  %v795_v8 = vmax.f32 %v763_v62, 0.0  ;;  %v4493_v13 = vor.u32 %v5129_v2, %v4492_v1 }
 0x13b   : > { %1458 = vst [vmem:[#allocation2 + $0x80] sm:$0xf] %v1330_v3  ;;  %v1219_v41 = vunpack.c.l.b16 %v1059_v19 }
 0x13c   : > { %1457 = vst [vmem:[#allocation2 + $0x78] sm:$0xff] %v1329_v6  ;;  %v842_v15 = vrot.slane %v795_v8, 7  ;;  %v941_v16 = vrot.slane %v795_v8, 1  ;;  %v1060_v20 = vpack.c.bf16 %v795_v8, %v795_v8 }
 0x13d   : > { %v662_v5 = vpop.f32.mrf.mxu0  ;;  %1459 = vst [vmem:[#allocation2 + $0x84] sm:$0xff] %v1331_v4  ;;  %2182 = vmatmul.bf16.gmra.mxu2 %v6111_v29  ;;  %v5095_v4 = vld [vmem:[#allocation2 + $0x13c] sm:$0xf] }
 0x13e   : > { %v728_v17 = vmul.f32 %v5856_v32, %v662_v5  ;;  %1460 = vst [vmem:[#allocation2 + $0x8c] sm:$0xf] %v1332_v7  ;;  %v859_v60 = vsel %vm853_vm1, %v826_v10, %v842_v15  ;;  %v875_v31 = vsel %vm853_vm1, %v842_v15, %v826_v10  ;;  %v958_v23 = vsel %vm952_vm3, %v925_v14, %v941_v16  ;;  %v4458_v5 = vld [vmem:[#allocation2 + $0x144] sm:$0xf0] }
 0x13f   : > { %v896_v25 = vsel %vm819_vm0, 0.0, %v875_v31  ;;  %v974_v26 = vsel %vm952_vm3, %v941_v16, %v925_v14  ;;  %v1028_v12 = vpack.c.bf16 %v859_v60, %v859_v60  ;;  %v1091_v28 = vpack.c.bf16 %v958_v23, %v958_v23  ;;  %2153 = vmatmul.bf16.gmra.mxu3 %v4493_v13 }
 0x140   : > { %2515 = vmatmul.bf16.gmra.mxu0 %v6007_v61  ;;  %v996_v30 = vsel %vm919_vm2, 0.0, %v974_v26  ;;  %v1027_v24 = vpack.c.bf16 %v896_v25, %v896_v25  ;;  %v764_v34 = vadd.f32 %v5863_v35, %v728_v17  ;;  %v1220_v37 = vunpack.c.l.b16 %v1060_v20  ;;  %v5115_v26 = vld [vmem:[#allocation8 + $0x58] sm:$0xff] }
 0x141   : > { %v1092_v38 = vpack.c.bf16 %v996_v30, %v996_v30  ;;  %v1156_v39 = vunpack.c.l.b16 %v1028_v12  ;;  %v1283_v21 = vunpack.c.l.b16 %v1091_v28  ;;  %v6154_v60 = vor.u32 %v5095_v4, %v4458_v5  ;;  %2590 = vmatpush.bf16.msrb.mxu1 %v5115_v26  ;;  %v5098_v5 = vld [vmem:[#allocation2 + $0x154] sm:$0xf] }
 0x142   : > { %v1155_v43 = vunpack.c.l.b16 %v1027_v24  ;;  %v796_v53 = vmax.f32 %v764_v34, 0.0 }
 0x143   : > { %v1284_v44 = vunpack.c.l.b16 %v1092_v38  ;;  %v1334_v46 = vpack.c.b16 %v1283_v21, %v1283_v21  ;;  %v1335_v48 = vpack.c.b16 %v1220_v37, %v1156_v39  ;;  %v4360_v50 = vld [vmem:[#allocation2 + $0x78] sm:$0xf]  ;;  %v5071_v56 = vld [vmem:[#allocation2 + $0x7c] sm:$0xf]  ;;  %v6162_v38 = vld [vmem:[%s7144_s5] ss:$0 sm:$0xff] }
 0x144   : > { %v1333_v61 = vpack.c.b16 %v1219_v41, %v1155_v43  ;;  %v5072_v51 = vld [vmem:[#allocation2 + $0x80] sm:$0xf0]  ;;  %v4362_v57 = vld [vmem:[#allocation2 + $0x84] sm:$0xf0]  ;;  %v827_v0 = vrot.slane %v796_v53, 7  ;;  %v926_v45 = vrot.slane %v796_v53, 1  ;;  %v1061_v1 = vpack.c.bf16 %v796_v53, %v796_v53 }
 0x145   : > { %v664_v33 = vpop.f32.mrf.mxu0  ;;  %v1336_v52 = vpack.c.b16 %v1284_v44, %v1284_v44  ;;  %1462 = vst [vmem:[#allocation2 + $0x98] sm:$0xf] %v1334_v46  ;;  %v6130_v54 = vor.u32 %v5072_v51, %v4360_v50  ;;  %v6134_v2 = vor.u32 %v5071_v56, %v4362_v57  ;;  %v5154_v46 = vld [vmem:[#allocation8 + $0x178] sm:$0xff] }
 0x146   : > { %v729_v27 = vmul.f32 %v5856_v32, %v664_v33  ;;  %1461 = vst [vmem:[#allocation2 + $0x90] sm:$0xff] %v1333_v61  ;;  %v1221_v12 = vunpack.c.l.b16 %v1061_v1  ;;  %2248 = vmatpush.bf16.msrb.mxu3 %v5154_v46 }
 0x147   : > { %1463 = vst [vmem:[#allocation2 + $0x9c] sm:$0xff] %v1335_v48  ;;  %2098 = vmatmul.bf16.gmra.mxu1 %v6130_v54 }
 0x148   : > { %v765_v55 = vadd.f32 %v5863_v35, %v729_v27  ;;  %1464 = vst [vmem:[#allocation2 + $0xa4] sm:$0xf] %v1336_v52  ;;  %v6139_v35 = vld [vmem:[%s7143_s4] ss:$0 sm:$0xff] }
 0x149   : > { %v5153_v27 = vld [vmem:[#allocation8 + $0x170] sm:$0xff] }
 0x14a   : > { %v797_v58 = vmax.f32 %v765_v55, 0.0  ;;  %2249 = vmatpush.bf16.msrb.mxu3 %v5153_v27 }
 0x14c   : > { %v843_v32 = vrot.slane %v797_v58, 7  ;;  %v942_v59 = vrot.slane %v797_v58, 1  ;;  %v1062_v3 = vpack.c.bf16 %v797_v58, %v797_v58 }
 0x14d   : > { %v667_v62 = vpop.f32.mrf.mxu0  ;;  %2187 = vmatmul.bf16.gmra.mxu2 %v6134_v2  ;;  %v4372_v37 = vld [vmem:[#allocation2 + $0x90] sm:$0xf]  ;;  %v5074_v61 = vld [vmem:[#allocation2 + $0x94] sm:$0xf] }
 0x14e   : > { %v730_v6 = vmul.f32 %v6139_v35, %v667_v62  ;;  %v860_v7 = vsel %vm853_vm1, %v827_v0, %v843_v32  ;;  %v876_v8 = vsel %vm853_vm1, %v843_v32, %v827_v0  ;;  %v959_v10 = vsel %vm952_vm3, %v926_v45, %v942_v59  ;;  %v5075_v21 = vld [vmem:[#allocation2 + $0x98] sm:$0xf0]  ;;  %v4374_v51 = vld [vmem:[#allocation2 + $0x9c] sm:$0xf0] }
 0x14f   : > { %v975_v13 = vsel %vm952_vm3, %v942_v59, %v926_v45  ;;  %v898_v14 = vsel %vm819_vm0, 0.0, %v876_v8  ;;  %v1030_v16 = vpack.c.bf16 %v860_v7, %v860_v7  ;;  %v1093_v17 = vpack.c.bf16 %v959_v10, %v959_v10  ;;  %2227 = vmatmul.bf16.vlgmr.msra.gmra.mxu3 %v6154_v60  ;;  %v5152_v59 = vld [vmem:[#allocation8 + $0x168] sm:$0xff] }
 0x150   : > { %v998_v15 = vsel %vm919_vm2, 0.0, %v975_v13  ;;  %v1029_v19 = vpack.c.bf16 %v898_v14, %v898_v14  ;;  %v1222_v23 = vunpack.c.l.b16 %v1062_v3  ;;  %2520 = vmatmul.bf16.gmra.mxu0 %v6059_v22  ;;  %v766_v39 = vadd.f32 %v6162_v38, %v730_v6  ;;  %v4470_v6 = vld [vmem:[#allocation2 + $0x15c] sm:$0xf0]  ;;  %2250 = vmatpush.bf16.msrb.mxu3 %v5152_v59  ;;  %v5148_v59 = vld [vmem:[#allocation8 + $0x148] sm:$0xff] }
 0x151   : > { %v1094_v20 = vpack.c.bf16 %v998_v15, %v998_v15  ;;  %v1158_v31 = vunpack.c.l.b16 %v1030_v16  ;;  %v1285_v25 = vunpack.c.l.b16 %v1093_v17  ;;  %v6166_v22 = vor.u32 %v5075_v21, %v4372_v37 }
 0x152   : > { %v1157_v28 = vunpack.c.l.b16 %v1029_v19  ;;  %v798_v48 = vmax.f32 %v766_v39, 0.0  ;;  %v6170_v0 = vor.u32 %v5074_v61, %v4374_v51 }
 0x153   : > { %v1286_v30 = vunpack.c.l.b16 %v1094_v20  ;;  %v1338_v24 = vpack.c.b16 %v1285_v25, %v1285_v25  ;;  %v1339_v34 = vpack.c.b16 %v1222_v23, %v1158_v31  ;;  %v6185_v31 = vor.u32 %v5098_v5, %v4470_v6  ;;  %v5101_v5 = vld [vmem:[#allocation2 + $0x16c] sm:$0xf]  ;;  %v4482_v6 = vld [vmem:[#allocation2 + $0x174] sm:$0xf0] }
 0x154   : > { %v1337_v33 = vpack.c.b16 %v1221_v12, %v1157_v28  ;;  %v828_v53 = vrot.slane %v798_v48, 7  ;;  %v927_v55 = vrot.slane %v798_v48, 1  ;;  %v1063_v58 = vpack.c.bf16 %v798_v48, %v798_v48  ;;  %v5151_v12 = vld [vmem:[#allocation8 + $0x160] sm:$0xff]  ;;  %v5114_v48 = vld [vmem:[#allocation8 + $0x50] sm:$0xff] }
 0x155   : > { %v1340_v41 = vpack.c.b16 %v1286_v30, %v1286_v30  ;;  %v669_v43 = vpop.f32.mrf.mxu0  ;;  %1466 = vst [vmem:[#allocation2 + $0xb0] sm:$0xf] %v1338_v24  ;;  %2251 = vmatpush.bf16.msrb.mxu3 %v5151_v12  ;;  %2591 = vmatpush.bf16.msrb.mxu1 %v5114_v48 }
 0x156   : > { %v731_v44 = vmul.f32 %v6139_v35, %v669_v43  ;;  %1465 = vst [vmem:[#allocation2 + $0xa8] sm:$0xff] %v1337_v33  ;;  %v1223_v23 = vunpack.c.l.b16 %v1063_v58 }
 0x157   : > { %1467 = vst [vmem:[#allocation2 + $0xb4] sm:$0xff] %v1339_v34  ;;  %2103 = vmatmul.bf16.gmra.mxu1 %v6166_v22 }
 0x158   : > { %v767_v50 = vadd.f32 %v6162_v38, %v731_v44  ;;  %1468 = vst [vmem:[#allocation2 + $0xbc] sm:$0xf] %v1340_v41  ;;  %v5150_v44 = vld [vmem:[#allocation8 + $0x158] sm:$0xff] }
 0x159   : > { %2252 = vmatpush.bf16.msrb.mxu3 %v5150_v44 }
 0x15a   : > { %v799_v52 = vmax.f32 %v767_v50, 0.0  ;;  %v5149_v50 = vld [vmem:[#allocation8 + $0x150] sm:$0xff] }
 0x15c   : > { %v844_v56 = vrot.slane %v799_v52, 7  ;;  %v943_v57 = vrot.slane %v799_v52, 1  ;;  %v1064_v45 = vpack.c.bf16 %v799_v52, %v799_v52 }
 0x15d   : > { %v672_v32 = vpop.f32.mrf.mxu0  ;;  %2192 = vmatmul.bf16.gmra.mxu2 %v6170_v0  ;;  %v4384_v37 = vld [vmem:[#allocation2 + $0xa8] sm:$0xf]  ;;  %v5077_v27 = vld [vmem:[#allocation2 + $0xac] sm:$0xf]  ;;  %2253 = vmatpush.bf16.msrb.mxu3 %v5149_v50 }
 0x15e   : > { %v861_v62 = vsel %vm853_vm1, %v828_v53, %v844_v56  ;;  %v877_v1 = vsel %vm853_vm1, %v844_v56, %v828_v53  ;;  %v960_v3 = vsel %vm952_vm3, %v927_v55, %v943_v57  ;;  %v976_v4 = vsel %vm952_vm3, %v943_v57, %v927_v55  ;;  %v5078_v21 = vld [vmem:[#allocation2 + $0xb0] sm:$0xf0]  ;;  %v4386_v61 = vld [vmem:[#allocation2 + $0xb4] sm:$0xf0] }
 0x15f   : > { %v900_v7 = vsel %vm819_vm0, 0.0, %v877_v1  ;;  %v1000_v8 = vsel %vm919_vm2, 0.0, %v976_v4  ;;  %v1032_v10 = vpack.c.bf16 %v861_v62, %v861_v62  ;;  %v1095_v13 = vpack.c.bf16 %v960_v3, %v960_v3  ;;  %2232 = vmatmul.bf16.gmra.mxu3 %v6185_v31 }
 0x160   : > { %v1031_v14 = vpack.c.bf16 %v900_v7, %v900_v7  ;;  %v1096_v15 = vpack.c.bf16 %v1000_v8, %v1000_v8  ;;  %v732_v16 = vmul.f32 %v6139_v35, %v672_v32  ;;  %v1224_v19 = vunpack.c.l.b16 %v1064_v45  ;;  %2525 = vmatmul.bf16.gmra.mxu0 %v6094_v40 }
 0x161   : > { %v1160_v17 = vunpack.c.l.b16 %v1032_v10  ;;  %v1287_v20 = vunpack.c.l.b16 %v1095_v13  ;;  %v6192_v43 = vor.u32 %v5078_v21, %v4384_v37  ;;  %v6196_v58 = vor.u32 %v5077_v27, %v4386_v61  ;;  %2254 = vmatpush.bf16.msrb.mxu3 %v5148_v59 }
 0x162   : > { %v1159_v25 = vunpack.c.l.b16 %v1031_v14  ;;  %v1288_v26 = vunpack.c.l.b16 %v1096_v15  ;;  %v768_v39 = vadd.f32 %v6162_v38, %v732_v16 }
 0x163   : > { %v1342_v28 = vpack.c.b16 %v1287_v20, %v1287_v20  ;;  %v1343_v30 = vpack.c.b16 %v1224_v19, %v1160_v17 }
 0x164   : > { %v1341_v24 = vpack.c.b16 %v1223_v23, %v1159_v25  ;;  %v1344_v34 = vpack.c.b16 %v1288_v26, %v1288_v26  ;;  %v800_v46 = vmax.f32 %v768_v39, 0.0  ;;  %v6211_v23 = vor.u32 %v5101_v5, %v4482_v6 }
 0x165   : > { %1470 = vst [vmem:[#allocation2 + $0xc8] sm:$0xf] %v1342_v28  ;;  %v674_v33 = vpop.f32.mrf.mxu0  ;;  %v5147_v28 = vld [vmem:[#allocation8 + $0x140] sm:$0xff] }
 0x166   : > { %1469 = vst [vmem:[#allocation2 + $0xc0] sm:$0xff] %v1341_v24  ;;  %v733_v41 = vmul.f32 %v6139_v35, %v674_v33  ;;  %v829_v52 = vrot.slane %v800_v46, 7  ;;  %v928_v53 = vrot.slane %v800_v46, 1  ;;  %v1065_v57 = vpack.c.bf16 %v800_v46, %v800_v46  ;;  %2255 = vmatpush.bf16.msrb.mxu3 %v5147_v28  ;;  %v5113_v28 = vld [vmem:[#allocation8 + $0x48] sm:$0xff] }
 0x167   : > { %1471 = vst [vmem:[#allocation2 + $0xcc] sm:$0xff] %v1343_v30  ;;  %2108 = vmatmul.bf16.gmra.mxu1 %v6192_v43 }
 0x168   : > { %1472 = vst [vmem:[#allocation2 + $0xd4] sm:$0xf] %v1344_v34  ;;  %v769_v40 = vadd.f32 %v6162_v38, %v733_v41  ;;  %v1225_v25 = vunpack.c.l.b16 %v1065_v57  ;;  %2592 = vmatpush.bf16.msrb.mxu1 %v5113_v28 }
 0x169   : > { %7168 = vst [vmem:[#allocation17_spill] sm:$0xff] %v6211_v23 }
 0x16a   : > { %v801_v51 = vmax.f32 %v769_v40, 0.0 }
 0x16c   : > { %v845_v55 = vrot.slane %v801_v51, 7  ;;  %v944_v56 = vrot.slane %v801_v51, 1  ;;  %v1066_v45 = vpack.c.bf16 %v801_v51, %v801_v51 }
 0x16d   : > { %v677_v32 = vpop.f32.mrf.mxu0  ;;  %2197 = vmatmul.bf16.gmra.mxu2 %v6196_v58  ;;  %v4396_v21 = vld [vmem:[#allocation2 + $0xc0] sm:$0xf] }
 0x16e   : > { %v862_v62 = vsel %vm853_vm1, %v829_v52, %v845_v55  ;;  %v878_v1 = vsel %vm853_vm1, %v845_v55, %v829_v52  ;;  %v961_v3 = vsel %vm952_vm3, %v928_v53, %v944_v56  ;;  %v977_v4 = vsel %vm952_vm3, %v944_v56, %v928_v53  ;;  %v5081_v33 = vld [vmem:[#allocation2 + $0xc8] sm:$0xf0]  ;;  %v4398_v50 = vld [vmem:[#allocation2 + $0xcc] sm:$0xf0] }
 0x16f   : > { %v902_v7 = vsel %vm819_vm0, 0.0, %v878_v1  ;;  %v1002_v8 = vsel %vm919_vm2, 0.0, %v977_v4  ;;  %v1034_v10 = vpack.c.bf16 %v862_v62, %v862_v62  ;;  %v1097_v13 = vpack.c.bf16 %v961_v3, %v961_v3  ;;  %2237 = vmatmul.bf16.gmra.mxu3 %v6211_v23  ;;  %v5128_v3 = vld [vmem:[#allocation2 + $0x184] sm:$0xf]  ;;  %v4494_v4 = vld [vmem:[#allocation2 + $0x18c] sm:$0xf0] }
 0x170   : > { %v1033_v14 = vpack.c.bf16 %v902_v7, %v902_v7  ;;  %v1098_v15 = vpack.c.bf16 %v1002_v8, %v1002_v8  ;;  %v734_v16 = vmul.f32 %v6139_v35, %v677_v32  ;;  %v1226_v19 = vunpack.c.l.b16 %v1066_v45  ;;  %2530 = vmatmul.bf16.gmra.mxu0 %v6130_v54  ;;  %v5080_v54 = vld [vmem:[#allocation2 + $0xc4] sm:$0xf] }
 0x171   : > { %v1162_v17 = vunpack.c.l.b16 %v1034_v10  ;;  %v1289_v20 = vunpack.c.l.b16 %v1097_v13  ;;  %v6218_v46 = vor.u32 %v5081_v33, %v4396_v21  ;;  %v6222_v56 = vor.u32 %v5080_v54, %v4398_v50 }
 0x172   : > { %v1161_v26 = vunpack.c.l.b16 %v1033_v14  ;;  %v1290_v12 = vunpack.c.l.b16 %v1098_v15  ;;  %v770_v37 = vadd.f32 %v6162_v38, %v734_v16 }
 0x173   : > { %v1346_v30 = vpack.c.b16 %v1289_v20, %v1289_v20  ;;  %v1347_v24 = vpack.c.b16 %v1226_v19, %v1162_v17  ;;  %v4497_v20 = vor.u32 %v5128_v3, %v4494_v4  ;;  %v4320_v3 = vld [vmem:[#allocation2 + $0x20] sm:$0xf]  ;;  %v5061_v4 = vld [vmem:[#allocation2 + $0x28] sm:$0xf0] }
 0x174   : > { %v1345_v34 = vpack.c.b16 %v1225_v25, %v1161_v26  ;;  %v1348_v39 = vpack.c.b16 %v1290_v12, %v1290_v12  ;;  %v802_v40 = vmax.f32 %v770_v37, 0.0 }
 0x175   : > { %1474 = vst [vmem:[#allocation2 + $0xe0] sm:$0xf] %v1346_v30  ;;  %v679_v41 = vpop.f32.mrf.mxu0  ;;  %v5127_v30 = vld [vmem:[#allocation8 + $0xb8] sm:$0xff] }
 0x176   : > { %1473 = vst [vmem:[#allocation2 + $0xd8] sm:$0xff] %v1345_v34  ;;  %v735_v44 = vmul.f32 %v6139_v35, %v679_v41  ;;  %v830_v61 = vrot.slane %v802_v40, 7  ;;  %v929_v51 = vrot.slane %v802_v40, 1  ;;  %v1067_v55 = vpack.c.bf16 %v802_v40, %v802_v40  ;;  %2675 = vmatpush.bf16.msrb.mxu2 %v5127_v30 }
 0x177   : > { %1475 = vst [vmem:[#allocation2 + $0xe4] sm:$0xff] %v1347_v24  ;;  %2113 = vmatmul.bf16.gmra.mxu1 %v6218_v46 }
 0x178   : > { %1476 = vst [vmem:[#allocation2 + $0xec] sm:$0xf] %v1348_v39  ;;  %v771_v48 = vadd.f32 %v6162_v38, %v735_v44  ;;  %v1227_v25 = vunpack.c.l.b16 %v1067_v55 }
 0x17a   : > { %v803_v27 = vmax.f32 %v771_v48, 0.0 }
 0x17c   : > { %v846_v52 = vrot.slane %v803_v27, 7  ;;  %v945_v53 = vrot.slane %v803_v27, 1  ;;  %v1068_v57 = vpack.c.bf16 %v803_v27, %v803_v27 }
 0x17d   : > { %v682_v45 = vpop.f32.mrf.mxu0  ;;  %2202 = vmatmul.bf16.gmra.mxu2 %v6222_v56  ;;  %v4408_v33 = vld [vmem:[#allocation2 + $0xd8] sm:$0xf] }
 0x17e   : > { %v863_v32 = vsel %vm853_vm1, %v830_v61, %v846_v52  ;;  %v879_v59 = vsel %vm853_vm1, %v846_v52, %v830_v61  ;;  %v962_v62 = vsel %vm952_vm3, %v929_v51, %v945_v53  ;;  %v978_v1 = vsel %vm952_vm3, %v945_v53, %v929_v51  ;;  %v2079_v5 = vpop.f32.mrf.mxu1  ;;  %v5084_v41 = vld [vmem:[#allocation2 + $0xe0] sm:$0xf0]  ;;  %v5083_v51 = vld [vmem:[#allocation2 + $0xdc] sm:$0xf]  ;;  %v4410_v52 = vld [vmem:[#allocation2 + $0xe4] sm:$0xf0] }
 0x17f   : > { %v904_v6 = vsel %vm819_vm0, 0.0, %v879_v59  ;;  %v1004_v7 = vsel %vm919_vm2, 0.0, %v978_v1  ;;  %v1036_v8 = vpack.c.bf16 %v863_v32, %v863_v32  ;;  %v1099_v10 = vpack.c.bf16 %v962_v62, %v962_v62  ;;  %2242 = vmatmul.bf16.gmra.mxu3 %v4497_v20 }
 0x180   : > { %v1035_v13 = vpack.c.bf16 %v904_v6, %v904_v6  ;;  %v1100_v14 = vpack.c.bf16 %v1004_v7, %v1004_v7  ;;  %v736_v15 = vmul.f32 %v6139_v35, %v682_v45  ;;  %v1228_v17 = vunpack.c.l.b16 %v1068_v57  ;;  %2535 = vmatmul.bf16.gmra.mxu0 %v6166_v22 }
 0x181   : > { %v1164_v16 = vunpack.c.l.b16 %v1036_v8  ;;  %v1291_v19 = vunpack.c.l.b16 %v1099_v10  ;;  %v6241_v54 = vor.u32 %v5084_v41, %v4408_v33  ;;  %v6249_v62 = vor.u32 %v5083_v51, %v4410_v52  ;;  %v5126_v52 = vld [vmem:[#allocation8 + $0xb0] sm:$0xff] }
 0x182   : > { %v1163_v26 = vunpack.c.l.b16 %v1035_v13  ;;  %v1292_v12 = vunpack.c.l.b16 %v1100_v14  ;;  %v772_v21 = vadd.f32 %v6162_v38, %v736_v15  ;;  %v6263_v20 = vor.u32 %v5061_v4, %v4320_v3  ;;  %2676 = vmatpush.bf16.msrb.mxu2 %v5126_v52 }
 0x183   : > { %v1350_v24 = vpack.c.b16 %v1291_v19, %v1291_v19  ;;  %v1351_v34 = vpack.c.b16 %v1228_v17, %v1164_v16 }
 0x184   : > { %v1349_v39 = vpack.c.b16 %v1227_v25, %v1163_v26  ;;  %v1352_v37 = vpack.c.b16 %v1292_v12, %v1292_v12  ;;  %v804_v22 = vmax.f32 %v772_v21, 0.0 }
 0x185   : > { %1478 = vst [vmem:[#allocation2 + $0xf8] sm:$0xf] %v1350_v24  ;;  %v684_v44 = vpop.f32.mrf.mxu0  ;;  %v2168_v40 = vpop.f32.mrf.mxu2 }
 0x186   : > { %1477 = vst [vmem:[#allocation2 + $0xf0] sm:$0xff] %v1349_v39  ;;  %v737_v48 = vmul.f32 %v6139_v35, %v684_v44  ;;  %v6243_v50 = vadd.f32 %v2168_v40, %v2079_v5  ;;  %v6246_v61 = vpop.f32.mrf.mxu1  ;;  %v831_v55 = vrot.slane %v804_v22, 7  ;;  %v930_v57 = vrot.slane %v804_v22, 1 }
 0x187   : > { %1479 = vst [vmem:[#allocation2 + $0xfc] sm:$0xff] %v1351_v34  ;;  %2118 = vmatmul.bf16.gmra.mxu1 %v6241_v54  ;;  %v1069_v59 = vpack.c.bf16 %v804_v22, %v804_v22 }
 0x188   : > { %1480 = vst [vmem:[#allocation2 + $0x104] sm:$0xf] %v1352_v37  ;;  %v773_v27 = vadd.f32 %v6162_v38, %v737_v48 }
 0x189   : > { %v1229_v24 = vunpack.c.l.b16 %v1069_v59 }
 0x18a   : > { %v805_v53 = vmax.f32 %v773_v27, 0.0 }
 0x18c   : > { %v847_v45 = vrot.slane %v805_v53, 7  ;;  %v946_v32 = vrot.slane %v805_v53, 1  ;;  %v1070_v1 = vpack.c.bf16 %v805_v53, %v805_v53  ;;  %v5112_v53 = vld [vmem:[#allocation8 + $0x40] sm:$0xff] }
 0x18d   : > { %v687_v5 = vpop.f32.mrf.mxu0  ;;  %2207 = vmatmul.bf16.gmra.mxu2 %v6249_v62  ;;  %v4420_v48 = vld [vmem:[#allocation2 + $0xf0] sm:$0xf]  ;;  %2593 = vmatpush.bf16.msrb.mxu1 %v5112_v53  ;;  %v5086_v59 = vld [vmem:[#allocation2 + $0xf4] sm:$0xf] }
 0x18e   : > { %v864_v6 = vsel %vm853_vm1, %v831_v55, %v847_v45  ;;  %v880_v7 = vsel %vm853_vm1, %v847_v45, %v831_v55  ;;  %v963_v8 = vsel %vm952_vm3, %v930_v57, %v946_v32  ;;  %v979_v10 = vsel %vm952_vm3, %v946_v32, %v930_v57  ;;  %v5087_v22 = vld [vmem:[#allocation2 + $0xf8] sm:$0xf0]  ;;  %v6277_v57 = vpop.f32.mrf.mxu2 }
 0x18f   : > { %v906_v13 = vsel %vm819_vm0, 0.0, %v880_v7  ;;  %v1006_v14 = vsel %vm919_vm2, 0.0, %v979_v10  ;;  %v1038_v15 = vpack.c.bf16 %v864_v6, %v864_v6  ;;  %v1101_v16 = vpack.c.bf16 %v963_v8, %v963_v8  ;;  %v6265_v25 = vpop.f32.mrf.mxu3  ;;  %2256 = vmatmul.bf16.vlgmr.msrb.gmra.mxu3 %v6263_v20  ;;  %v5125_v32 = vld [vmem:[#allocation8 + $0xa8] sm:$0xff] }
 0x190   : > { %v1037_v17 = vpack.c.bf16 %v906_v13, %v906_v13  ;;  %v1102_v19 = vpack.c.bf16 %v1006_v14, %v1006_v14  ;;  %v1230_v12 = vunpack.c.l.b16 %v1070_v1  ;;  %v738_v30 = vmul.f32 %v6139_v35, %v687_v5  ;;  %2540 = vmatmul.bf16.gmra.mxu0 %v6192_v43  ;;  %v4422_v1 = vld [vmem:[#allocation2 + $0xfc] sm:$0xf0]  ;;  %2677 = vmatpush.bf16.msrb.mxu2 %v5125_v32 }
 0x191   : > { %v1166_v26 = vunpack.c.l.b16 %v1038_v15  ;;  %v1293_v28 = vunpack.c.l.b16 %v1101_v16  ;;  %v6269_v37 = vpop.f32.mrf.mxu1  ;;  %v6275_v55 = vor.u32 %v5087_v22, %v4420_v48  ;;  %v6283_v13 = vor.u32 %v5086_v59, %v4422_v1 }
 0x192   : > { %v1165_v34 = vunpack.c.l.b16 %v1037_v17  ;;  %v1294_v39 = vunpack.c.l.b16 %v1102_v19  ;;  %v774_v40 = vadd.f32 %v6162_v38, %v738_v30  ;;  %v4332_v19 = vld [vmem:[#allocation2 + $0x38] sm:$0xf] }
 0x193   : > { %v1354_v21 = vpack.c.b16 %v1293_v28, %v1293_v28  ;;  %v1355_v33 = vpack.c.b16 %v1230_v12, %v1166_v26  ;;  %v5064_v26 = vld [vmem:[#allocation2 + $0x40] sm:$0xf0]  ;;  %v5124_v12 = vld [vmem:[#allocation8 + $0xa0] sm:$0xff] }
 0x194   : > { %v1353_v41 = vpack.c.b16 %v1229_v24, %v1165_v34  ;;  %v1356_v44 = vpack.c.b16 %v1294_v39, %v1294_v39  ;;  %v806_v43 = vmax.f32 %v774_v40, 0.0  ;;  %2678 = vmatpush.bf16.msrb.mxu2 %v5124_v12  ;;  %v6299_v48 = vor.u32 %v5064_v26, %v4332_v19  ;;  %v4344_v26 = vld [vmem:[#allocation2 + $0x50] sm:$0xf]  ;;  %v5067_v12 = vld [vmem:[#allocation2 + $0x58] sm:$0xf0] }
 0x195   : > { %1482 = vst [vmem:[#allocation2 + $0x110] sm:$0xf] %v1354_v21  ;;  %v689_v27 = vpop.f32.mrf.mxu0 }
 0x196   : > { %1481 = vst [vmem:[#allocation2 + $0x108] sm:$0xff] %v1353_v41  ;;  %v739_v51 = vmul.f32 %v6139_v35, %v689_v27  ;;  %v832_v5 = vrot.slane %v806_v43, 7  ;;  %v931_v6 = vrot.slane %v806_v43, 1  ;;  %v1071_v10 = vpack.c.bf16 %v806_v43, %v806_v43 }
 0x197   : > { %1483 = vst [vmem:[#allocation2 + $0x114] sm:$0xff] %v1355_v33  ;;  %v6280_v3 = vpop.f32.mrf.mxu3  ;;  %2123 = vmatmul.bf16.gmra.mxu1 %v6275_v55 }
 0x198   : > { %1484 = vst [vmem:[#allocation2 + $0x11c] sm:$0xf] %v1356_v44  ;;  %v775_v45 = vadd.f32 %v6162_v38, %v739_v51  ;;  %v1231_v22 = vunpack.c.l.b16 %v1071_v10  ;;  %2679 = vmatpush.bf16.msrb.mxu2 %v5123_v49 }
 0x199   : > { %v2086_v35 = vpop.f32.mrf.mxu1 }
 0x19a   : > { %v807_v4 = vmax.f32 %v775_v45, 0.0 }
 0x19b   : > { %v2173_v42 = vpop.f32.mrf.mxu2 }
 0x19c   : > { %v848_v7 = vrot.slane %v807_v4, 7  ;;  %v947_v8 = vrot.slane %v807_v4, 1  ;;  %v1072_v38 = vpack.c.bf16 %v807_v4, %v807_v4  ;;  %v6303_v52 = vadd.f32 %v2173_v42, %v6269_v37 }
 0x19d   : > { %v6297_v33 = vpop.f32.mrf.mxu0  ;;  %2212 = vmatmul.bf16.gmra.mxu2 %v6283_v13  ;;  %v4432_v1 = vld [vmem:[#allocation2 + $0x108] sm:$0xf] }
 0x19e   : > { %v865_v14 = vsel %vm853_vm1, %v832_v5, %v848_v7  ;;  %v881_v15 = vsel %vm853_vm1, %v848_v7, %v832_v5  ;;  %v964_v16 = vsel %vm952_vm3, %v931_v6, %v947_v8  ;;  %v980_v17 = vsel %vm952_vm3, %v947_v8, %v931_v6  ;;  %v5090_v4 = vld [vmem:[#allocation2 + $0x110] sm:$0xf0]  ;;  %v5122_v6 = vld [vmem:[#allocation8 + $0x90] sm:$0xff]  ;;  %v5210_v7 = vld [vmem:[#allocation8 + $0x1b8] sm:$0xff] }
 0x19f   : > { %v908_v28 = vsel %vm819_vm0, 0.0, %v881_v15  ;;  %v1008_v30 = vsel %vm919_vm2, 0.0, %v980_v17  ;;  %v1040_v24 = vpack.c.bf16 %v865_v14, %v865_v14  ;;  %v1103_v34 = vpack.c.bf16 %v964_v16, %v964_v16  ;;  %2261 = vmatmul.bf16.gmra.mxu3 %v6299_v48  ;;  %2680 = vmatpush.bf16.msrb.mxu2 %v5122_v6  ;;  %v5089_v14 = vld [vmem:[#allocation2 + $0x10c] sm:$0xf]  ;;  %v4434_v15 = vld [vmem:[#allocation2 + $0x114] sm:$0xf0] }
 0x1a0   : > { %v1039_v39 = vpack.c.bf16 %v908_v28, %v908_v28  ;;  %v1104_v21 = vpack.c.bf16 %v1008_v30, %v1008_v30  ;;  %v1232_v44 = vunpack.c.l.b16 %v1072_v38  ;;  %2545 = vmatmul.bf16.gmra.mxu0 %v6218_v46  ;;  %v6309_v37 = vor.u32 %v5090_v4, %v4432_v1  ;;  %3277 = vmatpush.bf16.msra.mxu3 %v5210_v7  ;;  %v5121_v46 = vld [vmem:[#allocation8 + $0x88] sm:$0xff]  ;;  %v5120_v28 = vld [vmem:[#allocation8 + $0x80] sm:$0xff]  ;;  %v5218_v30 = vld [vmem:[#allocation8 + $0x1f8] sm:$0xff] }
 0x1a1   : > { %v1168_v41 = vunpack.c.l.b16 %v1040_v24  ;;  %v1295_v40 = vunpack.c.l.b16 %v1103_v34  ;;  %v6307_v59 = vpop.f32.mrf.mxu3  ;;  %v6318_v19 = vor.u32 %v5089_v14, %v4434_v15  ;;  %v6322_v34 = vor.u32 %v5067_v12, %v4344_v26  ;;  %3366 = vmatpush.bf16.msra.mxu0 %v5218_v30  ;;  %v4356_v1 = vld [vmem:[#allocation2 + $0x68] sm:$0xf]  ;;  %v5070_v4 = vld [vmem:[#allocation2 + $0x70] sm:$0xf0]  ;;  %v5056_v7 = vld [vmem:[#allocation2 + $0x4] sm:$0xf] }
 0x1a2   : > { %v1167_v27 = vunpack.c.l.b16 %v1039_v39  ;;  %v1296_v51 = vunpack.c.l.b16 %v1104_v21  ;;  %v2089_v5 = vpop.f32.mrf.mxu1  ;;  %v6344_v6 = vor.u32 %v5070_v4, %v4356_v1  ;;  %v4608_v30 = vld [vmem:[#allocation2 + $0x8] sm:$0xf] }
 0x1a3   : > { %v1358_v53 = vpack.c.b16 %v1295_v40, %v1295_v40  ;;  %v1359_v43 = vpack.c.b16 %v1232_v44, %v1168_v41  ;;  %v2175_v10 = vpop.f32.mrf.mxu2  ;;  %2681 = vmatpush.bf16.msrb.mxu2 %v5121_v46  ;;  %v4602_v46 = vld [vmem:[#allocation2 + $0xc] sm:$0xf0] }
 0x1a4   : > { %v1357_v45 = vpack.c.b16 %v1231_v22, %v1167_v27  ;;  %v1360_v32 = vpack.c.b16 %v1296_v51, %v1296_v51  ;;  %v6313_v38 = vadd.f32 %v2175_v10, %v2086_v35  ;;  %v5226_v35 = vld [vmem:[#allocation8 + $0x238] sm:$0xff]  ;;  %v4605_v26 = vor.u32 %v5056_v7, %v4602_v46  ;;  %v5225_v7 = vld [vmem:[#allocation8 + $0x230] sm:$0xff] }
 0x1a5   : > { %1486 = vst [vmem:[#allocation2 + $0x128] sm:$0xf] %v1358_v53  ;;  %v6311_v8 = vpop.f32.mrf.mxu0  ;;  %3455 = vmatpush.bf16.msra.mxu1 %v5226_v35  ;;  %v5058_v35 = vld [vmem:[#allocation2 + $0x10] sm:$0xf0] }
 0x1a6   : > { %1485 = vst [vmem:[#allocation2 + $0x120] sm:$0xff] %v1357_v45 }
 0x1a7   : > { %1487 = vst [vmem:[#allocation2 + $0x12c] sm:$0xff] %v1359_v43  ;;  %2128 = vmatmul.bf16.gmra.mxu1 %v6309_v37  ;;  %2682 = vmatpush.bf16.msrb.mxu2 %v5120_v28 }
 0x1a8   : > { %1488 = vst [vmem:[#allocation2 + $0x134] sm:$0xf] %v1360_v32 }
 0x1a9   : > { %v6316_v16 = vpop.f32.mrf.mxu3  ;;  %3456 = vmatpush.bf16.msra.mxu1 %v5225_v7 }
 0x1aa   : > { %v2091_v17 = vpop.f32.mrf.mxu1 }
 0x1ad   : > { %v6320_v24 = vpop.f32.mrf.mxu0  ;;  %2217 = vmatmul.bf16.gmra.mxu2 %v6318_v19  ;;  %v4444_v39 = vld [vmem:[#allocation2 + $0x120] sm:$0xf]  ;;  %v5092_v51 = vld [vmem:[#allocation2 + $0x124] sm:$0xf] }
 0x1ae   : > { %v5093_v21 = vld [vmem:[#allocation2 + $0x128] sm:$0xf0]  ;;  %v4446_v49 = vld [vmem:[#allocation2 + $0x12c] sm:$0xf0] }
 0x1af   : > { %2266 = vmatmul.bf16.gmra.mxu3 %v6322_v34  ;;  %v6331_v42 = vor.u32 %v5093_v21, %v4444_v39  ;;  %v6340_v45 = vor.u32 %v5092_v51, %v4446_v49  ;;  %v4368_v51 = vld [vmem:[#allocation2 + $0x80] sm:$0xf] }
 0x1b0   : > { %2550 = vmatmul.bf16.gmra.mxu0 %v6241_v54  ;;  %v2178_v41 = vpop.f32.mrf.mxu2  ;;  %v5217_v49 = vld [vmem:[#allocation8 + $0x1f0] sm:$0xff] }
 0x1b1   : > { %v6327_v44 = vpop.f32.mrf.mxu3  ;;  %v6329_v40 = vadd.f32 %v2178_v41, %v2089_v5  ;;  %3367 = vmatpush.bf16.msra.mxu0 %v5217_v49 }
 0x1b2   : > { %v2094_v22 = vpop.f32.mrf.mxu1 }
 0x1b5   : > { %v6333_v27 = vpop.f32.mrf.mxu0 }
 0x1b7   : > { %2133 = vmatmul.bf16.gmra.mxu1 %v6331_v42 }
 0x1b8   : > { %v2180_v53 = vpop.f32.mrf.mxu2 }
 0x1b9   : > { %v6336_v43 = vpop.f32.mrf.mxu3  ;;  %v6338_v54 = vadd.f32 %v2180_v53, %v2091_v17  ;;  %v5209_v17 = vld [vmem:[#allocation8 + $0x1b0] sm:$0xff] }
 0x1ba   : > { %v2096_v32 = vpop.f32.mrf.mxu1  ;;  %3278 = vmatpush.bf16.msra.mxu3 %v5209_v17 }
 0x1bd   : > { %v6342_v5 = vpop.f32.mrf.mxu0  ;;  %2222 = vmatmul.bf16.gmra.mxu2 %v6340_v45 }
 0x1bf   : > { %2271 = vmatmul.bf16.gmra.mxu3 %v6344_v6 }
 0x1c0   : > { %2555 = vmatmul.bf16.gmra.mxu0 %v6275_v55  ;;  %v2183_v10 = vpop.f32.mrf.mxu2  ;;  %v4609_v55 = vor.u32 %v5058_v35, %v4608_v30 }
 0x1c1   : > { %v6349_v14 = vadd.f32 %v2183_v10, %v2094_v22  ;;  %v5073_v22 = vld [vmem:[#allocation2 + $0x88] sm:$0xf0] }
 0x1c2   : > { %v6351_v15 = vpop.f32.mrf.mxu3  ;;  %v6361_v4 = vor.u32 %v5073_v22, %v4368_v51  ;;  %v4380_v51 = vld [vmem:[#allocation2 + $0x98] sm:$0xf]  ;;  %v5076_v22 = vld [vmem:[#allocation2 + $0xa0] sm:$0xf0] }
 0x1c3   : > { %v6378_v49 = vor.u32 %v5076_v22, %v4380_v51  ;;  %v4392_v22 = vld [vmem:[#allocation2 + $0xb0] sm:$0xf] }
 0x1c4   : > { %v2099_v12 = vpop.f32.mrf.mxu1 }
 0x1c5   : > { %v6353_v28 = vpop.f32.mrf.mxu0 }
 0x1c7   : > { %2594 = vmatmul.bf16.vlgmr.msrb.gmra.mxu1 %v4605_v26 }
 0x1c8   : > { %v2185_v39 = vpop.f32.mrf.mxu2 }
 0x1c9   : > { %v6355_v21 = vadd.f32 %v2185_v39, %v2096_v32 }
 0x1ca   : > { %v6357_v41 = vpop.f32.mrf.mxu3 }
 0x1cc   : > { %v2101_v53 = vpop.f32.mrf.mxu1 }
 0x1cd   : > { %v6359_v1 = vpop.f32.mrf.mxu0  ;;  %2683 = vmatmul.bf16.vlgmr.msrb.gmra.mxu2 %v4609_v55 }
 0x1cf   : > { %2276 = vmatmul.bf16.gmra.mxu3 %v6361_v4 }
 0x1d0   : > { %2560 = vmatmul.bf16.gmra.mxu0 %v6309_v37  ;;  %v2188_v32 = vpop.f32.mrf.mxu2 }
 0x1d1   : > { %v6365_v46 = vadd.f32 %v2188_v32, %v2099_v12  ;;  %v5208_v32 = vld [vmem:[#allocation8 + $0x1a8] sm:$0xff] }
 0x1d2   : > { %v2228_v10 = vpop.f32.mrf.mxu3  ;;  %3279 = vmatpush.bf16.msra.mxu3 %v5208_v32 }
 0x1d3   : > { %v6368_v17 = vadd.f32 %v2228_v10, %v6265_v25 }
 0x1d4   : > { %v2104_v26 = vpop.f32.mrf.mxu1 }
 0x1d5   : > { %7169 = vst [vmem:[#allocation18_spill] sm:$0xff] %v6368_v17  ;;  %v6370_v30 = vpop.f32.mrf.mxu0 }
 0x1d7   : > { %2599 = vmatmul.bf16.gmra.mxu1 %v5955_v36 }
 0x1d8   : > { %v2190_v35 = vpop.f32.mrf.mxu2 }
 0x1d9   : > { %v6373_v39 = vadd.f32 %v2190_v35, %v2101_v53 }
 0x1da   : > { %v2230_v55 = vpop.f32.mrf.mxu3 }
 0x1db   : > { %v6376_v37 = vadd.f32 %v2230_v55, %v6280_v3 }
 0x1dc   : > { %v2106_v12 = vpop.f32.mrf.mxu1 }
 0x1dd   : > { %7170 = vst [vmem:[#allocation19_spill] sm:$0xff] %v6376_v37  ;;  %v6380_v7 = vpop.f32.mrf.mxu0  ;;  %2688 = vmatmul.bf16.gmra.mxu2 %v6263_v20  ;;  %v5216_v37 = vld [vmem:[#allocation8 + $0x1e8] sm:$0xff] }
 0x1de   : > { %3368 = vmatpush.bf16.msra.mxu0 %v5216_v37 }
 0x1df   : > { %2281 = vmatmul.bf16.gmra.mxu3 %v6378_v49 }
 0x1e0   : > { %2565 = vmatmul.bf16.gmra.mxu0 %v6331_v42  ;;  %v2193_v36 = vpop.f32.mrf.mxu2  ;;  %v5079_v42 = vld [vmem:[#allocation2 + $0xb8] sm:$0xf0] }
 0x1e1   : > { %v6385_v25 = vadd.f32 %v2193_v36, %v2104_v26 }
 0x1e2   : > { %v2233_v53 = vpop.f32.mrf.mxu3 }
 0x1e3   : > { %v6388_v10 = vadd.f32 %v2233_v53, %v6307_v59  ;;  %v6398_v59 = vor.u32 %v5079_v42, %v4392_v22  ;;  %v5224_v53 = vld [vmem:[#allocation8 + $0x228] sm:$0xff]  ;;  %v4404_v42 = vld [vmem:[#allocation2 + $0xc8] sm:$0xf] }
 0x1e4   : > { %v2109_v3 = vpop.f32.mrf.mxu1  ;;  %3457 = vmatpush.bf16.msra.mxu1 %v5224_v53 }
 0x1e5   : > { %7171 = vst [vmem:[#allocation20_spill] sm:$0xff] %v6388_v10  ;;  %v6391_v35 = vpop.f32.mrf.mxu0 }
 0x1e7   : > { %2604 = vmatmul.bf16.gmra.mxu1 %v6034_v47 }
 0x1e8   : > { %v2195_v55 = vpop.f32.mrf.mxu2 }
 0x1e9   : > { %v6393_v20 = vadd.f32 %v2195_v55, %v2106_v12 }
 0x1ea   : > { %v2235_v51 = vpop.f32.mrf.mxu3 }
 0x1eb   : > { %v6396_v26 = vadd.f32 %v2235_v51, %v6316_v16 }
 0x1ec   : > { %v2111_v36 = vpop.f32.mrf.mxu1 }
 0x1ed   : > { %7172 = vst [vmem:[#allocation21_spill] sm:$0xff] %v6396_v26  ;;  %2693 = vmatmul.bf16.gmra.mxu2 %v6299_v48  ;;  %v6403_v12 = vpop.f32.mrf.mxu0  ;;  %v5082_v26 = vld [vmem:[#allocation2 + $0xd0] sm:$0xf0] }
 0x1ef   : > { %2286 = vmatmul.bf16.gmra.mxu3 %v6398_v59 }
 0x1f0   : > { %2570 = vmatmul.bf16.gmra.mxu0 %v5986_v18  ;;  %v2198_v47 = vpop.f32.mrf.mxu2  ;;  %v5215_v18 = vld [vmem:[#allocation8 + $0x1e0] sm:$0xff] }
 0x1f1   : > { %v6405_v32 = vadd.f32 %v2198_v47, %v2109_v3  ;;  %3369 = vmatpush.bf16.msra.mxu0 %v5215_v18  ;;  %v6418_v47 = vor.u32 %v5082_v26, %v4404_v42  ;;  %v5212_v26 = vld [vmem:[#allocation8 + $0x1c8] sm:$0xff] }
 0x1f2   : > { %v2238_v55 = vpop.f32.mrf.mxu3 }
 0x1f3   : > { %v6408_v16 = vadd.f32 %v2238_v55, %v6327_v44  ;;  %v5214_v44 = vld [vmem:[#allocation8 + $0x1d8] sm:$0xff] }
 0x1f4   : > { %v2114_v37 = vpop.f32.mrf.mxu1 }
 0x1f5   : > { %7173 = vst [vmem:[#allocation22_spill] sm:$0xff] %v6408_v16  ;;  %v6416_v10 = vpop.f32.mrf.mxu0  ;;  %3370 = vmatpush.bf16.msra.mxu0 %v5214_v44  ;;  %v4416_v44 = vld [vmem:[#allocation2 + $0xe0] sm:$0xf] }
 0x1f7   : > { %2609 = vmatmul.bf16.gmra.mxu1 %v6082_v9 }
 0x1f8   : > { %v2200_v51 = vpop.f32.mrf.mxu2 }
 0x1f9   : > { %v6411_v48 = vadd.f32 %v2200_v51, %v2111_v36  ;;  %v5207_v51 = vld [vmem:[#allocation8 + $0x1a0] sm:$0xff] }
 0x1fa   : > { %v2240_v22 = vpop.f32.mrf.mxu3  ;;  %3280 = vmatpush.bf16.msra.mxu3 %v5207_v51 }
 0x1fb   : > { %v6414_v53 = vadd.f32 %v2240_v22, %v6336_v43  ;;  %v5213_v43 = vld [vmem:[#allocation8 + $0x1d0] sm:$0xff] }
 0x1fc   : > { %v2116_v3 = vpop.f32.mrf.mxu1  ;;  %3371 = vmatpush.bf16.msra.mxu0 %v5213_v43  ;;  %v5223_v43 = vld [vmem:[#allocation8 + $0x220] sm:$0xff] }
 0x1fd   : > { %7174 = vst [vmem:[#allocation23_spill] sm:$0xff] %v6414_v53  ;;  %2698 = vmatmul.bf16.gmra.mxu2 %v6322_v34  ;;  %v6428_v34 = vpop.f32.mrf.mxu0  ;;  %v5211_v53 = vld [vmem:[#allocation8 + $0x1c0] sm:$0xff]  ;;  %3458 = vmatpush.bf16.msra.mxu1 %v5223_v43  ;;  %v4428_v43 = vld [vmem:[#allocation2 + $0xf8] sm:$0xf] }
 0x1ff   : > { %2291 = vmatmul.bf16.gmra.mxu3 %v6418_v47 }
 0x200   : > { %2575 = vmatmul.bf16.gmra.mxu0 %v6042_v63  ;;  %v2203_v9 = vpop.f32.mrf.mxu2 }
 0x201   : > { %v6423_v36 = vadd.f32 %v2203_v9, %v2114_v37  ;;  %3372 = vmatpush.bf16.msra.mxu0 %v5212_v26  ;;  %v5085_v9 = vld [vmem:[#allocation2 + $0xe8] sm:$0xf0] }
 0x202   : > { %v2243_v55 = vpop.f32.mrf.mxu3 }
 0x203   : > { %v6426_v22 = vadd.f32 %v2243_v55, %v6351_v15  ;;  %v6436_v55 = vor.u32 %v5085_v9, %v4416_v44  ;;  %v5155_v44 = vld [vmem:[#allocation2 + $0x34] sm:$0xf] }
 0x204   : > { %v2119_v18 = vpop.f32.mrf.mxu1 }
 0x205   : > { %7175 = vst [vmem:[#allocation24_spill] sm:$0xff] %v6426_v22  ;;  %3373 = vmatpush.bf16.msra.mxu0 %v5211_v53  ;;  %v6439_v51 = vpop.f32.mrf.mxu0 }
 0x207   : > { %2614 = vmatmul.bf16.gmra.mxu1 %v6111_v29 }
 0x208   : > { %v2205_v63 = vpop.f32.mrf.mxu2 }
 0x209   : > { %v6431_v42 = vadd.f32 %v2205_v63, %v2116_v3 }
 0x20a   : > { %v2245_v37 = vpop.f32.mrf.mxu3 }
 0x20b   : > { %v6434_v16 = vadd.f32 %v2245_v37, %v6357_v41 }
 0x20c   : > { %v2121_v15 = vpop.f32.mrf.mxu1 }
 0x20d   : > { %7176 = vst [vmem:[#allocation25_spill] sm:$0xff] %v6434_v16  ;;  %2703 = vmatmul.bf16.gmra.mxu2 %v6344_v6  ;;  %v2171_v6 = vadd.f32 %v6277_v57, %v6246_v61  ;;  %v6451_v37 = vpop.f32.mrf.mxu0 }
 0x20f   : > { %2296 = vmatmul.bf16.gmra.mxu3 %v6436_v55 }
 0x210   : > { %2580 = vmatmul.bf16.gmra.mxu0 %v6085_v11  ;;  %v2208_v29 = vpop.f32.mrf.mxu2 }
 0x211   : > { %v6443_v3 = vadd.f32 %v2208_v29, %v2119_v18  ;;  %v5088_v18 = vld [vmem:[#allocation2 + $0x100] sm:$0xf0]  ;;  %v4710_v29 = vld [vmem:[#allocation2 + $0x3c] sm:$0xf0] }
 0x212   : > { %v2257_v26 = vpop.f32.mrf.mxu3  ;;  %v4713_v22 = vor.u32 %v5155_v44, %v4710_v29 }
 0x213   : > { %v6446_v41 = vadd.f32 %v2257_v26, %v6243_v50  ;;  %v6457_v26 = vor.u32 %v5088_v18, %v4428_v43  ;;  %v5091_v18 = vld [vmem:[#allocation2 + $0x118] sm:$0xf0] }
 0x214   : > { %v2124_v53 = vpop.f32.mrf.mxu1 }
 0x217   : > { %2619 = vmatmul.bf16.gmra.mxu1 %v6134_v2 }
 0x218   : > { %v2210_v63 = vpop.f32.mrf.mxu2 }
 0x219   : > { %v6453_v9 = vadd.f32 %v2210_v63, %v2121_v15  ;;  %v5206_v15 = vld [vmem:[#allocation8 + $0x198] sm:$0xff]  ;;  %v6463_v63 = vpop.f32.mrf.mxu0 }
 0x21a   : > { %v2259_v11 = vpop.f32.mrf.mxu3  ;;  %7177 = vst [vmem:[#allocation26_spill] sm:$0xff] %v6463_v63  ;;  %3281 = vmatpush.bf16.msra.mxu3 %v5206_v15 }
 0x21b   : > { %v6455_v16 = vadd.f32 %v2259_v11, %v2171_v6  ;;  %v5158_v11 = vld [vmem:[#allocation2 + $0x4c] sm:$0xf] }
 0x21c   : > { %v2126_v50 = vpop.f32.mrf.mxu1 }
 0x21d   : > { %2708 = vmatmul.bf16.gmra.mxu2 %v6361_v4 }
 0x21f   : > { %2301 = vmatmul.bf16.gmra.mxu3 %v6457_v26 }
 0x220   : > { %3374 = vmatmul.bf16.vlgmr.msra.gmra.mxu0 %v4713_v22  ;;  %v2213_v2 = vpop.f32.mrf.mxu2  ;;  %v4440_v22 = vld [vmem:[#allocation2 + $0x110] sm:$0xf] }
 0x221   : > { %v6461_v61 = vadd.f32 %v2213_v2, %v2124_v53  ;;  %v4722_v53 = vld [vmem:[#allocation2 + $0x54] sm:$0xf0]  ;;  %v6474_v63 = vpop.f32.mrf.mxu0 }
 0x222   : > { %v2262_v57 = vpop.f32.mrf.mxu3  ;;  %7178 = vst [vmem:[#allocation27_spill] sm:$0xff] %v6474_v63 }
 0x223   : > { %v6466_v17 = vadd.f32 %v2262_v57, %v6303_v52  ;;  %v6476_v52 = vor.u32 %v5091_v18, %v4440_v22  ;;  %v4725_v57 = vor.u32 %v5158_v11, %v4722_v53  ;;  %v5161_v22 = vld [vmem:[#allocation2 + $0x64] sm:$0xf]  ;;  %v4452_v53 = vld [vmem:[#allocation2 + $0x128] sm:$0xf] }
 0x224   : > { %v2129_v6 = vpop.f32.mrf.mxu1 }
 0x227   : > { %2624 = vmatmul.bf16.gmra.mxu1 %v6170_v0  ;;  %v5222_v0 = vld [vmem:[#allocation8 + $0x218] sm:$0xff] }
 0x228   : > { %v2215_v44 = vpop.f32.mrf.mxu2  ;;  %3459 = vmatpush.bf16.msra.mxu1 %v5222_v0  ;;  %v4734_v0 = vld [vmem:[#allocation2 + $0x6c] sm:$0xf0] }
 0x229   : > { %v6469_v4 = vadd.f32 %v2215_v44, %v2126_v50  ;;  %v6485_v23 = vpop.f32.mrf.mxu0 }
 0x22a   : > { %v2264_v43 = vpop.f32.mrf.mxu3  ;;  %7179 = vst [vmem:[#allocation28_spill] sm:$0xff] %v6485_v23 }
 0x22b   : > { %v6472_v29 = vadd.f32 %v2264_v43, %v6313_v38 }
 0x22c   : > { %v2131_v2 = vpop.f32.mrf.mxu1 }
 0x22d   : > { %2713 = vmatmul.bf16.gmra.mxu2 %v6378_v49 }
 0x22f   : > { %2306 = vmatmul.bf16.gmra.mxu3 %v6476_v52 }
 0x230   : > { %3379 = vmatmul.bf16.gmra.mxu0 %v4725_v57  ;;  %v2218_v50 = vpop.f32.mrf.mxu2  ;;  %v5094_v57 = vld [vmem:[#allocation2 + $0x130] sm:$0xf0] }
 0x231   : > { %v6480_v15 = vadd.f32 %v2218_v50, %v2129_v6  ;;  %v6493_v63 = vor.u32 %v5094_v57, %v4452_v53  ;;  %v4464_v57 = vld [vmem:[#allocation2 + $0x140] sm:$0xf] }
 0x232   : > { %v2267_v44 = vpop.f32.mrf.mxu3 }
 0x233   : > { %v6483_v38 = vadd.f32 %v2267_v44, %v6329_v40  ;;  %v4737_v40 = vor.u32 %v5161_v22, %v4734_v0  ;;  %v5234_v44 = vld [vmem:[#allocation9 + $0x38] sm:$0xff]  ;;  %v2507_v22 = vadd.f32 %v6297_v33, %v6446_v41  ;;  %v2509_v33 = vadd.f32 %v6311_v8, %v6455_v16 }
 0x234   : > { %v2134_v43 = vpop.f32.mrf.mxu1  ;;  %3760 = vmatpush.bf16.msra.mxu2 %v5234_v44  ;;  %v5164_v44 = vld [vmem:[#allocation2 + $0x7c] sm:$0xf]  ;;  %v2512_v8 = vadd.f32 %v6320_v24, %v6466_v17  ;;  %v2514_v24 = vadd.f32 %v6333_v27, %v6472_v29 }
 0x235   : > { %v2517_v29 = vadd.f32 %v6342_v5, %v6483_v38 }
 0x237   : > { %2629 = vmatmul.bf16.gmra.mxu1 %v6196_v58  ;;  %v6497_v58 = vpop.f32.mrf.mxu0 }
 0x238   : > { %v2220_v11 = vpop.f32.mrf.mxu2  ;;  %7181 = vst [vmem:[#allocation30_spill] sm:$0xff] %v6497_v58 }
 0x239   : > { %v6488_v49 = vadd.f32 %v2220_v11, %v2131_v2 }
 0x23a   : > { %v2269_v18 = vpop.f32.mrf.mxu3 }
 0x23b   : > { %7180 = vst [vmem:[#allocation29_spill] sm:$0xff] %v6488_v49  ;;  %v6491_v6 = vadd.f32 %v2269_v18, %v6338_v54  ;;  %v5205_v49 = vld [vmem:[#allocation8 + $0x190] sm:$0xff] }
 0x23c   : > { %v2136_v50 = vpop.f32.mrf.mxu1  ;;  %3282 = vmatpush.bf16.msra.mxu3 %v5205_v49 }
 0x23d   : > { %2718 = vmatmul.bf16.gmra.mxu2 %v6398_v59  ;;  %v2519_v5 = vadd.f32 %v6353_v28, %v6491_v6 }
 0x23f   : > { %2311 = vmatmul.bf16.gmra.mxu3 %v6493_v63  ;;  %v6509_v58 = vpop.f32.mrf.mxu0 }
 0x240   : > { %3384 = vmatmul.bf16.gmra.mxu0 %v4737_v40  ;;  %v2223_v2 = vpop.f32.mrf.mxu2 }
 0x241   : > { %v6499_v11 = vadd.f32 %v2223_v2, %v2134_v43  ;;  %v5097_v43 = vld [vmem:[#allocation2 + $0x148] sm:$0xf0]  ;;  %v4746_v2 = vld [vmem:[#allocation2 + $0x84] sm:$0xf0] }
 0x242   : > { %v2272_v23 = vpop.f32.mrf.mxu3  ;;  %v6516_v49 = vor.u32 %v5097_v43, %v4464_v57  ;;  %v4476_v43 = vld [vmem:[#allocation2 + $0x158] sm:$0xf] }
 0x243   : > { %v6502_v54 = vadd.f32 %v2272_v23, %v6349_v14 }
 0x244   : > { %v2595_v18 = vpop.f32.mrf.mxu1 }
 0x245   : > { %v2596_v59 = vadd.f32 %v2595_v18, %v2507_v22  ;;  %v2522_v6 = vadd.f32 %v6359_v1, %v6502_v54 }
 0x247   : > { %2634 = vmatmul.bf16.gmra.mxu1 %v6222_v56  ;;  %v4749_v56 = vor.u32 %v5164_v44, %v4746_v2  ;;  %v6527_v57 = vpop.f32.mrf.mxu0 }
 0x248   : > { %v2225_v53 = vpop.f32.mrf.mxu2 }
 0x249   : > { %v6507_v0 = vadd.f32 %v2225_v53, %v2136_v50  ;;  %v5221_v50 = vld [vmem:[#allocation8 + $0x210] sm:$0xff] }
 0x24a   : > { %v2274_v40 = vpop.f32.mrf.mxu3  ;;  %3460 = vmatpush.bf16.msra.mxu1 %v5221_v50 }
 0x24b   : > { %v6512_v23 = vadd.f32 %v2274_v40, %v6355_v21 }
 0x24c   : > { %v2597_v14 = vpop.f32.mrf.mxu1 }
 0x24d   : > { %v2598_v41 = vadd.f32 %v2597_v14, %v2509_v33  ;;  %2723 = vmatmul.bf16.gmra.mxu2 %v6418_v47  ;;  %v5167_v33 = vld [vmem:[#allocation2 + $0x94] sm:$0xf]  ;;  %v4758_v14 = vld [vmem:[#allocation2 + $0x9c] sm:$0xf0] }
 0x24f   : > { %2316 = vmatmul.bf16.gmra.mxu3 %v6516_v49 }
 0x250   : > { %3389 = vmatmul.bf16.gmra.mxu0 %v4749_v56  ;;  %v2684_v22 = vpop.f32.mrf.mxu2 }
 0x251   : > { %v6520_v18 = vadd.f32 %v2684_v22, %v2596_v59  ;;  %v5100_v59 = vld [vmem:[#allocation2 + $0x160] sm:$0xf0]  ;;  %v4761_v22 = vor.u32 %v5167_v33, %v4758_v14  ;;  %v5103_v14 = vld [vmem:[#allocation2 + $0x178] sm:$0xf0] }
 0x252   : > { %v2277_v21 = vpop.f32.mrf.mxu3  ;;  %v6537_v50 = vor.u32 %v5100_v59, %v4476_v43  ;;  %v4488_v59 = vld [vmem:[#allocation2 + $0x170] sm:$0xf] }
 0x253   : > { %v6523_v53 = vadd.f32 %v2277_v21, %v6365_v46 }
 0x254   : > { %v2600_v16 = vpop.f32.mrf.mxu1 }
 0x255   : > { %v2601_v40 = vadd.f32 %v2600_v16, %v2512_v8  ;;  %v5204_v16 = vld [vmem:[#allocation8 + $0x188] sm:$0xff] }
 0x256   : > { %3283 = vmatpush.bf16.msra.mxu3 %v5204_v16  ;;  %v5203_v16 = vld [vmem:[#allocation8 + $0x180] sm:$0xff] }
 0x257   : > { %2639 = vmatmul.bf16.gmra.mxu1 %v6249_v62  ;;  %v5233_v62 = vld [vmem:[#allocation9 + $0x30] sm:$0xff] }
 0x258   : > { %v2686_v47 = vpop.f32.mrf.mxu2  ;;  %3761 = vmatpush.bf16.msra.mxu2 %v5233_v62  ;;  %v6560_v62 = vor.u32 %v5103_v14, %v4488_v59  ;;  %v4500_v59 = vld [vmem:[#allocation2 + $0x188] sm:$0xf]  ;;  %v5130_v14 = vld [vmem:[#allocation2 + $0x190] sm:$0xf0] }
 0x259   : > { %v6530_v44 = vadd.f32 %v2686_v47, %v2598_v41  ;;  %v6540_v41 = vpop.f32.mrf.mxu0 }
 0x25a   : > { %v2279_v2 = vpop.f32.mrf.mxu3  ;;  %3284 = vmatpush.bf16.msra.mxu3 %v5203_v16 }
 0x25b   : > { %v6533_v46 = vadd.f32 %v2279_v2, %v6373_v39 }
 0x25c   : > { %v2602_v17 = vpop.f32.mrf.mxu1 }
 0x25d   : > { %v2603_v56 = vadd.f32 %v2602_v17, %v2514_v24  ;;  %2728 = vmatmul.bf16.gmra.mxu2 %v6436_v55  ;;  %v5170_v24 = vld [vmem:[#allocation2 + $0xac] sm:$0xf]  ;;  %v4770_v17 = vld [vmem:[#allocation2 + $0xb4] sm:$0xf0] }
 0x25f   : > { %2321 = vmatmul.bf16.gmra.mxu3 %v6537_v50 }
 0x260   : > { %3394 = vmatmul.bf16.gmra.mxu0 %v4761_v22  ;;  %v2689_v21 = vpop.f32.mrf.mxu2 }
 0x261   : > { %v6543_v39 = vadd.f32 %v2689_v21, %v2601_v40  ;;  %v6551_v43 = vpop.f32.mrf.mxu0  ;;  %v5220_v21 = vld [vmem:[#allocation8 + $0x208] sm:$0xff] }
 0x262   : > { %v2282_v8 = vpop.f32.mrf.mxu3  ;;  %3461 = vmatpush.bf16.msra.mxu1 %v5220_v21 }
 0x263   : > { %v6546_v27 = vadd.f32 %v2282_v8, %v6385_v25 }
 0x264   : > { %v2605_v47 = vpop.f32.mrf.mxu1 }
 0x265   : > { %v2606_v55 = vadd.f32 %v2605_v47, %v2517_v29 }
 0x267   : > { %2644 = vmatmul.bf16.gmra.mxu1 %v6283_v13  ;;  %v4773_v13 = vor.u32 %v5170_v24, %v4770_v17  ;;  %v5173_v24 = vld [vmem:[#allocation2 + $0xc4] sm:$0xf]  ;;  %v4782_v17 = vld [vmem:[#allocation2 + $0xcc] sm:$0xf0] }
 0x268   : > { %v2691_v2 = vpop.f32.mrf.mxu2 }
 0x269   : > { %v6553_v33 = vadd.f32 %v2691_v2, %v2603_v56  ;;  %v6566_v29 = vpop.f32.mrf.mxu0 }
 0x26a   : > { %v2284_v40 = vpop.f32.mrf.mxu3 }
 0x26b   : > { %v6556_v25 = vadd.f32 %v2284_v40, %v6393_v20 }
 0x26c   : > { %v2607_v38 = vpop.f32.mrf.mxu1 }
 0x26d   : > { %v2608_v22 = vadd.f32 %v2607_v38, %v2519_v5  ;;  %2733 = vmatmul.bf16.gmra.mxu2 %v6457_v26 }
 0x26f   : > { %2326 = vmatmul.bf16.gmra.mxu3 %v6560_v62 }
 0x270   : > { %3399 = vmatmul.bf16.gmra.mxu0 %v4773_v13  ;;  %v2694_v56 = vpop.f32.mrf.mxu2  ;;  %v4501_v13 = vor.u32 %v5130_v14, %v4500_v59  ;;  %v4794_v14 = vld [vmem:[#allocation2 + $0xe4] sm:$0xf0] }
 0x271   : > { %v6564_v8 = vadd.f32 %v2694_v56, %v2606_v55  ;;  %v6581_v54 = vpop.f32.mrf.mxu0 }
 0x272   : > { %v2287_v20 = vpop.f32.mrf.mxu3 }
 0x273   : > { %v6569_v28 = vadd.f32 %v2287_v20, %v6405_v32  ;;  %v2524_v32 = vadd.f32 %v6370_v30, %v6512_v23  ;;  %v2527_v30 = vadd.f32 %v6380_v7, %v6523_v53  ;;  %v2529_v7 = vadd.f32 %v6391_v35, %v6533_v46 }
 0x274   : > { %v2610_v47 = vpop.f32.mrf.mxu1  ;;  %v2532_v35 = vadd.f32 %v6403_v12, %v6546_v27 }
 0x275   : > { %v2611_v26 = vadd.f32 %v2610_v47, %v2522_v6  ;;  %v4708_v47 = vld [vmem:[#allocation2 + $0x30] sm:$0xf] }
 0x277   : > { %2649 = vmatmul.bf16.gmra.mxu1 %v6318_v19  ;;  %v4785_v19 = vor.u32 %v5173_v24, %v4782_v17 }
 0x278   : > { %v2696_v2 = vpop.f32.mrf.mxu2 }
 0x279   : > { %v6574_v40 = vadd.f32 %v2696_v2, %v2608_v22  ;;  %v5232_v22 = vld [vmem:[#allocation9 + $0x28] sm:$0xff]  ;;  %v6591_v6 = vpop.f32.mrf.mxu0 }
 0x27a   : > { %v2289_v55 = vpop.f32.mrf.mxu3  ;;  %3762 = vmatpush.bf16.msra.mxu2 %v5232_v22 }
 0x27b   : > { %v6577_v5 = vadd.f32 %v2289_v55, %v6411_v48  ;;  %v5176_v55 = vld [vmem:[#allocation2 + $0xdc] sm:$0xf] }
 0x27c   : > { %v2612_v1 = vpop.f32.mrf.mxu1 }
 0x27d   : > { %v2613_v38 = vadd.f32 %v2612_v1, %v2524_v32  ;;  %2738 = vmatmul.bf16.gmra.mxu2 %v6476_v52  ;;  %v4797_v32 = vor.u32 %v5176_v55, %v4794_v14 }
 0x27f   : > { %2331 = vmatmul.bf16.gmra.mxu3 %v4501_v13 }
 0x280   : > { %3404 = vmatmul.bf16.gmra.mxu0 %v4785_v19  ;;  %v2699_v21 = vpop.f32.mrf.mxu2 }
 0x281   : > { %v6584_v56 = vadd.f32 %v2699_v21, %v2611_v26  ;;  %v5156_v26 = vld [vmem:[#allocation2 + $0x38] sm:$0xf0]  ;;  %v6604_v1 = vpop.f32.mrf.mxu0  ;;  %v4720_v21 = vld [vmem:[#allocation2 + $0x48] sm:$0xf] }
 0x282   : > { %v2292_v48 = vpop.f32.mrf.mxu3  ;;  %v4709_v17 = vor.u32 %v5156_v26, %v4708_v47  ;;  %v5231_v26 = vld [vmem:[#allocation9 + $0x20] sm:$0xff] }
 0x283   : > { %v6587_v20 = vadd.f32 %v2292_v48, %v6423_v36  ;;  %3763 = vmatpush.bf16.msra.mxu2 %v5231_v26  ;;  %v5165_v26 = vld [vmem:[#allocation2 + $0x80] sm:$0xf0] }
 0x284   : > { %v2615_v23 = vpop.f32.mrf.mxu1 }
 0x285   : > { %v2616_v16 = vadd.f32 %v2615_v23, %v2527_v30  ;;  %v5159_v30 = vld [vmem:[#allocation2 + $0x50] sm:$0xf0] }
 0x286   : > { %v5179_v23 = vld [vmem:[#allocation2 + $0xf4] sm:$0xf] }
 0x287   : > { %2654 = vmatmul.bf16.gmra.mxu1 %v6340_v45  ;;  %v5219_v45 = vld [vmem:[#allocation8 + $0x200] sm:$0xff] }
 0x288   : > { %v2701_v52 = vpop.f32.mrf.mxu2  ;;  %3462 = vmatpush.bf16.msra.mxu1 %v5219_v45 }
 0x289   : > { %v6594_v2 = vadd.f32 %v2701_v52, %v2613_v38  ;;  %v4806_v52 = vld [vmem:[#allocation2 + $0xfc] sm:$0xf0] }
 0x28a   : > { %v2294_v59 = vpop.f32.mrf.mxu3 }
 0x28b   : > { %v6597_v36 = vadd.f32 %v2294_v59, %v6431_v42  ;;  %v4721_v59 = vor.u32 %v5159_v30, %v4720_v21 }
 0x28c   : > { %v2617_v53 = vpop.f32.mrf.mxu1 }
 0x28d   : > { %v6601_v24 = vadd.f32 %v2617_v53, %v2529_v7  ;;  %2743 = vmatmul.bf16.gmra.mxu2 %v6493_v63 }
 0x28f   : > { %3285 = vmatmul.bf16.vlgmr.msra.gmra.mxu3 %v4709_v17 }
 0x290   : > { %3409 = vmatmul.bf16.gmra.mxu0 %v4797_v32  ;;  %v2704_v38 = vpop.f32.mrf.mxu2  ;;  %v4732_v32 = vld [vmem:[#allocation2 + $0x60] sm:$0xf] }
 0x291   : > { %v6606_v13 = vadd.f32 %v2704_v38, %v2616_v16  ;;  %v6616_v16 = vpop.f32.mrf.mxu0  ;;  %v5162_v38 = vld [vmem:[#allocation2 + $0x68] sm:$0xf0] }
 0x292   : > { %v2297_v42 = vpop.f32.mrf.mxu3 }
 0x293   : > { %v6609_v19 = vadd.f32 %v2297_v42, %v6443_v3  ;;  %v2534_v3 = vadd.f32 %v6416_v10, %v6556_v25  ;;  %v2537_v10 = vadd.f32 %v6428_v34, %v6569_v28  ;;  %v5182_v42 = vld [vmem:[#allocation2 + $0x10c] sm:$0xf] }
 0x294   : > { %v2620_v46 = vpop.f32.mrf.mxu1 }
 0x295   : > { %v2621_v22 = vadd.f32 %v2620_v46, %v2532_v35  ;;  %v4818_v35 = vld [vmem:[#allocation2 + $0x114] sm:$0xf0] }
 0x296   : > { %v4821_v21 = vor.u32 %v5182_v42, %v4818_v35 }
 0x297   : > { %2659 = vmatmul.bf16.gmra.mxu1 %v6154_v60  ;;  %v4809_v60 = vor.u32 %v5179_v23, %v4806_v52 }
 0x298   : > { %v6614_v63 = vpop.f32.mrf.mxu2 }
 0x299   : > { %v6633_v53 = vpop.f32.mrf.mxu0 }
 0x29a   : > { %v2299_v48 = vpop.f32.mrf.mxu3 }
 0x29b   : > { %v6619_v47 = vadd.f32 %v2299_v48, %v6453_v9 }
 0x29c   : > { %v2622_v12 = vpop.f32.mrf.mxu1 }
 0x29d   : > { %v6623_v27 = vadd.f32 %v2622_v12, %v2534_v3  ;;  %2748 = vmatmul.bf16.gmra.mxu2 %v6516_v49  ;;  %v7182_v3 = vld [vmem:[#allocation17_spill] sm:$0xff] }
 0x29f   : > { %3290 = vmatmul.bf16.gmra.mxu3 %v4721_v59  ;;  %v4744_v59 = vld [vmem:[#allocation2 + $0x78] sm:$0xf] }
 0x2a0   : > { %3414 = vmatmul.bf16.gmra.mxu0 %v4809_v60  ;;  %v2709_v55 = vpop.f32.mrf.mxu2 }
 0x2a1   : > { %v6626_v14 = vadd.f32 %v2709_v55, %v2621_v22  ;;  %v4733_v22 = vor.u32 %v5162_v38, %v4732_v32  ;;  %v5185_v55 = vld [vmem:[#allocation2 + $0x124] sm:$0xf] }
 0x2a2   : > { %v2302_v7 = vpop.f32.mrf.mxu3 }
 0x2a3   : > { %v6629_v9 = vadd.f32 %v2302_v7, %v6461_v61  ;;  %v2539_v61 = vadd.f32 %v6439_v51, %v6577_v5  ;;  %v2542_v51 = vadd.f32 %v6451_v37, %v6587_v20  ;;  %v4830_v7 = vld [vmem:[#allocation2 + $0x12c] sm:$0xf0]  ;;  %v5230_v37 = vld [vmem:[#allocation9 + $0x18] sm:$0xff] }
 0x2a4   : > { %v2625_v25 = vpop.f32.mrf.mxu1  ;;  %v4833_v38 = vor.u32 %v5185_v55, %v4830_v7  ;;  %3764 = vmatpush.bf16.msra.mxu2 %v5230_v37  ;;  %v4842_v55 = vld [vmem:[#allocation2 + $0x144] sm:$0xf0] }
 0x2a5   : > { %v2626_v17 = vadd.f32 %v2625_v25, %v2537_v10  ;;  %v7183_v10 = vld [vmem:[#allocation29_spill] sm:$0xff] }
 0x2a7   : > { %2664 = vmatmul.bf16.gmra.mxu1 %v6185_v31  ;;  %v6646_v31 = vpop.f32.mrf.mxu0 }
 0x2a8   : > { %v6636_v49 = vpop.f32.mrf.mxu2 }
 0x2aa   : > { %v2304_v45 = vpop.f32.mrf.mxu3 }
 0x2ab   : > { %v6639_v46 = vadd.f32 %v2304_v45, %v6469_v4  ;;  %v4745_v45 = vor.u32 %v5165_v26, %v4744_v59  ;;  %v5188_v59 = vld [vmem:[#allocation2 + $0x13c] sm:$0xf] }
 0x2ac   : > { %v2627_v34 = vpop.f32.mrf.mxu1  ;;  %v5168_v26 = vld [vmem:[#allocation2 + $0x98] sm:$0xf0] }
 0x2ad   : > { %v6643_v28 = vadd.f32 %v2627_v34, %v2539_v61  ;;  %2753 = vmatmul.bf16.gmra.mxu2 %v6537_v50  ;;  %v4716_v34 = vld [vmem:[#allocation2 + $0x38] sm:$0xf] }
 0x2af   : > { %3295 = vmatmul.bf16.gmra.mxu3 %v4733_v22  ;;  %v6656_v12 = vpop.f32.mrf.mxu0  ;;  %v5157_v22 = vld [vmem:[#allocation2 + $0x40] sm:$0xf0] }
 0x2b0   : > { %3419 = vmatmul.bf16.gmra.mxu0 %v4821_v21  ;;  %v2714_v48 = vpop.f32.mrf.mxu2 }
 0x2b1   : > { %v6648_v30 = vadd.f32 %v2714_v48, %v2626_v17  ;;  %v7185_v48 = vld [vmem:[#allocation27_spill] sm:$0xff] }
 0x2b2   : > { %v2307_v23 = vpop.f32.mrf.mxu3 }
 0x2b3   : > { %v6651_v4 = vadd.f32 %v2307_v23, %v6480_v15  ;;  %v7184_v15 = vld [vmem:[#allocation26_spill] sm:$0xff]  ;;  %v2547_v23 = vadd.f32 %v7185_v48, %v6609_v19 }
 0x2b4   : > { %v2630_v5 = vpop.f32.mrf.mxu1  ;;  %v2544_v17 = vadd.f32 %v7184_v15, %v6597_v36 }
 0x2b5   : > { %v2631_v52 = vadd.f32 %v2630_v5, %v2542_v51 }
 0x2b7   : > { %2669 = vmatmul.bf16.gmra.mxu1 %v7182_v3  ;;  %v6670_v21 = vpop.f32.mrf.mxu0  ;;  %v4717_v3 = vor.u32 %v5157_v22, %v4716_v34  ;;  %v5160_v34 = vld [vmem:[#allocation2 + $0x58] sm:$0xf0] }
 0x2b8   : > { %v6658_v50 = vpop.f32.mrf.mxu2 }
 0x2ba   : > { %v2309_v60 = vpop.f32.mrf.mxu3 }
 0x2bb   : > { %v6661_v25 = vadd.f32 %v2309_v60, %v7183_v10  ;;  %v4756_v60 = vld [vmem:[#allocation2 + $0x90] sm:$0xf] }
 0x2bc   : > { %v2632_v20 = vpop.f32.mrf.mxu1  ;;  %v4757_v37 = vor.u32 %v5168_v26, %v4756_v60  ;;  %v5191_v60 = vld [vmem:[#allocation2 + $0x154] sm:$0xf]  ;;  %v4768_v26 = vld [vmem:[#allocation2 + $0xa8] sm:$0xf] }
 0x2bd   : > { %v6665_v32 = vadd.f32 %v2632_v20, %v2544_v17  ;;  %2758 = vmatmul.bf16.gmra.mxu2 %v6560_v62  ;;  %v4845_v20 = vor.u32 %v5188_v59, %v4842_v55  ;;  %v5171_v55 = vld [vmem:[#allocation2 + $0xb0] sm:$0xf0] }
 0x2bf   : > { %3300 = vmatmul.bf16.gmra.mxu3 %v4745_v45  ;;  %v6684_v17 = vpop.f32.mrf.mxu0 }
 0x2c0   : > { %3424 = vmatmul.bf16.gmra.mxu0 %v4833_v38  ;;  %v2719_v42 = vpop.f32.mrf.mxu2 }
 0x2c1   : > { %v6668_v35 = vadd.f32 %v2719_v42, %v2631_v52 }
 0x2c2   : > { %v2312_v61 = vpop.f32.mrf.mxu3 }
 0x2c3   : > { %v6673_v36 = vadd.f32 %v2312_v61, %v6499_v11  ;;  %v7186_v11 = vld [vmem:[#allocation28_spill] sm:$0xff]  ;;  %v4728_v61 = vld [vmem:[#allocation2 + $0x50] sm:$0xf] }
 0x2c4   : > { %v2635_v51 = vpop.f32.mrf.mxu1  ;;  %v2549_v10 = vadd.f32 %v7186_v11, %v6619_v47  ;;  %v7188_v47 = vld [vmem:[#allocation30_spill] sm:$0xff]  ;;  %v4854_v11 = vld [vmem:[#allocation2 + $0x15c] sm:$0xf0] }
 0x2c5   : > { %v2636_v5 = vadd.f32 %v2635_v51, %v2547_v23  ;;  %v2552_v48 = vadd.f32 %v7188_v47, %v6629_v9  ;;  %v5229_v9 = vld [vmem:[#allocation9 + $0x10] sm:$0xff] }
 0x2c6   : > { %3765 = vmatpush.bf16.msra.mxu2 %v5229_v9  ;;  %v4780_v9 = vld [vmem:[#allocation2 + $0xc0] sm:$0xf] }
 0x2c7   : > { %3463 = vmatmul.bf16.vlgmr.msra.gmra.mxu1 %v4717_v3  ;;  %v4729_v3 = vor.u32 %v5160_v34, %v4728_v61  ;;  %v4857_v61 = vor.u32 %v5191_v60, %v4854_v11  ;;  %v5194_v11 = vld [vmem:[#allocation2 + $0x16c] sm:$0xf] }
 0x2c8   : > { %v6677_v62 = vpop.f32.mrf.mxu2 }
 0x2ca   : > { %v2314_v52 = vpop.f32.mrf.mxu3 }
 0x2cb   : > { %v6680_v7 = vadd.f32 %v2314_v52, %v6507_v0  ;;  %v7187_v0 = vld [vmem:[#allocation18_spill] sm:$0xff]  ;;  %v6695_v52 = vpop.f32.mrf.mxu0 }
 0x2cc   : > { %v2637_v15 = vpop.f32.mrf.mxu1 }
 0x2cd   : > { %v6686_v19 = vadd.f32 %v2637_v15, %v2549_v10  ;;  %v7189_v10 = vld [vmem:[#allocation19_spill] sm:$0xff] }
 0x2cf   : > { %3305 = vmatmul.bf16.gmra.mxu3 %v4757_v37  ;;  %v2554_v37 = vadd.f32 %v6509_v58, %v6639_v46  ;;  %v2557_v58 = vadd.f32 %v6527_v57, %v6651_v4 }
 0x2d0   : > { %3429 = vmatmul.bf16.gmra.mxu0 %v4845_v20  ;;  %v2724_v45 = vpop.f32.mrf.mxu2 }
 0x2d1   : > { %v6688_v38 = vadd.f32 %v2724_v45, %v2636_v5 }
 0x2d2   : > { %v2317_v42 = vpop.f32.mrf.mxu3 }
 0x2d3   : > { %v6691_v22 = vadd.f32 %v2317_v42, %v7187_v0  ;;  %v4769_v42 = vor.u32 %v5171_v55, %v4768_v26  ;;  %v6706_v34 = vpop.f32.mrf.mxu0 }
 0x2d4   : > { %v2640_v23 = vpop.f32.mrf.mxu1 }
 0x2d5   : > { %v2641_v51 = vadd.f32 %v2640_v23, %v2552_v48  ;;  %v4740_v23 = vld [vmem:[#allocation2 + $0x68] sm:$0xf] }
 0x2d7   : > { %3468 = vmatmul.bf16.gmra.mxu1 %v4729_v3  ;;  %v5163_v3 = vld [vmem:[#allocation2 + $0x70] sm:$0xf0] }
 0x2d8   : > { %v6697_v59 = vpop.f32.mrf.mxu2  ;;  %v4741_v60 = vor.u32 %v5163_v3, %v4740_v23 }
 0x2da   : > { %v2319_v5 = vpop.f32.mrf.mxu3 }
 0x2db   : > { %v6700_v15 = vadd.f32 %v2319_v5, %v7189_v10  ;;  %v7192_v5 = vld [vmem:[#allocation20_spill] sm:$0xff] }
 0x2dc   : > { %v2642_v20 = vpop.f32.mrf.mxu1 }
 0x2dd   : > { %v6704_v45 = vadd.f32 %v2642_v20, %v2554_v37  ;;  %v4866_v20 = vld [vmem:[#allocation2 + $0x174] sm:$0xf0] }
 0x2de   : > { %v4869_v3 = vor.u32 %v5194_v11, %v4866_v20  ;;  %v4792_v20 = vld [vmem:[#allocation2 + $0xd8] sm:$0xf] }
 0x2df   : > { %7190 = vst [vmem:[#allocation17_spill] sm:$0xff] %v6704_v45  ;;  %3310 = vmatmul.bf16.gmra.mxu3 %v4769_v42  ;;  %v6717_v42 = vpop.f32.mrf.mxu0  ;;  %v7196_v45 = vld [vmem:[#allocation22_spill] sm:$0xff] }
 0x2e0   : > { %3434 = vmatmul.bf16.gmra.mxu0 %v4857_v61  ;;  %v2729_v0 = vpop.f32.mrf.mxu2  ;;  %v7194_v61 = vld [vmem:[#allocation21_spill] sm:$0xff] }
 0x2e1   : > { %v6708_v47 = vadd.f32 %v2729_v0, %v2641_v51  ;;  %v5174_v51 = vld [vmem:[#allocation2 + $0xc8] sm:$0xf0] }
 0x2e2   : > { %v2322_v48 = vpop.f32.mrf.mxu3  ;;  %v4781_v23 = vor.u32 %v5174_v51, %v4780_v9  ;;  %v5197_v51 = vld [vmem:[#allocation2 + $0x184] sm:$0xf] }
 0x2e3   : > { %7191 = vst [vmem:[#allocation29_spill] sm:$0xff] %v6708_v47  ;;  %v6711_v10 = vadd.f32 %v2322_v48, %v7192_v5  ;;  %v2559_v48 = vadd.f32 %v6540_v41, %v6661_v25 }
 0x2e4   : > { %v2645_v46 = vpop.f32.mrf.mxu1 }
 0x2e5   : > { %v2646_v26 = vadd.f32 %v2645_v46, %v2557_v58 }
 0x2e7   : > { %3473 = vmatmul.bf16.gmra.mxu1 %v4741_v60  ;;  %v4752_v60 = vld [vmem:[#allocation2 + $0x80] sm:$0xf]  ;;  %v6733_v25 = vpop.f32.mrf.mxu0 }
 0x2e8   : > { %v6715_v55 = vpop.f32.mrf.mxu2 }
 0x2e9   : > { %7193 = vst [vmem:[#allocation26_spill] sm:$0xff] %v6715_v55  ;;  %v5166_v55 = vld [vmem:[#allocation2 + $0x88] sm:$0xf0] }
 0x2ea   : > { %v2324_v37 = vpop.f32.mrf.mxu3  ;;  %v4753_v9 = vor.u32 %v5166_v55, %v4752_v60 }
 0x2eb   : > { %v6720_v0 = vadd.f32 %v2324_v37, %v7194_v61  ;;  %v2562_v37 = vadd.f32 %v6551_v43, %v6673_v36  ;;  %v5228_v43 = vld [vmem:[#allocation9 + $0x8] sm:$0xff] }
 0x2ec   : > { %v2647_v57 = vpop.f32.mrf.mxu1  ;;  %3766 = vmatpush.bf16.msra.mxu2 %v5228_v43  ;;  %v5180_v43 = vld [vmem:[#allocation2 + $0xf8] sm:$0xf0] }
 0x2ed   : > { %v6724_v4 = vadd.f32 %v2647_v57, %v2559_v48  ;;  %v5177_v48 = vld [vmem:[#allocation2 + $0xe0] sm:$0xf0]  ;;  %v4878_v57 = vld [vmem:[#allocation2 + $0x18c] sm:$0xf0] }
 0x2ee   : > { %v4881_v55 = vor.u32 %v5197_v51, %v4878_v57  ;;  %v4804_v57 = vld [vmem:[#allocation2 + $0xf0] sm:$0xf] }
 0x2ef   : > { %7195 = vst [vmem:[#allocation27_spill] sm:$0xff] %v6724_v4  ;;  %3315 = vmatmul.bf16.gmra.mxu3 %v4781_v23  ;;  %v7198_v23 = vld [vmem:[#allocation23_spill] sm:$0xff]  ;;  %v6744_v60 = vpop.f32.mrf.mxu0 }
 0x2f0   : > { %3439 = vmatmul.bf16.gmra.mxu0 %v4869_v3  ;;  %v2734_v5 = vpop.f32.mrf.mxu2 }
 0x2f1   : > { %v6726_v58 = vadd.f32 %v2734_v5, %v2646_v26 }
 0x2f2   : > { %v2327_v46 = vpop.f32.mrf.mxu3 }
 0x2f3   : > { %v6729_v47 = vadd.f32 %v2327_v46, %v7196_v45  ;;  %v2564_v45 = vadd.f32 %v6566_v29, %v6680_v7  ;;  %v4793_v46 = vor.u32 %v5177_v48, %v4792_v20  ;;  %v2567_v29 = vadd.f32 %v6581_v54, %v6691_v22 }
 0x2f4   : > { %v2650_v41 = vpop.f32.mrf.mxu1 }
 0x2f5   : > { %v2651_v61 = vadd.f32 %v2650_v41, %v2562_v37 }
 0x2f7   : > { %3478 = vmatmul.bf16.gmra.mxu1 %v4753_v9 }
 0x2f8   : > { %v6735_v11 = vpop.f32.mrf.mxu2 }
 0x2f9   : > { %7197 = vst [vmem:[#allocation28_spill] sm:$0xff] %v6735_v11  ;;  %v7199_v11 = vld [vmem:[#allocation24_spill] sm:$0xff] }
 0x2fa   : > { %v2329_v26 = vpop.f32.mrf.mxu3 }
 0x2fb   : > { %v6738_v3 = vadd.f32 %v2329_v26, %v7198_v23  ;;  %v4764_v26 = vld [vmem:[#allocation2 + $0x98] sm:$0xf]  ;;  %v5169_v23 = vld [vmem:[#allocation2 + $0xa0] sm:$0xf0] }
 0x2fc   : > { %v2652_v36 = vpop.f32.mrf.mxu1  ;;  %v4765_v20 = vor.u32 %v5169_v23, %v4764_v26  ;;  %v4776_v26 = vld [vmem:[#allocation2 + $0xb0] sm:$0xf]  ;;  %v5172_v23 = vld [vmem:[#allocation2 + $0xb8] sm:$0xf0] }
 0x2fd   : > { %v6742_v5 = vadd.f32 %v2652_v36, %v2564_v45  ;;  %v7200_v36 = vld [vmem:[#allocation25_spill] sm:$0xff] }
 0x2ff   : > { %3320 = vmatmul.bf16.gmra.mxu3 %v4793_v46  ;;  %v2569_v46 = vadd.f32 %v6591_v6, %v6700_v15 }
 0x300   : > { %3444 = vmatmul.bf16.gmra.mxu0 %v4881_v55  ;;  %v2739_v37 = vpop.f32.mrf.mxu2 }
 0x301   : > { %v6746_v41 = vadd.f32 %v2739_v37, %v2651_v61 }
 0x302   : > { %v2332_v9 = vpop.f32.mrf.mxu3 }
 0x303   : > { %v2333_v4 = vadd.f32 %v2332_v9, %v7199_v11  ;;  %v4805_v11 = vor.u32 %v5180_v43, %v4804_v57  ;;  %v4816_v57 = vld [vmem:[#allocation2 + $0x108] sm:$0xf]  ;;  %v5183_v43 = vld [vmem:[#allocation2 + $0x110] sm:$0xf0] }
 0x304   : > { %v2655_v7 = vpop.f32.mrf.mxu1 }
 0x305   : > { %v2656_v45 = vadd.f32 %v2655_v7, %v2567_v29  ;;  %v2572_v29 = vadd.f32 %v6604_v1, %v6711_v10 }
 0x307   : > { %3483 = vmatmul.bf16.gmra.mxu1 %v4765_v20 }
 0x308   : > { %v6751_v51 = vpop.f32.mrf.mxu2 }
 0x30a   : > { %v2334_v48 = vpop.f32.mrf.mxu3 }
 0x30b   : > { %v2335_v61 = vadd.f32 %v2334_v48, %v7200_v36  ;;  %v4777_v48 = vor.u32 %v5172_v23, %v4776_v26  ;;  %v5227_v36 = vld [vmem:[#allocation9] sm:$0xff]  ;;  %v4788_v26 = vld [vmem:[#allocation2 + $0xc8] sm:$0xf] }
 0x30c   : > { %v2657_v55 = vpop.f32.mrf.mxu1  ;;  %3767 = vmatpush.bf16.msra.mxu2 %v5227_v36  ;;  %v5175_v23 = vld [vmem:[#allocation2 + $0xd0] sm:$0xf0] }
 0x30d   : > { %v6756_v37 = vadd.f32 %v2657_v55, %v2569_v46 }
 0x30f   : > { %3325 = vmatmul.bf16.gmra.mxu3 %v4805_v11  ;;  %v4817_v11 = vor.u32 %v5183_v43, %v4816_v57  ;;  %v4828_v57 = vld [vmem:[#allocation2 + $0x120] sm:$0xf]  ;;  %v5186_v43 = vld [vmem:[#allocation2 + $0x128] sm:$0xf0] }
 0x310   : > { %v2744_v54 = vpop.f32.mrf.mxu2 }
 0x311   : > { %v6758_v22 = vadd.f32 %v2744_v54, %v2656_v45  ;;  %v2574_v45 = vadd.f32 %v6616_v16, %v6720_v0  ;;  %v4789_v16 = vor.u32 %v5175_v23, %v4788_v26  ;;  %v4800_v26 = vld [vmem:[#allocation2 + $0xe0] sm:$0xf]  ;;  %v5178_v23 = vld [vmem:[#allocation2 + $0xe8] sm:$0xf0] }
 0x312   : > { %v6760_v9 = vpop.f32.mrf.mxu3 }
 0x314   : > { %v2660_v7 = vpop.f32.mrf.mxu1 }
 0x315   : > { %v2661_v20 = vadd.f32 %v2660_v7, %v2572_v29  ;;  %v2577_v29 = vadd.f32 %v6633_v53, %v6729_v47 }
 0x317   : > { %3488 = vmatmul.bf16.gmra.mxu1 %v4777_v48 }
 0x318   : > { %v6764_v6 = vpop.f32.mrf.mxu2 }
 0x31a   : > { %v6766_v15 = vpop.f32.mrf.mxu3 }
 0x31c   : > { %v2662_v46 = vpop.f32.mrf.mxu1 }
 0x31d   : > { %v6770_v55 = vadd.f32 %v2662_v46, %v2574_v45 }
 0x31f   : > { %7201 = vst [vmem:[#allocation18_spill] sm:$0xff] %v6770_v55  ;;  %3330 = vmatmul.bf16.gmra.mxu3 %v4817_v11  ;;  %v4829_v11 = vor.u32 %v5186_v43, %v4828_v57  ;;  %v5189_v57 = vld [vmem:[#allocation2 + $0x140] sm:$0xf0]  ;;  %v2584_v43 = vadd.f32 %v6670_v21, %v2335_v61 }
 0x320   : > { %v2749_v1 = vpop.f32.mrf.mxu2 }
 0x321   : > { %v6772_v10 = vadd.f32 %v2749_v1, %v2661_v20  ;;  %v2579_v20 = vadd.f32 %v6646_v31, %v6738_v3  ;;  %v4840_v3 = vld [vmem:[#allocation2 + $0x138] sm:$0xf] }
 0x322   : > { %v6774_v54 = vpop.f32.mrf.mxu3 }
 0x324   : > { %v2665_v7 = vpop.f32.mrf.mxu1 }
 0x325   : > { %v2666_v48 = vadd.f32 %v2665_v7, %v2577_v29  ;;  %v2582_v29 = vadd.f32 %v6656_v12, %v2333_v4 }
 0x327   : > { %3493 = vmatmul.bf16.gmra.mxu1 %v4789_v16 }
 0x328   : > { %v6778_v0 = vpop.f32.mrf.mxu2 }
 0x329   : > { %7202 = vst [vmem:[#allocation30_spill] sm:$0xff] %v6778_v0  ;;  %v4801_v0 = vor.u32 %v5178_v23, %v4800_v26  ;;  %v5181_v26 = vld [vmem:[#allocation2 + $0x100] sm:$0xf0]  ;;  %v3376_v23 = vadd.f32 %v6684_v17, %v6760_v9  ;;  %v3378_v17 = vadd.f32 %v6695_v52, %v6766_v15  ;;  %v3381_v15 = vadd.f32 %v6706_v34, %v6774_v54 }
 0x32a   : > { %v6780_v45 = vpop.f32.mrf.mxu3 }
 0x32c   : > { %v2667_v36 = vpop.f32.mrf.mxu1 }
 0x32d   : > { %v6784_v46 = vadd.f32 %v2667_v36, %v2579_v20  ;;  %v4841_v36 = vor.u32 %v5189_v57, %v4840_v3 }
 0x32f   : > { %3335 = vmatmul.bf16.gmra.mxu3 %v4829_v11  ;;  %v6798_v11 = vpop.f32.mrf.mxu0 }
 0x330   : > { %v2754_v1 = vpop.f32.mrf.mxu2 }
 0x331   : > { %v6786_v53 = vadd.f32 %v2754_v1, %v2666_v48 }
 0x332   : > { %v6788_v47 = vpop.f32.mrf.mxu3 }
 0x334   : > { %v2670_v7 = vpop.f32.mrf.mxu1 }
 0x335   : > { %v2671_v16 = vadd.f32 %v2670_v7, %v2582_v29 }
 0x337   : > { %3498 = vmatmul.bf16.gmra.mxu1 %v4801_v0  ;;  %v4812_v0 = vld [vmem:[#allocation2 + $0xf8] sm:$0xf]  ;;  %v6806_v61 = vpop.f32.mrf.mxu0 }
 0x338   : > { %v6791_v55 = vpop.f32.mrf.mxu2  ;;  %v4813_v21 = vor.u32 %v5181_v26, %v4812_v0 }
 0x339   : > { %7203 = vst [vmem:[#allocation19_spill] sm:$0xff] %v6791_v55 }
 0x33a   : > { %v6793_v31 = vpop.f32.mrf.mxu3 }
 0x33c   : > { %v2672_v48 = vpop.f32.mrf.mxu1 }
 0x33d   : > { %v6796_v20 = vadd.f32 %v2672_v48, %v2584_v43  ;;  %v4852_v43 = vld [vmem:[#allocation2 + $0x150] sm:$0xf]  ;;  %v5192_v48 = vld [vmem:[#allocation2 + $0x158] sm:$0xf0] }
 0x33e   : > { %v4853_v0 = vor.u32 %v5192_v48, %v4852_v43 }
 0x33f   : > { %7204 = vst [vmem:[#allocation20_spill] sm:$0xff] %v6796_v20  ;;  %3340 = vmatmul.bf16.gmra.mxu3 %v4841_v36  ;;  %v6827_v52 = vpop.f32.mrf.mxu0 }
 0x340   : > { %v2759_v12 = vpop.f32.mrf.mxu2 }
 0x341   : > { %v6800_v4 = vadd.f32 %v2759_v12, %v2671_v16  ;;  %v6812_v16 = vld [vmem:[%s7145_s6] ss:$0 sm:$0xff] }
 0x342   : > { %v6802_v1 = vpop.f32.mrf.mxu3  ;;  %v6822_v12 = vld [vmem:[%s7146_s7] ss:$0 sm:$0xff] }
 0x343   : > { %7205 = vst [vmem:[#allocation21_spill] sm:$0xff] %v6800_v4  ;;  %v3383_v4 = vadd.f32 %v6717_v42, %v6780_v45  ;;  %v3386_v42 = vadd.f32 %v6733_v25, %v6788_v47  ;;  %v3388_v25 = vadd.f32 %v6744_v60, %v6793_v31  ;;  %v3391_v60 = vadd.f32 %v6798_v11, %v6802_v1 }
 0x344   : > { %v3464_v29 = vpop.f32.mrf.mxu1 }
 0x345   : > { %v3465_v7 = vadd.f32 %v3464_v29, %v3376_v23 }
 0x347   : > { %3503 = vmatmul.bf16.gmra.mxu1 %v4813_v21  ;;  %v3544_v3 = vadd.f32 %v3465_v7, %v6520_v18  ;;  %v4824_v7 = vld [vmem:[#allocation2 + $0x110] sm:$0xf]  ;;  %v5184_v21 = vld [vmem:[#allocation2 + $0x118] sm:$0xf0]  ;;  %v6837_v54 = vpop.f32.mrf.mxu0 }
 0x349   : > { %v3580_v36 = vmul.f32 %v6812_v16, %v3544_v3 }
 0x34a   : > { %v6814_v57 = vpop.f32.mrf.mxu3 }
 0x34b   : > { %v3616_v23 = vadd.f32 %v6822_v12, %v3580_v36 }
 0x34c   : > { %v3466_v9 = vpop.f32.mrf.mxu1 }
 0x34d   : > { %v3467_v18 = vadd.f32 %v3466_v9, %v3378_v17  ;;  %v3648_v43 = vmax.f32 %v3616_v23, 0.0  ;;  %v4825_v9 = vor.u32 %v5184_v21, %v4824_v7 }
 0x34f   : > { %v3545_v26 = vadd.f32 %v3467_v18, %v6530_v44  ;;  %3345 = vmatmul.bf16.gmra.mxu3 %v4853_v0  ;;  %v4864_v0 = vld [vmem:[#allocation2 + $0x168] sm:$0xf] }
 0x351   : > { %v3581_v29 = vmul.f32 %v6812_v16, %v3545_v26  ;;  %v5195_v26 = vld [vmem:[#allocation2 + $0x170] sm:$0xf0] }
 0x352   : > { %v6832_v20 = vpop.f32.mrf.mxu3 }
 0x353   : > { %v3617_v3 = vadd.f32 %v6822_v12, %v3581_v29 }
 0x354   : > { %v3469_v17 = vpop.f32.mrf.mxu1 }
 0x355   : > { %v3649_v48 = vmax.f32 %v3617_v3, 0.0  ;;  %v3470_v44 = vadd.f32 %v3469_v17, %v3381_v15  ;;  %v4865_v15 = vor.u32 %v5195_v26, %v4864_v0  ;;  %v4836_v3 = vld [vmem:[#allocation2 + $0x128] sm:$0xf]  ;;  %v5187_v17 = vld [vmem:[#allocation2 + $0x130] sm:$0xf0] }
 0x356   : > { %v4876_v26 = vld [vmem:[#allocation2 + $0x180] sm:$0xf] }
 0x357   : > { %v3680_v18 = vpack.c.bf16 %v3649_v48, %v3648_v43  ;;  %3508 = vmatmul.bf16.gmra.mxu1 %v4825_v9  ;;  %v3546_v36 = vadd.f32 %v3470_v44, %v6543_v39  ;;  %v4837_v44 = vor.u32 %v5187_v17, %v4836_v3  ;;  %v4848_v17 = vld [vmem:[#allocation2 + $0x140] sm:$0xf] }
 0x359   : > { %3768 = vmatmul.bf16.vlgmr.msra.gmra.mxu2 %v3680_v18  ;;  %v3582_v29 = vmul.f32 %v6812_v16, %v3546_v36  ;;  %v6848_v18 = vpop.f32.mrf.mxu0 }
 0x35a   : > { %v6840_v55 = vpop.f32.mrf.mxu3 }
 0x35b   : > { %v3618_v21 = vadd.f32 %v6822_v12, %v3582_v29 }
 0x35c   : > { %v3471_v34 = vpop.f32.mrf.mxu1 }
 0x35d   : > { %v3472_v23 = vadd.f32 %v3471_v34, %v3383_v4  ;;  %v3650_v9 = vmax.f32 %v3618_v21, 0.0  ;;  %v5198_v34 = vld [vmem:[#allocation2 + $0x188] sm:$0xf0] }
 0x35f   : > { %v3547_v7 = vadd.f32 %v3472_v23, %v6553_v33  ;;  %3350 = vmatmul.bf16.gmra.mxu3 %v4865_v15  ;;  %v4877_v15 = vor.u32 %v5198_v34, %v4876_v26 }
 0x361   : > { %v3583_v39 = vmul.f32 %v6812_v16, %v3547_v7 }
 0x362   : > { %v6850_v33 = vpop.f32.mrf.mxu3 }
 0x363   : > { %v3619_v45 = vadd.f32 %v6822_v12, %v3583_v39  ;;  %v6857_v39 = vpop.f32.mrf.mxu0 }
 0x364   : > { %v3474_v43 = vpop.f32.mrf.mxu1 }
 0x365   : > { %v3475_v48 = vadd.f32 %v3474_v43, %v3386_v42  ;;  %v3651_v4 = vmax.f32 %v3619_v45, 0.0  ;;  %v5190_v42 = vld [vmem:[#allocation2 + $0x148] sm:$0xf0] }
 0x367   : > { %3513 = vmatmul.bf16.gmra.mxu1 %v4837_v44  ;;  %v3681_v36 = vpack.c.bf16 %v3651_v4, %v3650_v9  ;;  %v3548_v0 = vadd.f32 %v3475_v48, %v6564_v8  ;;  %v4849_v48 = vor.u32 %v5190_v42, %v4848_v17 }
 0x369   : > { %3773 = vmatmul.bf16.gmra.mxu2 %v3681_v36  ;;  %v3584_v29 = vmul.f32 %v6812_v16, %v3548_v0  ;;  %v3393_v0 = vadd.f32 %v6806_v61, %v6814_v57 }
 0x36a   : > { %v6859_v21 = vpop.f32.mrf.mxu3 }
 0x36b   : > { %v3620_v3 = vadd.f32 %v6822_v12, %v3584_v29  ;;  %v6867_v36 = vpop.f32.mrf.mxu0 }
 0x36c   : > { %v3476_v47 = vpop.f32.mrf.mxu1 }
 0x36d   : > { %v3477_v23 = vadd.f32 %v3476_v47, %v3388_v25 }
 0x36f   : > { %v3549_v7 = vadd.f32 %v3477_v23, %v6574_v40  ;;  %3355 = vmatmul.bf16.gmra.mxu3 %v4877_v15  ;;  %v3652_v40 = vmax.f32 %v3620_v3, 0.0  ;;  %v4860_v23 = vld [vmem:[#allocation2 + $0x158] sm:$0xf]  ;;  %v3396_v15 = vadd.f32 %v6827_v52, %v6832_v20  ;;  %v3398_v20 = vadd.f32 %v6837_v54, %v6840_v55 }
 0x370   : > { %v3401_v54 = vadd.f32 %v6848_v18, %v6850_v33  ;;  %v2712_v18 = vadd.f32 %v6636_v49, %v6623_v27 }
 0x371   : > { %v3585_v8 = vmul.f32 %v6812_v16, %v3549_v7 }
 0x372   : > { %v6871_v26 = vpop.f32.mrf.mxu3 }
 0x373   : > { %v3621_v31 = vadd.f32 %v6822_v12, %v3585_v8  ;;  %v6880_v57 = vpop.f32.mrf.mxu0 }
 0x374   : > { %v3479_v45 = vpop.f32.mrf.mxu1 }
 0x375   : > { %v3480_v43 = vadd.f32 %v3479_v45, %v3391_v60  ;;  %v3653_v44 = vmax.f32 %v3621_v31, 0.0  ;;  %v4888_v45 = vld [vmem:[#allocation2 + $0x198] sm:$0xf] }
 0x377   : > { %3518 = vmatmul.bf16.gmra.mxu1 %v4849_v48  ;;  %v3682_v9 = vpack.c.bf16 %v3653_v44, %v3652_v40  ;;  %v3550_v4 = vadd.f32 %v3480_v43, %v6584_v56  ;;  %v5193_v56 = vld [vmem:[#allocation2 + $0x160] sm:$0xf0]  ;;  %v2707_v40 = vadd.f32 %v6614_v63, %v6601_v24 }
 0x378   : > { %v4861_v17 = vor.u32 %v5193_v56, %v4860_v23  ;;  %v5201_v43 = vld [vmem:[#allocation2 + $0x1a0] sm:$0xf0] }
 0x379   : > { %3778 = vmatmul.bf16.gmra.mxu2 %v3682_v9  ;;  %v3586_v1 = vmul.f32 %v6812_v16, %v3550_v4  ;;  %v4889_v48 = vor.u32 %v5201_v43, %v4888_v45 }
 0x37a   : > { %v6882_v8 = vpop.f32.mrf.mxu3 }
 0x37b   : > { %v3622_v29 = vadd.f32 %v6822_v12, %v3586_v1  ;;  %v3410_v4 = vpop.f32.mrf.mxu0 }
 0x37c   : > { %v3481_v11 = vpop.f32.mrf.mxu1 }
 0x37d   : > { %v3482_v34 = vadd.f32 %v3481_v11, %v3393_v0  ;;  %v3654_v42 = vmax.f32 %v3622_v29, 0.0  ;;  %v5196_v29 = vld [vmem:[#allocation2 + $0x178] sm:$0xf0] }
 0x37f   : > { %v3551_v25 = vadd.f32 %v3482_v34, %v6594_v2  ;;  %3360 = vmatmul.bf16.gmra.mxu3 %v4889_v48  ;;  %v5200_v34 = vld [vmem:[#allocation2 + $0x19c] sm:$0xf] }
 0x381   : > { %v3587_v47 = vmul.f32 %v6812_v16, %v3551_v25  ;;  %v4890_v25 = vld [vmem:[#allocation2 + $0x1a4] sm:$0xf0] }
 0x382   : > { %v3321_v0 = vpop.f32.mrf.mxu3  ;;  %v4893_v55 = vor.u32 %v5200_v34, %v4890_v25  ;;  %v3408_v34 = vadd.f32 %v6880_v57, %v6882_v8 }
 0x383   : > { %v3623_v7 = vadd.f32 %v6822_v12, %v3587_v47  ;;  %v4872_v47 = vld [vmem:[#allocation2 + $0x170] sm:$0xf] }
 0x384   : > { %v3484_v61 = vpop.f32.mrf.mxu1  ;;  %3449 = vmatmul.bf16.gmra.mxu0 %v4893_v55  ;;  %v4873_v56 = vor.u32 %v5196_v29, %v4872_v47 }
 0x385   : > { %v3485_v3 = vadd.f32 %v3484_v61, %v3396_v15  ;;  %v3655_v2 = vmax.f32 %v3623_v7, 0.0 }
 0x387   : > { %3523 = vmatmul.bf16.gmra.mxu1 %v4861_v17  ;;  %v3683_v60 = vpack.c.bf16 %v3655_v2, %v3654_v42  ;;  %v3552_v31 = vadd.f32 %v3485_v3, %v6606_v13  ;;  %v3412_v3 = vpop.f32.mrf.mxu0  ;;  %v3403_v2 = vadd.f32 %v6857_v39, %v6859_v21 }
 0x389   : > { %3783 = vmatmul.bf16.gmra.mxu2 %v3683_v60  ;;  %v3588_v44 = vmul.f32 %v6812_v16, %v3552_v31 }
 0x38a   : > { %v3323_v17 = vpop.f32.mrf.mxu3 }
 0x38b   : > { %v3624_v1 = vadd.f32 %v6822_v12, %v3588_v44 }
 0x38c   : > { %v3486_v52 = vpop.f32.mrf.mxu1 }
 0x38d   : > { %v3487_v9 = vadd.f32 %v3486_v52, %v3398_v20  ;;  %v3656_v15 = vmax.f32 %v3624_v1, 0.0  ;;  %v4884_v20 = vld [vmem:[#allocation2 + $0x188] sm:$0xf]  ;;  %v5199_v52 = vld [vmem:[#allocation2 + $0x190] sm:$0xf0] }
 0x38e   : > { %v4885_v27 = vor.u32 %v5199_v52, %v4884_v20 }
 0x38f   : > { %v3553_v11 = vadd.f32 %v3487_v9, %v2707_v40  ;;  %v3415_v40 = vpop.f32.mrf.mxu0 }
 0x391   : > { %v3589_v13 = vmul.f32 %v6812_v16, %v3553_v11 }
 0x392   : > { %v3326_v44 = vpop.f32.mrf.mxu3 }
 0x393   : > { %v3625_v24 = vadd.f32 %v6822_v12, %v3589_v13 }
 0x394   : > { %v3489_v63 = vpop.f32.mrf.mxu1 }
 0x395   : > { %v3490_v23 = vadd.f32 %v3489_v63, %v3401_v54  ;;  %v3657_v7 = vmax.f32 %v3625_v24, 0.0  ;;  %v4896_v24 = vld [vmem:[#allocation2 + $0x1a0] sm:$0xf]  ;;  %v5202_v63 = vld [vmem:[#allocation2 + $0x1a8] sm:$0xf0] }
 0x397   : > { %3528 = vmatmul.bf16.gmra.mxu1 %v4873_v56  ;;  %v3684_v61 = vpack.c.bf16 %v3657_v7, %v3656_v15  ;;  %v3554_v42 = vadd.f32 %v3490_v23, %v6626_v14  ;;  %v3406_v14 = vadd.f32 %v6867_v36, %v6871_v26  ;;  %v2717_v36 = vadd.f32 %v6658_v50, %v6643_v28  ;;  %v3417_v26 = vpop.f32.mrf.mxu0 }
 0x398   : > { %v3411_v56 = vadd.f32 %v3410_v4, %v3321_v0  ;;  %v4897_v15 = vor.u32 %v5202_v63, %v4896_v24  ;;  %v7206_v63 = vld [vmem:[#allocation29_spill] sm:$0xff] }
 0x399   : > { %3788 = vmatmul.bf16.gmra.mxu2 %v3684_v61  ;;  %v3590_v33 = vmul.f32 %v6812_v16, %v3554_v42 }
 0x39a   : > { %v3328_v47 = vpop.f32.mrf.mxu3 }
 0x39b   : > { %v3626_v48 = vadd.f32 %v6822_v12, %v3590_v33 }
 0x39c   : > { %v3491_v60 = vpop.f32.mrf.mxu1 }
 0x39d   : > { %v3492_v31 = vadd.f32 %v3491_v60, %v3403_v2  ;;  %v3658_v49 = vmax.f32 %v3626_v48, 0.0 }
 0x39f   : > { %v3555_v45 = vadd.f32 %v3492_v31, %v2712_v18  ;;  %v3420_v50 = vpop.f32.mrf.mxu0  ;;  %v3413_v18 = vadd.f32 %v3412_v3, %v3323_v17  ;;  %v2722_v31 = vadd.f32 %v6677_v62, %v6665_v32 }
 0x3a1   : > { %v3591_v43 = vmul.f32 %v6812_v16, %v3555_v45 }
 0x3a2   : > { %v3331_v42 = vpop.f32.mrf.mxu3 }
 0x3a3   : > { %v3627_v39 = vadd.f32 %v6822_v12, %v3591_v43 }
 0x3a4   : > { %v3494_v21 = vpop.f32.mrf.mxu1 }
 0x3a5   : > { %v3495_v9 = vadd.f32 %v3494_v21, %v3406_v14  ;;  %v3659_v11 = vmax.f32 %v3627_v39, 0.0  ;;  %v3416_v14 = vadd.f32 %v3415_v40, %v3326_v44 }
 0x3a7   : > { %3533 = vmatmul.bf16.gmra.mxu1 %v4885_v27  ;;  %v3685_v13 = vpack.c.bf16 %v3659_v11, %v3658_v49  ;;  %v3556_v1 = vadd.f32 %v3495_v9, %v6648_v30  ;;  %v3422_v43 = vpop.f32.mrf.mxu0  ;;  %v3418_v27 = vadd.f32 %v3417_v26, %v3328_v47 }
 0x3a9   : > { %3793 = vmatmul.bf16.gmra.mxu2 %v3685_v13  ;;  %v3592_v29 = vmul.f32 %v6812_v16, %v3556_v1  ;;  %v2727_v13 = vadd.f32 %v6697_v59, %v6686_v19 }
 0x3aa   : > { %v3333_v48 = vpop.f32.mrf.mxu3 }
 0x3ab   : > { %v3628_v30 = vadd.f32 %v6822_v12, %v3592_v29  ;;  %v6929_v29 = vpop.f32.mrf.mxu2 }
 0x3ac   : > { %v3496_v25 = vpop.f32.mrf.mxu1 }
 0x3ad   : > { %v3497_v55 = vadd.f32 %v3496_v25, %v3408_v34  ;;  %v3660_v61 = vmax.f32 %v3628_v30, 0.0  ;;  %v6935_v30 = vld [vmem:[%s7147_s8] ss:$0 sm:$0xff] }
 0x3af   : > { %v3557_v54 = vadd.f32 %v3497_v55, %v2717_v36  ;;  %v3425_v62 = vpop.f32.mrf.mxu0  ;;  %v3421_v36 = vadd.f32 %v3420_v50, %v3331_v42 }
 0x3b1   : > { %v3593_v23 = vmul.f32 %v6812_v16, %v3557_v54 }
 0x3b2   : > { %v3336_v49 = vpop.f32.mrf.mxu3 }
 0x3b3   : > { %v3629_v57 = vadd.f32 %v6822_v12, %v3593_v23 }
 0x3b4   : > { %v3499_v8 = vpop.f32.mrf.mxu1 }
 0x3b5   : > { %v3500_v7 = vadd.f32 %v3499_v8, %v3411_v56  ;;  %v3661_v28 = vmax.f32 %v3629_v57, 0.0  ;;  %v5237_v56 = vld [vmem:[%s5813_s2] sm:$0xff]   ;;  %v6941_v57 = vld [vmem:[%s7148_s9] ss:$0 sm:$0xff] }
 0x3b6   : > { %v7207_v8 = vld [vmem:[#allocation17_spill] sm:$0xff] }
 0x3b7   : > { %3538 = vmatmul.bf16.gmra.mxu1 %v4897_v15  ;;  %v3686_v2 = vpack.c.bf16 %v3661_v28, %v3660_v61  ;;  %v3558_v60 = vadd.f32 %v3500_v7, %v6668_v35  ;;  %v3427_v47 = vpop.f32.mrf.mxu0  ;;  %v3423_v15 = vadd.f32 %v3422_v43, %v3333_v48  ;;  %v7208_v7 = vld [vmem:[#allocation26_spill] sm:$0xff] }
 0x3b8   : > { %v2732_v61 = vadd.f32 %v7208_v7, %v7207_v8 }
 0x3b9   : > { %3798 = vmatmul.bf16.gmra.mxu2 %v3686_v2  ;;  %v3594_v4 = vmul.f32 %v6812_v16, %v3558_v60 }
 0x3ba   : > { %v3338_v55 = vpop.f32.mrf.mxu3 }
 0x3bb   : > { %v3630_v52 = vadd.f32 %v6822_v12, %v3594_v4 }
 0x3bc   : > { %v3501_v33 = vpop.f32.mrf.mxu1 }
 0x3bd   : > { %v3502_v0 = vadd.f32 %v3501_v33, %v3413_v18  ;;  %v3662_v3 = vmax.f32 %v3630_v52, 0.0  ;;  %v5238_v18 = vunpack.c.l.bf16 %v5237_v56 }
 0x3bf   : > { %v3559_v45 = vadd.f32 %v3502_v0, %v2722_v31  ;;  %v3430_v33 = vpop.f32.mrf.mxu0 }
 0x3c1   : > { %v3595_v20 = vmul.f32 %v6812_v16, %v3559_v45 }
 0x3c2   : > { %v3341_v31 = vpop.f32.mrf.mxu3 }
 0x3c3   : > { %v3631_v39 = vadd.f32 %v6822_v12, %v3595_v20  ;;  %v3426_v20 = vadd.f32 %v3425_v62, %v3336_v49  ;;  %v3431_v8 = vadd.f32 %v3430_v33, %v3341_v31 }
 0x3c4   : > { %v3504_v35 = vpop.f32.mrf.mxu1 }
 0x3c5   : > { %v3505_v21 = vadd.f32 %v3504_v35, %v3416_v14  ;;  %v3663_v17 = vmax.f32 %v3631_v39, 0.0 }
 0x3c7   : > { %v3687_v9 = vpack.c.bf16 %v3663_v17, %v3662_v3  ;;  %v3560_v32 = vadd.f32 %v3505_v21, %v6688_v38  ;;  %v5239_v21 = vunpack.c.h.bf16 %v5237_v56  ;;  %v3432_v49 = vpop.f32.mrf.mxu0 }
 0x3c9   : > { %3803 = vmatmul.bf16.gmra.mxu2 %v3687_v9  ;;  %v3596_v1 = vmul.f32 %v6812_v16, %v3560_v32 }
 0x3cb   : > { %v3632_v25 = vadd.f32 %v6822_v12, %v3596_v1 }
 0x3cc   : > { %v3506_v11 = vpop.f32.mrf.mxu1 }
 0x3cd   : > { %v3507_v40 = vadd.f32 %v3506_v11, %v3418_v27  ;;  %v3664_v24 = vmax.f32 %v3632_v25, 0.0  ;;  %v3343_v11 = vpop.f32.mrf.mxu3  ;;  %v7209_v25 = vld [vmem:[#allocation27_spill] sm:$0xff] }
 0x3cf   : > { %v3561_v44 = vadd.f32 %v3507_v40, %v2727_v13  ;;  %v5300_v40 = vld [vmem:[%s5813_s2 + $0x8] sm:$0xff]  }
 0x3d1   : > { %v3597_v34 = vmul.f32 %v6812_v16, %v3561_v44  ;;  %v3428_v44 = vadd.f32 %v3427_v47, %v3338_v55 }
 0x3d3   : > { %v3633_v38 = vadd.f32 %v6822_v12, %v3597_v34 }
 0x3d4   : > { %v3509_v26 = vpop.f32.mrf.mxu1 }
 0x3d5   : > { %v3510_v54 = vadd.f32 %v3509_v26, %v3421_v36  ;;  %v3665_v19 = vmax.f32 %v3633_v38, 0.0  ;;  %v7210_v36 = vld [vmem:[#allocation28_spill] sm:$0xff]  ;;  %v3346_v7 = vpop.f32.mrf.mxu3 }
 0x3d6   : > { %v2737_v38 = vadd.f32 %v7210_v36, %v7209_v25 }
 0x3d7   : > { %v3688_v59 = vpack.c.bf16 %v3665_v19, %v3664_v24  ;;  %v3562_v23 = vadd.f32 %v3510_v54, %v7206_v63  ;;  %v5242_v63 = vunpack.c.l.bf16 %v5300_v40 }
 0x3d9   : > { %3808 = vmatmul.bf16.gmra.mxu2 %v3688_v59  ;;  %v3598_v42 = vmul.f32 %v6812_v16, %v3562_v23 }
 0x3db   : > { %v3634_v48 = vadd.f32 %v6822_v12, %v3598_v42 }
 0x3dc   : > { %v3511_v28 = vpop.f32.mrf.mxu1  ;;  %v3769_v50 = vpop.f32.mrf.mxu2 }
 0x3dd   : > { %v3512_v2 = vadd.f32 %v3511_v28, %v3423_v15  ;;  %v3853_v60 = vmul.f32 %v6935_v30, %v3769_v50  ;;  %v3666_v9 = vmax.f32 %v3634_v48, 0.0  ;;  %v3435_v15 = vpop.f32.mrf.mxu0  ;;  %v5301_v48 = vld [vmem:[%s5813_s2 + $0x10] sm:$0xff]  }
 0x3df   : > { %v3563_v4 = vadd.f32 %v3512_v2, %v2732_v61  ;;  %v3889_v0 = vadd.f32 %v6941_v57, %v3853_v60  ;;  %v5243_v2 = vunpack.c.h.bf16 %v5300_v40 }
 0x3e1   : > { %v3599_v45 = vmul.f32 %v6812_v16, %v3563_v4  ;;  %v3985_v43 = vadd.f32 %v5238_v18, %v3889_v0 }
 0x3e3   : > { %v4017_v52 = vmax.f32 %v3985_v43, 0.0  ;;  %v3635_v14 = vadd.f32 %v6822_v12, %v3599_v45 }
 0x3e4   : > { %v3514_v39 = vpop.f32.mrf.mxu1  ;;  %v3771_v35 = vpop.f32.mrf.mxu2 }
 0x3e5   : > { %4049 = vst [vmem:[%s6952_s26] sm:$0xff] %v4017_v52  ;;  %v3515_v3 = vadd.f32 %v3514_v39, %v3426_v20  ;;  %v3854_v17 = vmul.f32 %v6935_v30, %v3771_v35  ;;  %v3667_v32 = vmax.f32 %v3635_v14, 0.0  ;;  %v3433_v20 = vadd.f32 %v3432_v49, %v3343_v11 }
 0x3e6   : > { %v2742_v14 = vadd.f32 %v6751_v51, %v6742_v5  ;;  %v3436_v51 = vadd.f32 %v3435_v15, %v3346_v7 }
 0x3e7   : > { %v3890_v27 = vadd.f32 %v6941_v57, %v3854_v17  ;;  %v3689_v62 = vpack.c.bf16 %v3667_v32, %v3666_v9  ;;  %v3564_v13 = vadd.f32 %v3515_v3, %v6726_v58  ;;  %v3348_v3 = vpop.f32.mrf.mxu3 }
 0x3e9   : > { %v3986_v1 = vadd.f32 %v5239_v21, %v3890_v27  ;;  %3813 = vmatmul.bf16.gmra.mxu2 %v3689_v62  ;;  %v3600_v24 = vmul.f32 %v6812_v16, %v3564_v13  ;;  %v3437_v21 = vpop.f32.mrf.mxu0 }
 0x3eb   : > { %v4018_v34 = vmax.f32 %v3986_v1, 0.0  ;;  %v3636_v55 = vadd.f32 %v6822_v12, %v3600_v24 }
 0x3ec   : > { %v3516_v26 = vpop.f32.mrf.mxu1  ;;  %v3774_v54 = vpop.f32.mrf.mxu2 }
 0x3ed   : > { %4050 = vst [vmem:[%s6952_s26 + $0x8] sm:$0xff] %v4018_v34  ;;  %v3517_v19 = vadd.f32 %v3516_v26, %v3428_v44  ;;  %v3855_v59 = vmul.f32 %v6935_v30, %v3774_v54  ;;  %v3668_v4 = vmax.f32 %v3636_v55, 0.0  ;;  %v5247_v34 = vunpack.c.h.bf16 %v5301_v48 }
 0x3ee   : > { %v2747_v55 = vadd.f32 %v6764_v6, %v6756_v37 }
 0x3ef   : > { %v3565_v23 = vadd.f32 %v3517_v19, %v2737_v38  ;;  %v3891_v58 = vadd.f32 %v6941_v57, %v3855_v59  ;;  %v3351_v24 = vpop.f32.mrf.mxu3 }
 0x3f1   : > { %v3601_v56 = vmul.f32 %v6812_v16, %v3565_v23  ;;  %v3987_v47 = vadd.f32 %v5242_v63, %v3891_v58  ;;  %v3440_v54 = vpop.f32.mrf.mxu0  ;;  %v5302_v58 = vld [vmem:[%s5813_s2 + $0x18] sm:$0xff]  }
 0x3f2   : > { %v3441_v6 = vadd.f32 %v3440_v54, %v3351_v24 }
 0x3f3   : > { %v4019_v61 = vmax.f32 %v3987_v47, 0.0  ;;  %v3637_v28 = vadd.f32 %v6822_v12, %v3601_v56  ;;  %v3438_v56 = vadd.f32 %v3437_v21, %v3348_v3 }
 0x3f4   : > { %v3519_v50 = vpop.f32.mrf.mxu1  ;;  %v3776_v42 = vpop.f32.mrf.mxu2 }
 0x3f5   : > { %4051 = vst [vmem:[%s6952_s26 + $0x10] sm:$0xff] %v4019_v61  ;;  %v3520_v60 = vadd.f32 %v3519_v50, %v3431_v8  ;;  %v3856_v18 = vmul.f32 %v6935_v30, %v3776_v42  ;;  %v3669_v0 = vmax.f32 %v3637_v28, 0.0  ;;  %v5250_v50 = vunpack.c.l.bf16 %v5302_v58 }
 0x3f7   : > { %v3892_v45 = vadd.f32 %v6941_v57, %v3856_v18  ;;  %v3690_v43 = vpack.c.bf16 %v3669_v0, %v3668_v4  ;;  %v3566_v33 = vadd.f32 %v3520_v60, %v6746_v41  ;;  %v5246_v41 = vunpack.c.l.bf16 %v5301_v48  ;;  %v3353_v60 = vpop.f32.mrf.mxu3 }
 0x3f9   : > { %v3988_v31 = vadd.f32 %v5243_v2, %v3892_v45  ;;  %3818 = vmatmul.bf16.gmra.mxu2 %v3690_v43  ;;  %v3602_v17 = vmul.f32 %v6812_v16, %v3566_v33  ;;  %v3442_v2 = vpop.f32.mrf.mxu0 }
 0x3fb   : > { %v4020_v52 = vmax.f32 %v3988_v31, 0.0  ;;  %v3638_v5 = vadd.f32 %v6822_v12, %v3602_v17  ;;  %v5251_v31 = vunpack.c.h.bf16 %v5302_v58  ;;  %v5303_v17 = vld [vmem:[%s5813_s2 + $0x20] sm:$0xff]  }
 0x3fc   : > { %v3521_v39 = vpop.f32.mrf.mxu1  ;;  %v3779_v35 = vpop.f32.mrf.mxu2 }
 0x3fd   : > { %4052 = vst [vmem:[%s6952_s26 + $0x18] sm:$0xff] %v4020_v52  ;;  %v3522_v9 = vadd.f32 %v3521_v39, %v3433_v20  ;;  %v3857_v32 = vmul.f32 %v6935_v30, %v3779_v35  ;;  %v3670_v38 = vmax.f32 %v3638_v5, 0.0 }
 0x3ff   : > { %v3567_v27 = vadd.f32 %v3522_v9, %v2742_v14  ;;  %v3893_v62 = vadd.f32 %v6941_v57, %v3857_v32  ;;  %v3443_v32 = vadd.f32 %v3442_v2, %v3353_v60  ;;  %v7213_v2 = vld [vmem:[#allocation19_spill] sm:$0xff] }
 0x400   : > { %v2757_v60 = vadd.f32 %v7213_v2, %v6784_v46 }
 0x401   : > { %v3603_v49 = vmul.f32 %v6812_v16, %v3567_v27  ;;  %v3989_v11 = vadd.f32 %v5246_v41, %v3893_v62  ;;  %v3445_v9 = vpop.f32.mrf.mxu0  ;;  %v3356_v41 = vpop.f32.mrf.mxu3  ;;  %v7211_v62 = vld [vmem:[#allocation18_spill] sm:$0xff] }
 0x403   : > { %v4021_v13 = vmax.f32 %v3989_v11, 0.0  ;;  %v3639_v1 = vadd.f32 %v6822_v12, %v3603_v49  ;;  %v7212_v49 = vld [vmem:[#allocation30_spill] sm:$0xff] }
 0x404   : > { %v3524_v40 = vpop.f32.mrf.mxu1  ;;  %v3781_v44 = vpop.f32.mrf.mxu2  ;;  %v2752_v11 = vadd.f32 %v7212_v49, %v7211_v62 }
 0x405   : > { %4053 = vst [vmem:[%s6952_s26 + $0x20] sm:$0xff] %v4021_v13  ;;  %v3525_v25 = vadd.f32 %v3524_v40, %v3436_v51  ;;  %v3858_v36 = vmul.f32 %v6935_v30, %v3781_v44  ;;  %v3671_v26 = vmax.f32 %v3639_v1, 0.0 }
 0x407   : > { %v3894_v19 = vadd.f32 %v6941_v57, %v3858_v36  ;;  %v3691_v59 = vpack.c.bf16 %v3671_v26, %v3670_v38  ;;  %v3568_v63 = vadd.f32 %v3525_v25, %v6758_v22  ;;  %v3446_v26 = vadd.f32 %v3445_v9, %v3356_v41 }
 0x409   : > { %v3990_v23 = vadd.f32 %v5247_v34, %v3894_v19  ;;  %3823 = vmatmul.bf16.gmra.mxu2 %v3691_v59  ;;  %v3604_v7 = vmul.f32 %v6812_v16, %v3568_v63  ;;  %v5255_v63 = vunpack.c.h.bf16 %v5303_v17 }
 0x40b   : > { %v4022_v47 = vmax.f32 %v3990_v23, 0.0  ;;  %v3640_v37 = vadd.f32 %v6822_v12, %v3604_v7 }
 0x40c   : > { %v3526_v15 = vpop.f32.mrf.mxu1  ;;  %v3784_v8 = vpop.f32.mrf.mxu2 }
 0x40d   : > { %4054 = vst [vmem:[%s6952_s26 + $0x28] sm:$0xff] %v4022_v47  ;;  %v3527_v61 = vadd.f32 %v3526_v15, %v3438_v56  ;;  %v3859_v28 = vmul.f32 %v6935_v30, %v3784_v8  ;;  %v3672_v52 = vmax.f32 %v3640_v37, 0.0  ;;  %v3358_v15 = vpop.f32.mrf.mxu3 }
 0x40f   : > { %v3569_v42 = vadd.f32 %v3527_v61, %v2747_v55  ;;  %v3895_v22 = vadd.f32 %v6941_v57, %v3859_v28  ;;  %v3447_v55 = vpop.f32.mrf.mxu0 }
 0x411   : > { %v3605_v18 = vmul.f32 %v6812_v16, %v3569_v42  ;;  %v3991_v4 = vadd.f32 %v5250_v50, %v3895_v22  ;;  %v5304_v50 = vld [vmem:[%s5813_s2 + $0x28] sm:$0xff]   ;;  %v3448_v42 = vadd.f32 %v3447_v55, %v3358_v15 }
 0x413   : > { %v4023_v0 = vmax.f32 %v3991_v4, 0.0  ;;  %v3641_v45 = vadd.f32 %v6822_v12, %v3605_v18 }
 0x414   : > { %v3529_v43 = vpop.f32.mrf.mxu1  ;;  %v3786_v33 = vpop.f32.mrf.mxu2 }
 0x415   : > { %4055 = vst [vmem:[%s6952_s26 + $0x30] sm:$0xff] %v4023_v0  ;;  %v3530_v48 = vadd.f32 %v3529_v43, %v3441_v6  ;;  %v3860_v20 = vmul.f32 %v6935_v30, %v3786_v33  ;;  %v3673_v14 = vmax.f32 %v3641_v45, 0.0  ;;  %v5258_v45 = vunpack.c.l.bf16 %v5304_v50  ;;  %v3361_v43 = vpop.f32.mrf.mxu3 }
 0x417   : > { %v3896_v39 = vadd.f32 %v6941_v57, %v3860_v20  ;;  %v3692_v35 = vpack.c.bf16 %v3673_v14, %v3672_v52  ;;  %v3570_v21 = vadd.f32 %v3530_v48, %v6772_v10  ;;  %v5254_v10 = vunpack.c.l.bf16 %v5303_v17 }
 0x419   : > { %v3992_v3 = vadd.f32 %v5251_v31, %v3896_v39  ;;  %3828 = vmatmul.bf16.gmra.mxu2 %v3692_v35  ;;  %v3606_v13 = vmul.f32 %v6812_v16, %v3570_v21 }
 0x41b   : > { %v4024_v27 = vmax.f32 %v3992_v3, 0.0  ;;  %v3642_v38 = vadd.f32 %v6822_v12, %v3606_v13  ;;  %v5259_v3 = vunpack.c.h.bf16 %v5304_v50 }
 0x41c   : > { %v3531_v5 = vpop.f32.mrf.mxu1  ;;  %v3789_v51 = vpop.f32.mrf.mxu2 }
 0x41d   : > { %4056 = vst [vmem:[%s6952_s26 + $0x38] sm:$0xff] %v4024_v27  ;;  %v3532_v1 = vadd.f32 %v3531_v5, %v3443_v32  ;;  %v3861_v40 = vmul.f32 %v6935_v30, %v3789_v51  ;;  %v3674_v56 = vmax.f32 %v3642_v38, 0.0  ;;  %v3363_v49 = vpop.f32.mrf.mxu3  ;;  %v7214_v5 = vld [vmem:[#allocation21_spill] sm:$0xff] }
 0x41f   : > { %v3571_v44 = vadd.f32 %v3532_v1, %v2752_v11  ;;  %v3897_v34 = vadd.f32 %v6941_v57, %v3861_v40  ;;  %v5305_v1 = vld [vmem:[%s5813_s2 + $0x30] sm:$0xff]  }
 0x420   : > { %v5263_v15 = vunpack.c.h.bf16 %v5305_v1 }
 0x421   : > { %v3607_v25 = vmul.f32 %v6812_v16, %v3571_v44  ;;  %v3993_v36 = vadd.f32 %v5254_v10, %v3897_v34  ;;  %v7215_v44 = vld [vmem:[#allocation20_spill] sm:$0xff] }
 0x422   : > { %v2762_v34 = vadd.f32 %v6929_v29, %v7215_v44  ;;  %v5309_v44 = vld [vmem:[%s5813_s2 + $0x50] sm:$0xff]  }
 0x423   : > { %v4025_v54 = vmax.f32 %v3993_v36, 0.0  ;;  %v3643_v24 = vadd.f32 %v6822_v12, %v3607_v25 }
 0x424   : > { %v3534_v19 = vpop.f32.mrf.mxu1  ;;  %v3791_v59 = vpop.f32.mrf.mxu2 }
 0x425   : > { %4057 = vst [vmem:[%s6952_s26 + $0x40] sm:$0xff] %v4025_v54  ;;  %v3535_v23 = vadd.f32 %v3534_v19, %v3446_v26  ;;  %v3862_v58 = vmul.f32 %v6935_v30, %v3791_v59  ;;  %v3675_v47 = vmax.f32 %v3643_v24, 0.0  ;;  %v5262_v24 = vunpack.c.l.bf16 %v5305_v1 }
 0x427   : > { %v3898_v8 = vadd.f32 %v6941_v57, %v3862_v58  ;;  %v3693_v7 = vpack.c.bf16 %v3675_v47, %v3674_v56  ;;  %v3572_v61 = vadd.f32 %v3535_v23, %v6786_v53  ;;  %v3450_v53 = vpop.f32.mrf.mxu0 }
 0x428   : > { %v3451_v48 = vadd.f32 %v3450_v53, %v3361_v43  ;;  %v5307_v53 = vld [vmem:[%s5813_s2 + $0x40] sm:$0xff]  }
 0x429   : > { %v3994_v28 = vadd.f32 %v5255_v63, %v3898_v8  ;;  %3833 = vmatmul.bf16.gmra.mxu2 %v3693_v7  ;;  %v3608_v37 = vmul.f32 %v6812_v16, %v3572_v61 }
 0x42b   : > { %v4026_v22 = vmax.f32 %v3994_v28, 0.0  ;;  %v3644_v46 = vadd.f32 %v6822_v12, %v3608_v37 }
 0x42c   : > { %v3536_v18 = vpop.f32.mrf.mxu1  ;;  %v3794_v4 = vpop.f32.mrf.mxu2 }
 0x42d   : > { %4058 = vst [vmem:[%s6952_s26 + $0x48] sm:$0xff] %v4026_v22  ;;  %v3537_v6 = vadd.f32 %v3536_v18, %v3448_v42  ;;  %v3863_v0 = vmul.f32 %v6935_v30, %v3794_v4  ;;  %v3676_v32 = vmax.f32 %v3644_v46, 0.0 }
 0x42f   : > { %v3573_v33 = vadd.f32 %v3537_v6, %v2757_v60  ;;  %v3899_v31 = vadd.f32 %v6941_v57, %v3863_v0  ;;  %v3452_v11 = vpop.f32.mrf.mxu0 }
 0x430   : > { %v3453_v40 = vadd.f32 %v3452_v11, %v3363_v49 }
 0x431   : > { %v3609_v20 = vmul.f32 %v6812_v16, %v3573_v33  ;;  %v3995_v52 = vadd.f32 %v5258_v45, %v3899_v31 }
 0x433   : > { %v4027_v14 = vmax.f32 %v3995_v52, 0.0  ;;  %v3645_v39 = vadd.f32 %v6822_v12, %v3609_v20  ;;  %v5270_v20 = vunpack.c.l.bf16 %v5307_v53 }
 0x434   : > { %v3539_v35 = vpop.f32.mrf.mxu1  ;;  %v3796_v21 = vpop.f32.mrf.mxu2 }
 0x435   : > { %4059 = vst [vmem:[%s6952_s26 + $0x50] sm:$0xff] %v4027_v14  ;;  %v3540_v17 = vadd.f32 %v3539_v35, %v3451_v48  ;;  %v3864_v9 = vmul.f32 %v6935_v30, %v3796_v21  ;;  %v3677_v41 = vmax.f32 %v3645_v39, 0.0  ;;  %v5271_v21 = vunpack.c.h.bf16 %v5307_v53 }
 0x437   : > { %v3900_v27 = vadd.f32 %v6941_v57, %v3864_v9  ;;  %v3694_v62 = vpack.c.bf16 %v3677_v41, %v3676_v32  ;;  %v3574_v51 = vadd.f32 %v3540_v17, %v7214_v5  ;;  %v5308_v9 = vld [vmem:[%s5813_s2 + $0x48] sm:$0xff]  }
 0x438   : > { %v5275_v1 = vunpack.c.h.bf16 %v5308_v9 }
 0x439   : > { %v3996_v13 = vadd.f32 %v5259_v3, %v3900_v27  ;;  %3838 = vmatmul.bf16.gmra.mxu2 %v3694_v62  ;;  %v3610_v38 = vmul.f32 %v6812_v16, %v3574_v51  ;;  %v5274_v62 = vunpack.c.l.bf16 %v5308_v9 }
 0x43b   : > { %v4028_v10 = vmax.f32 %v3996_v13, 0.0  ;;  %v3646_v58 = vadd.f32 %v6822_v12, %v3610_v38  ;;  %v5278_v38 = vunpack.c.l.bf16 %v5309_v44 }
 0x43c   : > { %v3541_v25 = vpop.f32.mrf.mxu1  ;;  %v3799_v36 = vpop.f32.mrf.mxu2 }
 0x43d   : > { %4060 = vst [vmem:[%s6952_s26 + $0x58] sm:$0xff] %v4028_v10  ;;  %v3542_v26 = vadd.f32 %v3541_v25, %v3453_v40  ;;  %v3865_v54 = vmul.f32 %v6935_v30, %v3799_v36  ;;  %v3678_v8 = vmax.f32 %v3646_v58, 0.0 }
 0x43f   : > { %v3575_v19 = vadd.f32 %v3542_v26, %v2762_v34  ;;  %v3901_v59 = vadd.f32 %v6941_v57, %v3865_v54 }
 0x441   : > { %v3611_v63 = vmul.f32 %v6812_v16, %v3575_v19  ;;  %v3997_v23 = vadd.f32 %v5262_v24, %v3901_v59  ;;  %v5306_v16 = vld [vmem:[%s5813_s2 + $0x38] sm:$0xff]  }
 0x442   : > { %v5266_v2 = vunpack.c.l.bf16 %v5306_v16  ;;  %v5267_v0 = vunpack.c.h.bf16 %v5306_v16 }
 0x443   : > { %v4029_v29 = vmax.f32 %v3997_v23, 0.0  ;;  %v3647_v56 = vadd.f32 %v6822_v12, %v3611_v63  ;;  %v5279_v63 = vunpack.c.h.bf16 %v5309_v44 }
 0x444   : > { %v3801_v47 = vpop.f32.mrf.mxu2 }
 0x445   : > { %4061 = vst [vmem:[%s6952_s26 + $0x60] sm:$0xff] %v4029_v29  ;;  %v3866_v55 = vmul.f32 %v6935_v30, %v3801_v47  ;;  %v3679_v7 = vmax.f32 %v3647_v56, 0.0  ;;  %v5310_v29 = vld [vmem:[%s5813_s2 + $0x58] sm:$0xff]  }
 0x446   : > { %v5283_v16 = vunpack.c.h.bf16 %v5310_v29 }
 0x447   : > { %v3902_v61 = vadd.f32 %v6941_v57, %v3866_v55  ;;  %v3695_v28 = vpack.c.bf16 %v3679_v7, %v3678_v8 }
 0x449   : > { %v3998_v50 = vadd.f32 %v5263_v15, %v3902_v61  ;;  %3843 = vmatmul.bf16.gmra.mxu2 %v3695_v28  ;;  %v5282_v15 = vunpack.c.l.bf16 %v5310_v29 }
 0x44b   : > { %v4030_v42 = vmax.f32 %v3998_v50, 0.0 }
 0x44c   : > { %v3804_v22 = vpop.f32.mrf.mxu2 }
 0x44d   : > { %4062 = vst [vmem:[%s6952_s26 + $0x68] sm:$0xff] %v4030_v42  ;;  %v3867_v12 = vmul.f32 %v6935_v30, %v3804_v22 }
 0x44f   : > { %v3903_v60 = vadd.f32 %v6941_v57, %v3867_v12  ;;  %v5311_v12 = vld [vmem:[%s5813_s2 + $0x60] sm:$0xff]  }
 0x450   : > { %v5287_v53 = vunpack.c.h.bf16 %v5311_v12 }
 0x451   : > { %v3999_v18 = vadd.f32 %v5266_v2, %v3903_v60 }
 0x453   : > { %v4031_v4 = vmax.f32 %v3999_v18, 0.0 }
 0x454   : > { %v3806_v37 = vpop.f32.mrf.mxu2 }
 0x455   : > { %4063 = vst [vmem:[%s6952_s26 + $0x70] sm:$0xff] %v4031_v4  ;;  %v3868_v6 = vmul.f32 %v6935_v30, %v3806_v37  ;;  %v5286_v4 = vunpack.c.l.bf16 %v5311_v12 }
 0x457   : > { %v3904_v45 = vadd.f32 %v6941_v57, %v3868_v6 }
 0x459   : > { %v4000_v43 = vadd.f32 %v5267_v0, %v3904_v45 }
 0x45b   : > { %v4032_v33 = vmax.f32 %v4000_v43, 0.0 }
 0x45c   : > { %v3809_v31 = vpop.f32.mrf.mxu2 }
 0x45d   : > { %4064 = vst [vmem:[%s6952_s26 + $0x78] sm:$0xff] %v4032_v33  ;;  %v3869_v48 = vmul.f32 %v6935_v30, %v3809_v31 }
 0x45f   : > { %v3905_v52 = vadd.f32 %v6941_v57, %v3869_v48  ;;  %v5312_v48 = vld [vmem:[%s5813_s2 + $0x68] sm:$0xff]  }
 0x460   : > { %v5291_v9 = vunpack.c.h.bf16 %v5312_v48 }
 0x461   : > { %v4001_v46 = vadd.f32 %v5270_v20, %v3905_v52 }
 0x463   : > { %v4033_v14 = vmax.f32 %v4001_v46, 0.0 }
 0x464   : > { %v3811_v39 = vpop.f32.mrf.mxu2 }
 0x465   : > { %4065 = vst [vmem:[%s6952_s26 + $0x80] sm:$0xff] %v4033_v14  ;;  %v3870_v35 = vmul.f32 %v6935_v30, %v3811_v39  ;;  %v5290_v14 = vunpack.c.l.bf16 %v5312_v48 }
 0x467   : > { %v3906_v3 = vadd.f32 %v6941_v57, %v3870_v35 }
 0x469   : > { %v4002_v17 = vadd.f32 %v5271_v21, %v3906_v3 }
 0x46b   : > { %v4034_v32 = vmax.f32 %v4002_v17, 0.0 }
 0x46c   : > { %v3814_v41 = vpop.f32.mrf.mxu2 }
 0x46d   : > { %4066 = vst [vmem:[%s6952_s26 + $0x88] sm:$0xff] %v4034_v32  ;;  %v3871_v27 = vmul.f32 %v6935_v30, %v3814_v41 }
 0x46f   : > { %v3907_v49 = vadd.f32 %v6941_v57, %v3871_v27  ;;  %v5313_v27 = vld [vmem:[%s5813_s2 + $0x70] sm:$0xff]  }
 0x470   : > { %v5295_v44 = vunpack.c.h.bf16 %v5313_v27 }
 0x471   : > { %v4003_v11 = vadd.f32 %v5274_v62, %v3907_v49 }
 0x473   : > { %v4035_v5 = vmax.f32 %v4003_v11, 0.0 }
 0x474   : > { %v3816_v51 = vpop.f32.mrf.mxu2 }
 0x475   : > { %4067 = vst [vmem:[%s6952_s26 + $0x90] sm:$0xff] %v4035_v5  ;;  %v3872_v13 = vmul.f32 %v6935_v30, %v3816_v51  ;;  %v5294_v5 = vunpack.c.l.bf16 %v5313_v27 }
 0x477   : > { %v3908_v40 = vadd.f32 %v6941_v57, %v3872_v13 }
 0x479   : > { %v4004_v10 = vadd.f32 %v5275_v1, %v3908_v40 }
 0x47b   : > { %v4036_v34 = vmax.f32 %v4004_v10, 0.0 }
 0x47c   : > { %v3819_v25 = vpop.f32.mrf.mxu2 }
 0x47d   : > { %4068 = vst [vmem:[%s6952_s26 + $0x98] sm:$0xff] %v4036_v34  ;;  %v3873_v36 = vmul.f32 %v6935_v30, %v3819_v25 }
 0x47f   : > { %v3909_v26 = vadd.f32 %v6941_v57, %v3873_v36  ;;  %v5314_v36 = vld [vmem:[%s5813_s2 + $0x78] sm:$0xff]   ;;  %s4094_s2 = sshll.u32 %s6952_s26, 4  ;;  %s4095_s2 = int_to_ptr.vmem [resolvable:$true] %s4094_s2 }
 0x480   : > { %v5299_v29 = vunpack.c.h.bf16 %v5314_v36 }
 0x481   : > { %v4005_v54 = vadd.f32 %v5278_v38, %v3909_v26 }
 0x483   : > { %v4037_v24 = vmax.f32 %v4005_v54, 0.0 }
 0x484   : > { %v3821_v19 = vpop.f32.mrf.mxu2 }
 0x485   : > { %4069 = vst [vmem:[%s6952_s26 + $0xa0] sm:$0xff] %v4037_v24  ;;  %v3874_v59 = vmul.f32 %v6935_v30, %v3821_v19  ;;  %v5298_v24 = vunpack.c.l.bf16 %v5314_v36 }
 0x487   : > { %v3910_v23 = vadd.f32 %v6941_v57, %v3874_v59 }
 0x489   : > { %v4006_v58 = vadd.f32 %v5279_v63, %v3910_v23 }
 0x48b   : > { %v4038_v56 = vmax.f32 %v4006_v58, 0.0 }
 0x48c   : > { %v3824_v47 = vpop.f32.mrf.mxu2 }
 0x48d   : > { %4070 = vst [vmem:[%s6952_s26 + $0xa8] sm:$0xff] %v4038_v56  ;;  %v3875_v55 = vmul.f32 %v6935_v30, %v3824_v47 }
 0x48f   : > { %v3911_v8 = vadd.f32 %v6941_v57, %v3875_v55 }
 0x491   : > { %v4007_v7 = vadd.f32 %v5282_v15, %v3911_v8 }
 0x493   : > { %v4039_v61 = vmax.f32 %v4007_v7, 0.0 }
 0x494   : > { %v3826_v28 = vpop.f32.mrf.mxu2 }
 0x495   : > { %4071 = vst [vmem:[%s6952_s26 + $0xb0] sm:$0xff] %v4039_v61  ;;  %v3876_v50 = vmul.f32 %v6935_v30, %v3826_v28 }
 0x497   : > { %v3912_v42 = vadd.f32 %v6941_v57, %v3876_v50 }
 0x499   : > { %v4008_v22 = vadd.f32 %v5283_v16, %v3912_v42 }
 0x49b   : > { %v4040_v2 = vmax.f32 %v4008_v22, 0.0 }
 0x49c   : > { %v3829_v60 = vpop.f32.mrf.mxu2 }
 0x49d   : > { %4072 = vst [vmem:[%s6952_s26 + $0xb8] sm:$0xff] %v4040_v2  ;;  %v3877_v18 = vmul.f32 %v6935_v30, %v3829_v60 }
 0x49f   : > { %v3913_v37 = vadd.f32 %v6941_v57, %v3877_v18 }
 0x4a1   : > { %v4009_v6 = vadd.f32 %v5286_v4, %v3913_v37 }
 0x4a3   : > { %v4041_v0 = vmax.f32 %v4009_v6, 0.0 }
 0x4a4   : > { %v3831_v45 = vpop.f32.mrf.mxu2 }
 0x4a5   : > { %4073 = vst [vmem:[%s6952_s26 + $0xc0] sm:$0xff] %v4041_v0  ;;  %v3878_v43 = vmul.f32 %v6935_v30, %v3831_v45 }
 0x4a7   : > { %v3914_v33 = vadd.f32 %v6941_v57, %v3878_v43 }
 0x4a9   : > { %v4010_v31 = vadd.f32 %v5287_v53, %v3914_v33 }
 0x4ab   : > { %v4042_v20 = vmax.f32 %v4010_v31, 0.0 }
 0x4ac   : > { %v3834_v52 = vpop.f32.mrf.mxu2 }
 0x4ad   : > { %4074 = vst [vmem:[%s6952_s26 + $0xc8] sm:$0xff] %v4042_v20  ;;  %v3879_v46 = vmul.f32 %v6935_v30, %v3834_v52 }
 0x4af   : > { %v3915_v39 = vadd.f32 %v6941_v57, %v3879_v46 }
 0x4b1   : > { %v4011_v35 = vadd.f32 %v5290_v14, %v3915_v39 }
 0x4b3   : > { %v4043_v21 = vmax.f32 %v4011_v35, 0.0 }
 0x4b4   : > { %v3836_v3 = vpop.f32.mrf.mxu2 }
 0x4b5   : > { %4075 = vst [vmem:[%s6952_s26 + $0xd0] sm:$0xff] %v4043_v21  ;;  %v3880_v17 = vmul.f32 %v6935_v30, %v3836_v3 }
 0x4b7   : > { %v3916_v32 = vadd.f32 %v6941_v57, %v3880_v17 }
 0x4b9   : > { %v4012_v41 = vadd.f32 %v5291_v9, %v3916_v32 }
 0x4bb   : > { %v4044_v62 = vmax.f32 %v4012_v41, 0.0 }
 0x4bc   : > { %v3839_v49 = vpop.f32.mrf.mxu2 }
 0x4bd   : > { %4076 = vst [vmem:[%s6952_s26 + $0xd8] sm:$0xff] %v4044_v62  ;;  %v3881_v11 = vmul.f32 %v6935_v30, %v3839_v49 }
 0x4bf   : > { %v3917_v51 = vadd.f32 %v6941_v57, %v3881_v11 }
 0x4c1   : > { %v4013_v13 = vadd.f32 %v5294_v5, %v3917_v51 }
 0x4c3   : > { %v4045_v1 = vmax.f32 %v4013_v13, 0.0 }
 0x4c4   : > { %v3841_v40 = vpop.f32.mrf.mxu2 }
 0x4c5   : > { %4077 = vst [vmem:[%s6952_s26 + $0xe0] sm:$0xff] %v4045_v1  ;;  %v3882_v10 = vmul.f32 %v6935_v30, %v3841_v40 }
 0x4c7   : > { %v3918_v34 = vadd.f32 %v6941_v57, %v3882_v10 }
 0x4c9   : > { %v4014_v25 = vadd.f32 %v5295_v44, %v3918_v34 }
 0x4cb   : > { %v4046_v38 = vmax.f32 %v4014_v25, 0.0 }
 0x4cc   : > { %v3844_v26 = vpop.f32.mrf.mxu2 }
 0x4cd   : > { %4078 = vst [vmem:[%s6952_s26 + $0xe8] sm:$0xff] %v4046_v38  ;;  %v3883_v54 = vmul.f32 %v6935_v30, %v3844_v26 }
 0x4cf   : > { %v3919_v19 = vadd.f32 %v6941_v57, %v3883_v54 }
 0x4d1   : > { %v4015_v59 = vadd.f32 %v5298_v24, %v3919_v19 }
 0x4d3   : > { %v4047_v63 = vmax.f32 %v4015_v59, 0.0 }
 0x4d4   : > { %v3846_v23 = vpop.f32.mrf.mxu2 }
 0x4d5   : > { %4079 = vst [vmem:[%s6952_s26 + $0xf0] sm:$0xff] %v4047_v63  ;;  %v3884_v58 = vmul.f32 %v6935_v30, %v3846_v23 }
 0x4d7   : > { %v3920_v56 = vadd.f32 %v6941_v57, %v3884_v58 }
 0x4d9   : > { %v4016_v47 = vadd.f32 %v5299_v29, %v3920_v56 }
 0x4db   : > { %v4048_v55 = vmax.f32 %v4016_v47, 0.0 }
 0x4dd   : > { %4080 = vst [vmem:[%s6952_s26 + $0xf8] sm:$0xff] %v4048_v55 }
 0x4de   : > { %5576 = shalt.err (!%p5573_p10)
}
 0x4df   : > { %s5631_s1 = smov 128   ;;  %s5632_s26 = smov 8  }
 0x4e0   : > { %5353 = dma.vmem_to_hbm [thread:$0]  (%p5779_p3), %s4095_s2, 4096, %s4097_s21, %s4082_s17, %s5631_s1, %s5631_s1, %s5632_s26  }
 0x4e1 PF: > { %s4111_s22 = sand.u32 1, %s5611_s13   ;;  %p7216_p12 = scmp.ge.s32.totalorder %s5623_s16, 2 }
 0x4e2   : > { %s4112_s27 = scalar_lea.sflag [#allocation5], %s4111_s22 }
 0x4e3   : > { %p5370_p13 = pnand %p7216_p12, %p5723_p6 }
 0x4e5   : > { %p5371_p0 = pneg %p5370_p13 }
 0x4e7   : > { %5606 = dma.done.wait (%p5371_p0), %s4112_s27, 4096  }
 0x4e8   : > { %5608 = vsyncadd (%p5371_p0), %s4112_s27, 4294963200  ;;  %s7217_s23 = sld [smem:[#allocation16_spill]]  ;;  %p25_p5 = scmp.ge.s32.totalorder %s5761_s29, 4  }
 0x4e9   : > { %s7218_s13 = smov %s5615_s14  ;;  %s7219_s14 = smov %s5619_s15 }
 0x4ea   : > { %s7221_s16 = smov %s5761_s29  ;;  %27 = sbr.rel (!%p25_p5) target bundleno = 11 (0xb), region = 119 }
 0x4ee   : > { %s7220_s15 = smov %s7217_s23 }
 0x4ef   :  { %4118 = vsyncpa [#allocation4], 1 }
 0x4f0   :  { %4120 = vsyncpa [#allocation4 + $0x1], 1 }
 0x4f1   :  { %4121 = vsyncpa [#allocation7], 1 }
 0x4f2   :  { %4122 = vsyncpa [#allocation10], 1 }
 0x4f3   :  { %4123 = vsyncpa [#allocation5], 1 }
 0x4f4   :  { %4125 = vsyncpa [#allocation5 + $0x1], 1 }

</bundles_post_ra>
